<compile_context>
chip_gen: v7x
topology: tpu7x:2x2x1
jax: 0.10.0
libtpu: 0.0.40
codegen_flags: <defaults>
</compile_context>

<pallas_src>
import functools
import math

import jax
import jax.numpy as jnp
from jax.experimental import pallas as pl
from jax.experimental.pallas import tpu as pltpu


def _round_up(x, m):
    return (x + m - 1) // m * m


def _vmem_block_bytes(shape, dtype):
    """Physical VMEM footprint of a block: last two dims pad to the
    (sublane, lane) tile -- (8,128) for 4-byte, (16,128) for 2-byte dtypes."""
    itemsize = jnp.dtype(dtype).itemsize
    sublane = 8 * (4 // itemsize)
    lead = 1
    for d in shape[:-2]:
        lead *= d
    return lead * _round_up(shape[-2], sublane) * _round_up(shape[-1], 128) * itemsize


# ----------------------------- Pallas kernel --------------------------------
def _conv_bn_relu_kernel(x_ref, w_ref, scale_ref, shift_ref, o_ref, *,
                         ksize_h, ksize_w, tile_h, out_w):
    # x_ref:     (TH+KH-1, Wp, Cin)  bf16  halo row-block of the padded input
    # w_ref:     (KH, KW, Cin, Cp)   bf16  conv weights (VMEM resident)
    # scale_ref: (1, Cp)             f32   BN scale = gamma / sqrt(var + eps)
    # shift_ref: (1, Cp)             f32   BN shift = beta - mean * scale
    # o_ref:     (TH*Wo, Cp)         bf16  output rows (lane-dense store)
    tm = tile_h * out_w
    cin = x_ref.shape[-1]
    cp = o_ref.shape[-1]

    acc = jnp.zeros((tm, cp), jnp.float32)
    # Taps unrolled: implicit im2col -- the shifted windows never touch HBM.
    for kh in range(ksize_h):
        for kw in range(ksize_w):
            xs = x_ref[kh:kh + tile_h, kw:kw + out_w, :].reshape(tm, cin)
            acc += jnp.dot(xs, w_ref[kh, kw],
                           preferred_element_type=jnp.float32)

    y = acc * scale_ref[...] + shift_ref[...]      # BN applied on the f32 acc
    o_ref[...] = jnp.maximum(y, 0.0).astype(o_ref.dtype)


# ------------------------------- wrapper -------------------------------------
@functools.partial(jax.jit, static_argnames=("stride", "padding", "eps"))
def conv_block_forward(x_nchw, weight, gamma, beta, run_mean, run_var,
                       *, stride=1, padding=1, eps=1e-5):
    N, Cin, H, W = x_nchw.shape
    Cout, Cin_w, KH, KW = weight.shape
    assert Cin_w == Cin
    # TODO(synk): stride > 1 needs strided in-kernel windows (pl.ds stride) or
    # a GEMM fallback; the ConvBlock configuration under test uses stride=1.
    assert stride == 1, "fused Pallas ConvBlock path implements stride=1"

    Ho = H + 2 * padding - KH + 1
    Wo = W + 2 * padding - KW + 1
    assert Ho > 0 and Wo > 0
    Wp = W + 2 * padding
    Cp = _round_up(Cout, 128)

    # ---- choose the output-row tile height TH --------------------------------
    gran = 8 // math.gcd(Wo, 8)                    # ensures (TH*Wo) % 8 == 0
    th = min(_round_up(Ho, gran),                  # never taller than padded Ho
             _round_up(max(1, -(-512 // Wo)), gran))   # target ~512-row M tiles
    th = max(th, gran)

    # keep >= 2 parallel grid blocks when possible (megacore / 2 TCs on v7x)
    if N * (_round_up(Ho, th) // th) < 2:
        th_half = max(gran, _round_up(-(-Ho // 2), gran))
        if th_half < th:
            th = th_half

    # shrink TH until the working set fits a v7x-safe VMEM budget
    def vmem_estimate(th_):
        th_in_ = th_ + KH - 1
        tm_ = th_ * Wo
        return (2 * _vmem_block_bytes((th_in_, Wp, Cin), jnp.bfloat16)   # x (2-buf)
                + 2 * _vmem_block_bytes((tm_, Cp), jnp.bfloat16)         # out (2-buf)
                + _vmem_block_bytes((KH, KW, Cin, Cp), jnp.bfloat16)     # weights
                + 2 * _vmem_block_bytes((1, Cp), jnp.float32)            # scale/shift
                + _vmem_block_bytes((tm_, Cp), jnp.float32)              # f32 acc
                + 2 * _vmem_block_bytes((tm_, Cin), jnp.bfloat16))       # tap staging

    budget = 36 * 2**20
    while vmem_estimate(th) > budget and th > gran:
        th = max(gran, _round_up(th // 2, gran))

    th_in = th + KH - 1
    tm = th * Wo
    ho_pad = _round_up(Ho, th)
    nrb = ho_pad // th
    nb = N * nrb

    # ---- BN (eval mode) affine, kept in f32 ----------------------------------
    scale = (gamma / jnp.sqrt(run_var + eps)).astype(jnp.float32)
    shift = (beta - run_mean * scale).astype(jnp.float32)
    scale_p = jnp.pad(scale, (0, Cp - Cout)).reshape(1, Cp)
    shift_p = jnp.pad(shift, (0, Cp - Cout)).reshape(1, Cp)

    # ---- weights: (Cout, Cin, KH, KW) -> (KH, KW, Cin, Cp) bf16 ---------------
    w = jnp.transpose(weight, (2, 3, 1, 0))
    w = jnp.pad(w, ((0, 0), (0, 0), (0, 0), (0, Cp - Cout))).astype(jnp.bfloat16)

    # ---- input: NCHW -> padded NHWC bf16, halo-duplicated row blocks ----------
    # TODO(synk): keeping the surrounding model NHWC would drop this transpose.
    x = jnp.transpose(x_nchw, (0, 2, 3, 1)).astype(jnp.bfloat16)
    extra_rows = ho_pad - Ho
    x = jnp.pad(x, ((0, 0), (padding, padding + extra_rows),
                    (padding, padding), (0, 0)))
    row_idx = (jnp.arange(nrb) * th)[:, None] + jnp.arange(th_in)[None, :]
    x_blocks = x[:, row_idx, :, :].reshape(nb, th_in, Wp, Cin)

    vmem_limit = int(min(max(vmem_estimate(th) * 3 // 2, 32 * 2**20), 56 * 2**20))

    kernel = functools.partial(_conv_bn_relu_kernel, ksize_h=KH, ksize_w=KW,
                               tile_h=th, out_w=Wo)
    out = pl.pallas_call(
        kernel,
        out_shape=jax.ShapeDtypeStruct((nb * tm, Cp), jnp.bfloat16),
        grid_spec=pltpu.PrefetchScalarGridSpec(
            num_scalar_prefetch=0,
            grid=(nb,),
            in_specs=[
                pl.BlockSpec((None, th_in, Wp, Cin), lambda b: (b, 0, 0, 0)),
                pl.BlockSpec((KH, KW, Cin, Cp), lambda b: (0, 0, 0, 0)),
                pl.BlockSpec((1, Cp), lambda b: (0, 0)),
                pl.BlockSpec((1, Cp), lambda b: (0, 0)),
            ],
            out_specs=pl.BlockSpec((tm, Cp), lambda b: (b, 0)),
        ),
        compiler_params=pltpu.CompilerParams(
            dimension_semantics=("parallel",),
            vmem_limit_bytes=vmem_limit),
    )(x_blocks, w, scale_p, shift_p)

    out = out.reshape(N, ho_pad, Wo, Cp)[:, :Ho, :, :Cout]           # bf16 NHWC
    return jnp.transpose(out, (0, 3, 1, 2)).astype(jnp.float32)      # f32 NCHW


# ------------------------------- reference -----------------------------------
def _reference(x_nchw, weight, gamma, beta, run_mean, run_var,
               stride=1, padding=1, eps=1e-5):
    y = jax.lax.conv_general_dilated(
        x_nchw, weight, window_strides=(stride, stride),
        padding=[(padding, padding), (padding, padding)],
        dimension_numbers=("NCHW", "OIHW", "NCHW"))
    scale = gamma / jnp.sqrt(run_var + eps)
    shift = beta - run_mean * scale
    y = y * scale[None, :, None, None] + shift[None, :, None, None]
    return jnp.maximum(y, 0.0)


# --------------------------------- main ---------------------------------------
if __name__ == "__main__":
    key = jax.random.PRNGKey(0)
    k_x, k_w, k_g, k_b, k_m, k_v = jax.random.split(key, 6)

    N, Cin, H, W = 2, 4, 16, 16
    Cout, KH, KW = 8, 3, 3
    stride, padding = 1, 1

    x = jax.random.normal(k_x, (N, Cin, H, W), dtype=jnp.float32)
    weight = 0.1 * jax.random.normal(k_w, (Cout, Cin, KH, KW), dtype=jnp.float32)
    gamma = 1.0 + 0.1 * jax.random.normal(k_g, (Cout,), dtype=jnp.float32)
    beta = 0.1 * jax.random.normal(k_b, (Cout,), dtype=jnp.float32)
    run_mean = 0.05 * jax.random.normal(k_m, (Cout,), dtype=jnp.float32)
    run_var = jnp.abs(1.0 + 0.1 * jax.random.normal(k_v, (Cout,), dtype=jnp.float32))

    out = conv_block_forward(x, weight, gamma, beta, run_mean, run_var,
                             stride=stride, padding=padding)
    out = jax.block_until_ready(out)

    ref = _reference(x, weight, gamma, beta, run_mean, run_var,
                     stride=stride, padding=padding)
    assert out.shape == (N, Cout, H, W), out.shape
    # bf16 operands / bf16 output (f32 accumulation & BN) vs f32 reference.
    max_err = float(jnp.max(jnp.abs(out - ref)))
    assert jnp.allclose(out, ref, atol=2e-2, rtol=2e-2), max_err

    print("KERNEL_OK")
</pallas_src>

<mosaic_0001>
module attributes {stable_mosaic.version = 11 : i64} {
  func.func @_conv_bn_relu_kernel(%arg0: i32, %arg1: memref<1x18x18x4xbf16, #tpu.memory_space<vmem>>, %arg2: memref<3x3x4x128xbf16, #tpu.memory_space<vmem>>, %arg3: memref<1x128xf32, #tpu.memory_space<vmem>>, %arg4: memref<1x128xf32, #tpu.memory_space<vmem>>, %arg5: memref<256x128xbf16, #tpu.memory_space<vmem>>) attributes {dimension_semantics = [#tpu.dimension_semantics<parallel>], iteration_bounds = array<i64: 2>, scalar_prefetch = 0 : i64, scratch_operands = 0 : i64, tpu.core_type = #tpu.core_type<tc>, window_params = [{transform_indices = @transform_0, window_bounds = array<i64: 1, 18, 18, 4>}, {pipeline_mode = #tpu.pipeline_mode<synchronous>, transform_indices = @transform_1, window_bounds = array<i64: 3, 3, 4, 128>}, {pipeline_mode = #tpu.pipeline_mode<synchronous>, transform_indices = @transform_2, window_bounds = array<i64: 1, 128>}, {pipeline_mode = #tpu.pipeline_mode<synchronous>, transform_indices = @transform_3, window_bounds = array<i64: 1, 128>}, {transform_indices = @transform_4, window_bounds = array<i64: 256, 128>}]} {
    %cst = arith.constant 0.000000e+00 : f32
    %0 = vector.broadcast %cst : f32 to vector<256x128xf32>
    %c0 = arith.constant 0 : index
    %c0_0 = arith.constant 0 : index
    %c0_1 = arith.constant 0 : index
    %c0_2 = arith.constant 0 : index
    %1 = vector.load %arg1[%c0, %c0_0, %c0_1, %c0_2] : memref<1x18x18x4xbf16, #tpu.memory_space<vmem>>, vector<1x16x16x4xbf16>
    %2 = vector.shape_cast %1 : vector<1x16x16x4xbf16> to vector<16x16x4xbf16>
    %3 = vector.shape_cast %2 : vector<16x16x4xbf16> to vector<256x4xbf16>
    %c0_3 = arith.constant 0 : index
    %c0_4 = arith.constant 0 : index
    %c0_5 = arith.constant 0 : index
    %c0_6 = arith.constant 0 : index
    %4 = vector.load %arg2[%c0_3, %c0_4, %c0_5, %c0_6] : memref<3x3x4x128xbf16, #tpu.memory_space<vmem>>, vector<1x1x4x128xbf16>
    %5 = vector.shape_cast %4 : vector<1x1x4x128xbf16> to vector<4x128xbf16>
    %cst_7 = arith.constant dense<0.000000e+00> : vector<256x128xf32>
    %6 = tpu.matmul %3, %5, %cst_7 {dimension_numbers = #tpu.dot_dimension_numbers<[1], [0], [0], [1], [0, 0, 1, 1], [], []>} : vector<256x4xbf16>, vector<4x128xbf16>, vector<256x128xf32> -> vector<256x128xf32>
    %7 = arith.addf %0, %6 : vector<256x128xf32>
    %c0_8 = arith.constant 0 : index
    %c0_9 = arith.constant 0 : index
    %c1 = arith.constant 1 : index
    %c0_10 = arith.constant 0 : index
    %8 = vector.load %arg1[%c0_8, %c0_9, %c1, %c0_10] : memref<1x18x18x4xbf16, #tpu.memory_space<vmem>>, vector<1x16x16x4xbf16>
    %9 = vector.shape_cast %8 : vector<1x16x16x4xbf16> to vector<16x16x4xbf16>
    %10 = vector.shape_cast %9 : vector<16x16x4xbf16> to vector<256x4xbf16>
    %c0_11 = arith.constant 0 : index
    %c1_12 = arith.constant 1 : index
    %c0_13 = arith.constant 0 : index
    %c0_14 = arith.constant 0 : index
    %11 = vector.load %arg2[%c0_11, %c1_12, %c0_13, %c0_14] : memref<3x3x4x128xbf16, #tpu.memory_space<vmem>>, vector<1x1x4x128xbf16>
    %12 = vector.shape_cast %11 : vector<1x1x4x128xbf16> to vector<4x128xbf16>
    %cst_15 = arith.constant dense<0.000000e+00> : vector<256x128xf32>
    %13 = tpu.matmul %10, %12, %cst_15 {dimension_numbers = #tpu.dot_dimension_numbers<[1], [0], [0], [1], [0, 0, 1, 1], [], []>} : vector<256x4xbf16>, vector<4x128xbf16>, vector<256x128xf32> -> vector<256x128xf32>
    %14 = arith.addf %7, %13 : vector<256x128xf32>
    %c0_16 = arith.constant 0 : index
    %c0_17 = arith.constant 0 : index
    %c2 = arith.constant 2 : index
    %c0_18 = arith.constant 0 : index
    %15 = vector.load %arg1[%c0_16, %c0_17, %c2, %c0_18] : memref<1x18x18x4xbf16, #tpu.memory_space<vmem>>, vector<1x16x16x4xbf16>
    %16 = vector.shape_cast %15 : vector<1x16x16x4xbf16> to vector<16x16x4xbf16>
    %17 = vector.shape_cast %16 : vector<16x16x4xbf16> to vector<256x4xbf16>
    %c0_19 = arith.constant 0 : index
    %c2_20 = arith.constant 2 : index
    %c0_21 = arith.constant 0 : index
    %c0_22 = arith.constant 0 : index
    %18 = vector.load %arg2[%c0_19, %c2_20, %c0_21, %c0_22] : memref<3x3x4x128xbf16, #tpu.memory_space<vmem>>, vector<1x1x4x128xbf16>
    %19 = vector.shape_cast %18 : vector<1x1x4x128xbf16> to vector<4x128xbf16>
    %cst_23 = arith.constant dense<0.000000e+00> : vector<256x128xf32>
    %20 = tpu.matmul %17, %19, %cst_23 {dimension_numbers = #tpu.dot_dimension_numbers<[1], [0], [0], [1], [0, 0, 1, 1], [], []>} : vector<256x4xbf16>, vector<4x128xbf16>, vector<256x128xf32> -> vector<256x128xf32>
    %21 = arith.addf %14, %20 : vector<256x128xf32>
    %c0_24 = arith.constant 0 : index
    %c1_25 = arith.constant 1 : index
    %c0_26 = arith.constant 0 : index
    %c0_27 = arith.constant 0 : index
    %22 = vector.load %arg1[%c0_24, %c1_25, %c0_26, %c0_27] : memref<1x18x18x4xbf16, #tpu.memory_space<vmem>>, vector<1x16x16x4xbf16>
    %23 = vector.shape_cast %22 : vector<1x16x16x4xbf16> to vector<16x16x4xbf16>
    %24 = vector.shape_cast %23 : vector<16x16x4xbf16> to vector<256x4xbf16>
    %c1_28 = arith.constant 1 : index
    %c0_29 = arith.constant 0 : index
    %c0_30 = arith.constant 0 : index
    %c0_31 = arith.constant 0 : index
    %25 = vector.load %arg2[%c1_28, %c0_29, %c0_30, %c0_31] : memref<3x3x4x128xbf16, #tpu.memory_space<vmem>>, vector<1x1x4x128xbf16>
    %26 = vector.shape_cast %25 : vector<1x1x4x128xbf16> to vector<4x128xbf16>
    %cst_32 = arith.constant dense<0.000000e+00> : vector<256x128xf32>
    %27 = tpu.matmul %24, %26, %cst_32 {dimension_numbers = #tpu.dot_dimension_numbers<[1], [0], [0], [1], [0, 0, 1, 1], [], []>} : vector<256x4xbf16>, vector<4x128xbf16>, vector<256x128xf32> -> vector<256x128xf32>
    %28 = arith.addf %21, %27 : vector<256x128xf32>
    %c0_33 = arith.constant 0 : index
    %c1_34 = arith.constant 1 : index
    %c1_35 = arith.constant 1 : index
    %c0_36 = arith.constant 0 : index
    %29 = vector.load %arg1[%c0_33, %c1_34, %c1_35, %c0_36] : memref<1x18x18x4xbf16, #tpu.memory_space<vmem>>, vector<1x16x16x4xbf16>
    %30 = vector.shape_cast %29 : vector<1x16x16x4xbf16> to vector<16x16x4xbf16>
    %31 = vector.shape_cast %30 : vector<16x16x4xbf16> to vector<256x4xbf16>
    %c1_37 = arith.constant 1 : index
    %c1_38 = arith.constant 1 : index
    %c0_39 = arith.constant 0 : index
    %c0_40 = arith.constant 0 : index
    %32 = vector.load %arg2[%c1_37, %c1_38, %c0_39, %c0_40] : memref<3x3x4x128xbf16, #tpu.memory_space<vmem>>, vector<1x1x4x128xbf16>
    %33 = vector.shape_cast %32 : vector<1x1x4x128xbf16> to vector<4x128xbf16>
    %cst_41 = arith.constant dense<0.000000e+00> : vector<256x128xf32>
    %34 = tpu.matmul %31, %33, %cst_41 {dimension_numbers = #tpu.dot_dimension_numbers<[1], [0], [0], [1], [0, 0, 1, 1], [], []>} : vector<256x4xbf16>, vector<4x128xbf16>, vector<256x128xf32> -> vector<256x128xf32>
    %35 = arith.addf %28, %34 : vector<256x128xf32>
    %c0_42 = arith.constant 0 : index
    %c1_43 = arith.constant 1 : index
    %c2_44 = arith.constant 2 : index
    %c0_45 = arith.constant 0 : index
    %36 = vector.load %arg1[%c0_42, %c1_43, %c2_44, %c0_45] : memref<1x18x18x4xbf16, #tpu.memory_space<vmem>>, vector<1x16x16x4xbf16>
    %37 = vector.shape_cast %36 : vector<1x16x16x4xbf16> to vector<16x16x4xbf16>
    %38 = vector.shape_cast %37 : vector<16x16x4xbf16> to vector<256x4xbf16>
    %c1_46 = arith.constant 1 : index
    %c2_47 = arith.constant 2 : index
    %c0_48 = arith.constant 0 : index
    %c0_49 = arith.constant 0 : index
    %39 = vector.load %arg2[%c1_46, %c2_47, %c0_48, %c0_49] : memref<3x3x4x128xbf16, #tpu.memory_space<vmem>>, vector<1x1x4x128xbf16>
    %40 = vector.shape_cast %39 : vector<1x1x4x128xbf16> to vector<4x128xbf16>
    %cst_50 = arith.constant dense<0.000000e+00> : vector<256x128xf32>
    %41 = tpu.matmul %38, %40, %cst_50 {dimension_numbers = #tpu.dot_dimension_numbers<[1], [0], [0], [1], [0, 0, 1, 1], [], []>} : vector<256x4xbf16>, vector<4x128xbf16>, vector<256x128xf32> -> vector<256x128xf32>
    %42 = arith.addf %35, %41 : vector<256x128xf32>
    %c0_51 = arith.constant 0 : index
    %c2_52 = arith.constant 2 : index
    %c0_53 = arith.constant 0 : index
    %c0_54 = arith.constant 0 : index
    %43 = vector.load %arg1[%c0_51, %c2_52, %c0_53, %c0_54] : memref<1x18x18x4xbf16, #tpu.memory_space<vmem>>, vector<1x16x16x4xbf16>
    %44 = vector.shape_cast %43 : vector<1x16x16x4xbf16> to vector<16x16x4xbf16>
    %45 = vector.shape_cast %44 : vector<16x16x4xbf16> to vector<256x4xbf16>
    %c2_55 = arith.constant 2 : index
    %c0_56 = arith.constant 0 : index
    %c0_57 = arith.constant 0 : index
    %c0_58 = arith.constant 0 : index
    %46 = vector.load %arg2[%c2_55, %c0_56, %c0_57, %c0_58] : memref<3x3x4x128xbf16, #tpu.memory_space<vmem>>, vector<1x1x4x128xbf16>
    %47 = vector.shape_cast %46 : vector<1x1x4x128xbf16> to vector<4x128xbf16>
    %cst_59 = arith.constant dense<0.000000e+00> : vector<256x128xf32>
    %48 = tpu.matmul %45, %47, %cst_59 {dimension_numbers = #tpu.dot_dimension_numbers<[1], [0], [0], [1], [0, 0, 1, 1], [], []>} : vector<256x4xbf16>, vector<4x128xbf16>, vector<256x128xf32> -> vector<256x128xf32>
    %49 = arith.addf %42, %48 : vector<256x128xf32>
    %c0_60 = arith.constant 0 : index
    %c2_61 = arith.constant 2 : index
    %c1_62 = arith.constant 1 : index
    %c0_63 = arith.constant 0 : index
    %50 = vector.load %arg1[%c0_60, %c2_61, %c1_62, %c0_63] : memref<1x18x18x4xbf16, #tpu.memory_space<vmem>>, vector<1x16x16x4xbf16>
    %51 = vector.shape_cast %50 : vector<1x16x16x4xbf16> to vector<16x16x4xbf16>
    %52 = vector.shape_cast %51 : vector<16x16x4xbf16> to vector<256x4xbf16>
    %c2_64 = arith.constant 2 : index
    %c1_65 = arith.constant 1 : index
    %c0_66 = arith.constant 0 : index
    %c0_67 = arith.constant 0 : index
    %53 = vector.load %arg2[%c2_64, %c1_65, %c0_66, %c0_67] : memref<3x3x4x128xbf16, #tpu.memory_space<vmem>>, vector<1x1x4x128xbf16>
    %54 = vector.shape_cast %53 : vector<1x1x4x128xbf16> to vector<4x128xbf16>
    %cst_68 = arith.constant dense<0.000000e+00> : vector<256x128xf32>
    %55 = tpu.matmul %52, %54, %cst_68 {dimension_numbers = #tpu.dot_dimension_numbers<[1], [0], [0], [1], [0, 0, 1, 1], [], []>} : vector<256x4xbf16>, vector<4x128xbf16>, vector<256x128xf32> -> vector<256x128xf32>
    %56 = arith.addf %49, %55 : vector<256x128xf32>
    %c0_69 = arith.constant 0 : index
    %c2_70 = arith.constant 2 : index
    %c2_71 = arith.constant 2 : index
    %c0_72 = arith.constant 0 : index
    %57 = vector.load %arg1[%c0_69, %c2_70, %c2_71, %c0_72] : memref<1x18x18x4xbf16, #tpu.memory_space<vmem>>, vector<1x16x16x4xbf16>
    %58 = vector.shape_cast %57 : vector<1x16x16x4xbf16> to vector<16x16x4xbf16>
    %59 = vector.shape_cast %58 : vector<16x16x4xbf16> to vector<256x4xbf16>
    %c2_73 = arith.constant 2 : index
    %c2_74 = arith.constant 2 : index
    %c0_75 = arith.constant 0 : index
    %c0_76 = arith.constant 0 : index
    %60 = vector.load %arg2[%c2_73, %c2_74, %c0_75, %c0_76] : memref<3x3x4x128xbf16, #tpu.memory_space<vmem>>, vector<1x1x4x128xbf16>
    %61 = vector.shape_cast %60 : vector<1x1x4x128xbf16> to vector<4x128xbf16>
    %cst_77 = arith.constant dense<0.000000e+00> : vector<256x128xf32>
    %62 = tpu.matmul %59, %61, %cst_77 {dimension_numbers = #tpu.dot_dimension_numbers<[1], [0], [0], [1], [0, 0, 1, 1], [], []>} : vector<256x4xbf16>, vector<4x128xbf16>, vector<256x128xf32> -> vector<256x128xf32>
    %63 = arith.addf %56, %62 : vector<256x128xf32>
    %c0_78 = arith.constant 0 : index
    %c0_79 = arith.constant 0 : index
    %64 = vector.load %arg3[%c0_78, %c0_79] : memref<1x128xf32, #tpu.memory_space<vmem>>, vector<1x128xf32>
    %65 = vector.broadcast %64 : vector<1x128xf32> to vector<256x128xf32>
    %66 = arith.mulf %63, %65 : vector<256x128xf32>
    %c0_80 = arith.constant 0 : index
    %c0_81 = arith.constant 0 : index
    %67 = vector.load %arg4[%c0_80, %c0_81] : memref<1x128xf32, #tpu.memory_space<vmem>>, vector<1x128xf32>
    %68 = vector.broadcast %67 : vector<1x128xf32> to vector<256x128xf32>
    %69 = arith.addf %66, %68 : vector<256x128xf32>
    %cst_82 = arith.constant 0.000000e+00 : f32
    %70 = vector.broadcast %cst_82 : f32 to vector<256x128xf32>
    %71 = arith.maximumf %69, %70 : vector<256x128xf32>
    %72 = arith.truncf %71 : vector<256x128xf32> to vector<256x128xbf16>
    %c0_83 = arith.constant 0 : index
    %c0_84 = arith.constant 0 : index
    %73 = vector.load %arg5[%c0_83, %c0_84] : memref<256x128xbf16, #tpu.memory_space<vmem>>, vector<256x128xbf16>
    tpu.vector_store %arg5[%c0_83, %c0_84], %72 {strides = array<i32>} : memref<256x128xbf16, #tpu.memory_space<vmem>>, vector<256x128xbf16>,
    return
  }
  func.func @transform_0(%arg0: i32) -> (i32, i32, i32, i32) {
    %c0_i32 = arith.constant 0 : i32
    %c0_i32_0 = arith.constant 0 : i32
    %c0_i32_1 = arith.constant 0 : i32
    %c0_i32_2 = arith.constant 0 : i32
    return %arg0, %c0_i32, %c0_i32_0, %c0_i32_1 : i32, i32, i32, i32
  }
  func.func @transform_1(%arg0: i32) -> (i32, i32, i32, i32) {
    %c0_i32 = arith.constant 0 : i32
    %c0_i32_0 = arith.constant 0 : i32
    %c0_i32_1 = arith.constant 0 : i32
    %c0_i32_2 = arith.constant 0 : i32
    %c0_i32_3 = arith.constant 0 : i32
    return %c0_i32, %c0_i32_0, %c0_i32_1, %c0_i32_2 : i32, i32, i32, i32
  }
  func.func @transform_2(%arg0: i32) -> (i32, i32) {
    %c0_i32 = arith.constant 0 : i32
    %c0_i32_0 = arith.constant 0 : i32
    %c0_i32_1 = arith.constant 0 : i32
    return %c0_i32, %c0_i32_0 : i32, i32
  }
  func.func @transform_3(%arg0: i32) -> (i32, i32) {
    %c0_i32 = arith.constant 0 : i32
    %c0_i32_0 = arith.constant 0 : i32
    %c0_i32_1 = arith.constant 0 : i32
    return %c0_i32, %c0_i32_0 : i32, i32
  }
  func.func @transform_4(%arg0: i32) -> (i32, i32) {
    %c0_i32 = arith.constant 0 : i32
    %c0_i32_0 = arith.constant 0 : i32
    return %arg0, %c0_i32 : i32, i32
  }
}

</mosaic_0001>

<bundles_post_ra>
// kernel: conv_block_forward.1
= control target key start
LH: loop header
LB: loop body
LE: loop exit
PB: predicated region body
PF: predicated region fallthrough
CT: control target
= control target key end

     0   :  { %s6666_s15 = smov 0   ;;  %s8495_s0 = inlined_call_operand.vmem [shape: bf16[2,18,18,4], index: 0, kind: input, shape index: {}]   ;;  %s8496_s1 = inlined_call_operand.vmem [shape: bf16[3,3,4,128], index: 1, kind: input, shape index: {}]   ;;  %s8497_s2 = inlined_call_operand.vmem [shape: f32[1,128], index: 2, kind: input, shape index: {}]   ;;  %s8498_s3 = inlined_call_operand.vmem [shape: f32[1,128], index: 3, kind: input, shape index: {}]   ;;  %s8499_s4 = inlined_call_operand.vmem [shape: bf16[512,128], index: 4, kind: output, shape index: {}]  }
   0x1 LB: > { %s6672_s16 = sadd.s32 4294967295, %s6639_s15   ;;  %p5089_p0 = scmp.ge.s32.totalorder %s6639_s15, 1  ;;  %s6639_s15 = sphi %s6666_s15, %s14_s15  }
   0x2   : > { %p162_p1 = scmp.lt.s32.totalorder %s6639_s15, 3 }
   0x4   : > { %p163_p2 = pnand %p5089_p0, %p162_p1 }
   0x6   : > { %166 = sbr.rel (%p163_p2) target bundleno = 592 (0x250), region = 36 }
   0xd   : > { %v5093_v0 = vld [vmem:[%s8496_s1 + $0x2] sm:$0x3]  ;;  %vm735_vm0 = vcmask 1041408   ;;  %v5320_v1 = vld [vmem:[%s8496_s1 + $0x8] sm:$0x3]  ;;  %p188_p3 = scmp.lt.s32.totalorder %s6672_s16, 1 }
   0xe   : > { %6509 = vmatprep.subr.msk.bf16.mxu1 %vm735_vm0, %v5093_v0  ;;  %6513 = vmatprep.subr.msk.bf16.mxu0 %vm735_vm0, %v5320_v1  ;;  %v737_v2 = vsel %vm735_vm0, %v5093_v0, 0  ;;  %v6687_v3 = vsel %vm735_vm0, %v5320_v1, 0  ;;  %v232_v4 = vld [vmem:[%s8496_s1] sm:$0x3]  ;;  %v5385_v5 = vld [vmem:[%s8496_s1 + $0xa] sm:$0x3] }
   0xf   : > { %8513 = vst [vmem:[#allocation2_spill] sm:$0xff] %v6687_v3  ;;  %5946 = vmatpush3.bf16.msra.mxu1 %v737_v2  ;;  %6082 = vmatpush3.bf16.msra.mxu0 %v6687_v3  ;;  %s189_s21 = scalar_select %p188_p3, %s6672_s16, 1  ;;  %vm249_vm1 = vsmask.f32 3328  ;;  %vm250_vm2 = vsmask.f32 7440 }
  0x10   : > { %6510 = vmatprep.subr.msk.bf16.mxu1 %vm735_vm0, %v232_v4  ;;  %6515 = vmatprep.subr.msk.bf16.mxu0 %vm735_vm0, %v5385_v5  ;;  %vm686_vm3 = vcmask 31744   ;;  %v6715_v17 = vsel %vm735_vm0, %v232_v4, 0  ;;  %v6721_v26 = vld [vmem:[%s8496_s1 + $0xc] sm:$0x3]  ;;  %vm6728_vm4 = vmor %vm249_vm1, %vm250_vm2  ;;  %v6734_v37 = vsel %vm735_vm0, %v5385_v5, 0  ;;  %vm1240_vm5 = vcmask 1042432  }
  0x11   : > { %s6519_s26 = smul.u32 216, %s189_s21  ;;  %v6738_v41 = vsel %vm735_vm0, %v6721_v26, 0  ;;  %vm1241_vm6 = vcmask 1046532   ;;  %s5091_s20 = sshll.u32 %s6672_s16, 5 }
  0x12   : > { %vm6954_vm7 = vmor %vm1240_vm5, %vm1241_vm6  ;;  %p194_p4 = scmp.lt.s32.totalorder %s5091_s20, 63 }
  0x13   : > { %s6702_s29 = scalar_lea.vmem %s8495_s0, %s6519_s26 }
  0x14   : > { %v200_v6 = vld [vmem:[%s6702_s29] sm:$0xf]  ;;  %v201_v7 = vld [vmem:[%s6702_s29 + $0x4] sm:$0xf]  ;;  %v233_v8 = vld [vmem:[%s6702_s29 + $0x8] sm:$0x1] }
  0x15   : > { %v253_v9 = vshrl.u32 %v200_v6, 16  ;;  %v256_v10 = vshll.u32 %v200_v6, 16  ;;  %v262_v11 = vshll.u32 %v201_v7, 16  ;;  %v266_v12 = vshrl.u32 %v201_v7, 16  ;;  %v5272_v13 = vld [vmem:[%s6702_s29 + $0xc] sm:$0xf] }
  0x16   : > { %v272_v14 = vshll.u32 %v233_v8, 16  ;;  %v6709_v15 = vld [vmem:[%s6702_s29 + $0x10] sm:$0xf]  ;;  %v6712_v16 = vld [vmem:[%s6702_s29 + $0x14] sm:$0x1]  ;;  %v2057_v23 = vshrl.u32 %v5272_v13, 16 }
  0x17   : > { %v255_v18 = vrot.slane %v253_v9, 4  ;;  %v258_v19 = vrot.slane %v256_v10, 5  ;;  %v264_v20 = vrot.slane %v262_v11, 5  ;;  %v268_v21 = vrot.slane %v266_v12, 4  ;;  %v202_v31 = vld [vmem:[%s6702_s29 + $0xc] sm:$0xf] }
  0x18   : > { %v274_v22 = vrot.slane %v272_v14, 5  ;;  %v2060_v24 = vshll.u32 %v5272_v13, 16  ;;  %v2066_v25 = vshll.u32 %v6709_v15, 16  ;;  %v2070_v29 = vshrl.u32 %v6709_v15, 16  ;;  %v203_v36 = vld [vmem:[%s6702_s29 + $0x10] sm:$0xf] }
  0x19   : > { %v259_v27 = vor.u32 %v258_v19, %v255_v18  ;;  %v269_v28 = vor.u32 %v268_v21, %v264_v20  ;;  %v2076_v30 = vshll.u32 %v6712_v16, 16  ;;  %v2059_v33 = vrot.slane %v2057_v23, 4  ;;  %v234_v44 = vld [vmem:[%s6702_s29 + $0x14] sm:$0x1]  ;;  %v5275_v55 = vld [vmem:[%s6702_s29 + $0x18] sm:$0xf] }
  0x1a   : > { %v2062_v34 = vrot.slane %v2060_v24, 5  ;;  %v2068_v35 = vrot.slane %v2066_v25, 5  ;;  %v2072_v40 = vrot.slane %v2070_v29, 4  ;;  %v277_v45 = vshrl.u32 %v202_v31, 16  ;;  %v6747_v60 = vld [vmem:[%s6702_s29 + $0x1c] sm:$0xf] }
  0x1b   : > { %v260_v38 = vrot.slane %v259_v27, 4  ;;  %v270_v39 = vrot.slane %v269_v28, 4  ;;  %v2078_v43 = vrot.slane %v2076_v30, 5  ;;  %v280_v46 = vshll.u32 %v202_v31, 16  ;;  %v6755_v1 = vld [vmem:[%s6702_s29 + $0x20] sm:$0x1] }
  0x1c   : > { %v2063_v42 = vor.u32 %v2062_v34, %v2059_v33  ;;  %v2073_v49 = vor.u32 %v2072_v40, %v2068_v35  ;;  %v286_v50 = vshll.u32 %v203_v36, 16  ;;  %v279_v53 = vrot.slane %v277_v45, 4  ;;  %v204_v18 = vld [vmem:[%s6702_s29 + $0x18] sm:$0xf]  ;;  %v205_v23 = vld [vmem:[%s6702_s29 + $0x1c] sm:$0xf] }
  0x1d   : > { %v265_v47 = vsel %vm6728_vm4, %v260_v38, %v264_v20  ;;  %v275_v48 = vsel %vm6728_vm4, %v270_v39, %v274_v22  ;;  %v282_v54 = vrot.slane %v280_v46, 5  ;;  %v290_v58 = vshrl.u32 %v203_v36, 16  ;;  %v235_v31 = vld [vmem:[%s6702_s29 + $0x20] sm:$0x1]  ;;  %v5278_v40 = vld [vmem:[%s6702_s29 + $0x24] sm:$0xf] }
  0x1e   : > { %v5094_v51 = vcombine.low %v265_v47, %v275_v48  ;;  %v2064_v52 = vrot.slane %v2063_v42, 4  ;;  %v2074_v56 = vrot.slane %v2073_v49, 4  ;;  %v288_v57 = vrot.slane %v286_v50, 5  ;;  %v6778_v46 = vld [vmem:[%s6702_s29 + $0x28] sm:$0xf]  ;;  %s8568_s20 = smov (!%p194_p4, %s5091_s20), 63 }
  0x1f   : > { %v296_v59 = vshll.u32 %v234_v44, 16  ;;  %v2800_v62 = vrot.slane %v6709_v15, 5  ;;  %v2803_v63 = vrot.slane %v6712_v16, 5  ;;  %v283_v0 = vor.u32 %v282_v54, %v279_v53  ;;  %v6787_v54 = vld [vmem:[%s6702_s29 + $0x2c] sm:$0x1]  ;;  %s5092_s16 = sshll.u32 %s8568_s20, 2 }
  0x20   : > { %5947 = vmatprep.mubr.msk.bf16.mxu1 %vm686_vm3, %v5094_v51  ;;  %v2069_v61 = vsel %vm6728_vm4, %v2064_v52, %v2068_v35  ;;  %v2079_v2 = vsel %vm6728_vm4, %v2074_v56, %v2078_v43  ;;  %v292_v4 = vrot.slane %v290_v58, 4  ;;  %v2081_v6 = vshrl.u32 %v5275_v55, 16  ;;  %v5174_v51 = vld [vmem:[%s8496_s1 + $0x4] sm:$0x3]  ;;  %v6987_v16 = vld [vmem:[%s6702_s29 + $0x7c] sm:$0xf]  ;;  %s8412_s27 = scalar_lea.vmem %s8499_s4, %s5092_s16 }
  0x21   : > { %v298_v5 = vrot.slane %v296_v59, 5  ;;  %v5321_v7 = vcombine.low %v2069_v61, %v2079_v2  ;;  %v284_v8 = vrot.slane %v283_v0, 4  ;;  %v2084_v9 = vshll.u32 %v5275_v55, 16  ;;  %v206_v0 = vld [vmem:[%s6702_s29 + $0x24] sm:$0xf] }
  0x22   : > { %v2090_v10 = vshll.u32 %v6747_v60, 16  ;;  %v293_v11 = vor.u32 %v292_v4, %v288_v57  ;;  %v2083_v12 = vrot.slane %v2081_v6, 4  ;;  %v2094_v13 = vshrl.u32 %v6747_v60, 16 }
  0x23   : > { %v2100_v14 = vshll.u32 %v6755_v1, 16  ;;  %6083 = vmatprep.mubr.msk.bf16.mxu0 %vm686_vm3, %v5321_v7  ;;  %v289_v19 = vsel %vm6728_vm4, %v284_v8, %v288_v57  ;;  %v2086_v20 = vrot.slane %v2084_v9, 5  ;;  %v2807_v22 = vrot.slane %v6747_v60, 5  ;;  %v207_v7 = vld [vmem:[%s6702_s29 + $0x28] sm:$0xf] }
  0x24   : > { %v2092_v21 = vrot.slane %v2090_v10, 5  ;;  %v294_v24 = vrot.slane %v293_v11, 4  ;;  %v2096_v25 = vrot.slane %v2094_v13, 4  ;;  %v2810_v28 = vrot.slane %v6755_v1, 5  ;;  %v236_v13 = vld [vmem:[%s6702_s29 + $0x2c] sm:$0x1] }
  0x25   : > { %v2102_v27 = vrot.slane %v2100_v14, 5  ;;  %v2087_v29 = vor.u32 %v2086_v20, %v2083_v12  ;;  %v6771_v30 = vrot.slane %v2807_v22, 4  ;;  %v301_v33 = vshrl.u32 %v204_v18, 16 }
  0x26   : > { %v304_v34 = vshll.u32 %v204_v18, 16  ;;  %v299_v35 = vsel %vm6728_vm4, %v294_v24, %v298_v5  ;;  %v2097_v36 = vor.u32 %v2096_v25, %v2092_v21  ;;  %v310_v38 = vshll.u32 %v205_v23, 16  ;;  %v5281_v24 = vld [vmem:[%s6702_s29 + $0x30] sm:$0xf] }
  0x27   : > { %v314_v39 = vshrl.u32 %v205_v23, 16  ;;  %v5095_v42 = vcombine.low %v289_v19, %v299_v35  ;;  %v2088_v43 = vrot.slane %v2087_v29, 4  ;;  %v303_v44 = vrot.slane %v301_v33, 4  ;;  %v6807_v33 = vld [vmem:[%s6702_s29 + $0x34] sm:$0xf] }
  0x28   : > { %v306_v45 = vrot.slane %v304_v34, 5  ;;  %v2098_v47 = vrot.slane %v2097_v36, 4  ;;  %v312_v48 = vrot.slane %v310_v38, 5  ;;  %v320_v50 = vshll.u32 %v235_v31, 16 }
  0x29   : > { %v316_v49 = vrot.slane %v314_v39, 4  ;;  %5948 = vmatmul.mubr.msk.bf16.vlgmr.msra.gmra.mrb[0].mxu1 %vm686_vm3, %v5095_v42  ;;  %v2093_v52 = vsel %vm6728_vm4, %v2088_v43, %v2092_v21  ;;  %v2105_v55 = vshrl.u32 %v5278_v40, 16  ;;  %v2108_v56 = vshll.u32 %v5278_v40, 16  ;;  %v6815_v40 = vld [vmem:[%s6702_s29 + $0x38] sm:$0x1] }
  0x2a   : > { %v307_v53 = vor.u32 %v306_v45, %v303_v44  ;;  %5980 = vmatpush3.bf16.msra.mxu1 %v6715_v17  ;;  %v2103_v57 = vsel %vm6728_vm4, %v2098_v47, %v2102_v27  ;;  %v322_v59 = vrot.slane %v320_v50, 5  ;;  %v2114_v61 = vshll.u32 %v6778_v46, 16 }
  0x2b   : > { %v317_v58 = vor.u32 %v316_v49, %v312_v48  ;;  %v5322_v2 = vcombine.low %v2093_v52, %v2103_v57  ;;  %v2107_v5 = vrot.slane %v2105_v55, 4  ;;  %v2110_v6 = vrot.slane %v2108_v56, 5  ;;  %6511 = vmatprep.subr.msk.bf16.mxu1 %vm735_vm0, %v5174_v51  ;;  %v208_v52 = vld [vmem:[%s6702_s29 + $0x30] sm:$0xf] }
  0x2c   : > { %v308_v4 = vrot.slane %v307_v53, 4  ;;  %v2116_v9 = vrot.slane %v2114_v61, 5  ;;  %v2118_v17 = vshrl.u32 %v6778_v46, 16  ;;  %v2124_v10 = vshll.u32 %v6787_v54, 16 }
  0x2d   : > { %v318_v8 = vrot.slane %v317_v58, 4  ;;  %6084 = vmatmul.mubr.msk.bf16.vlgmr.msra.gmra.mrb[0].mxu0 %vm686_vm3, %v5322_v2  ;;  %v2111_v12 = vor.u32 %v2110_v6, %v2107_v5  ;;  %v325_v14 = vshrl.u32 %v206_v0, 16  ;;  %v328_v18 = vshll.u32 %v206_v0, 16  ;;  %v209_v58 = vld [vmem:[%s6702_s29 + $0x34] sm:$0xf] }
  0x2e   : > { %v313_v11 = vsel %vm6728_vm4, %v308_v4, %v312_v48  ;;  %6116 = vmatpush3.bf16.msra.mxu0 %v6734_v37  ;;  %v2120_v20 = vrot.slane %v2118_v17, 4  ;;  %v2126_v21 = vrot.slane %v2124_v10, 5  ;;  %v334_v23 = vshll.u32 %v207_v7, 16  ;;  %v237_v4 = vld [vmem:[%s6702_s29 + $0x38] sm:$0x1] }
  0x2f   : > { %v323_v19 = vsel %vm6728_vm4, %v318_v8, %v322_v59  ;;  %v2112_v27 = vrot.slane %v2111_v12, 4  ;;  %v327_v29 = vrot.slane %v325_v14, 4  ;;  %v330_v31 = vrot.slane %v328_v18, 5  ;;  %6516 = vmatprep.subr.msk.bf16.mxu0 %vm735_vm0, %v6721_v26  ;;  %v5284_v12 = vld [vmem:[%s6702_s29 + $0x3c] sm:$0xf] }
  0x30   : > { %v5096_v25 = vcombine.low %v313_v11, %v323_v19  ;;  %v2121_v34 = vor.u32 %v2120_v20, %v2116_v9  ;;  %v336_v35 = vrot.slane %v334_v23, 5  ;;  %v338_v37 = vshrl.u32 %v207_v7, 16  ;;  %v6832_v20 = vld [vmem:[%s6702_s29 + $0x40] sm:$0xf] }
  0x31   : > { %v344_v36 = vshll.u32 %v236_v13, 16  ;;  %v2117_v38 = vsel %vm6728_vm4, %v2112_v27, %v2116_v9  ;;  %v331_v39 = vor.u32 %v330_v31, %v327_v29  ;;  %v2129_v42 = vshrl.u32 %v5281_v24, 16 }
  0x32   : > { %5951 = vmatprep.mubr.msk.bf16.mxu1 %vm686_vm3, %v5096_v25  ;;  %v2132_v43 = vshll.u32 %v5281_v24, 16  ;;  %v2122_v44 = vrot.slane %v2121_v34, 4  ;;  %v340_v45 = vrot.slane %v338_v37, 4  ;;  %v2138_v26 = vshll.u32 %v6807_v33, 16  ;;  %v6837_v34 = vld [vmem:[%s6702_s29 + $0x44] sm:$0x1] }
  0x33   : > { %v346_v47 = vrot.slane %v344_v36, 5  ;;  %v332_v48 = vrot.slane %v331_v39, 4  ;;  %v2131_v49 = vrot.slane %v2129_v42, 4  ;;  %v2142_v51 = vshrl.u32 %v6807_v33, 16  ;;  %v210_v42 = vld [vmem:[%s6702_s29 + $0x3c] sm:$0xf] }
  0x34   : > { %v2134_v50 = vrot.slane %v2132_v43, 5  ;;  %v2127_v53 = vsel %vm6728_vm4, %v2122_v44, %v2126_v21  ;;  %v341_v55 = vor.u32 %v340_v45, %v336_v35  ;;  %v2140_v56 = vrot.slane %v2138_v26, 5  ;;  %v211_v26 = vld [vmem:[%s6702_s29 + $0x40] sm:$0xf] }
  0x35   : > { %v2148_v57 = vshll.u32 %v6815_v40, 16  ;;  %v5323_v59 = vcombine.low %v2117_v38, %v2127_v53  ;;  %v337_v61 = vsel %vm6728_vm4, %v332_v48, %v336_v35  ;;  %v2144_v2 = vrot.slane %v2142_v51, 4 }
  0x36   : > { %v2135_v0 = vor.u32 %v2134_v50, %v2131_v49  ;;  %v342_v5 = vrot.slane %v341_v55, 4  ;;  %v349_v7 = vshrl.u32 %v208_v52, 16  ;;  %v352_v8 = vshll.u32 %v208_v52, 16 }
  0x37   : > { %v2150_v6 = vrot.slane %v2148_v57, 5  ;;  %6087 = vmatprep.mubr.msk.bf16.mxu0 %vm686_vm3, %v5323_v59  ;;  %v2145_v17 = vor.u32 %v2144_v2, %v2140_v56  ;;  %v358_v10 = vshll.u32 %v209_v58, 16  ;;  %v362_v11 = vshrl.u32 %v209_v58, 16  ;;  %v5287_v2 = vld [vmem:[%s6702_s29 + $0x48] sm:$0xf] }
  0x38   : > { %v2136_v9 = vrot.slane %v2135_v0, 4  ;;  %v347_v13 = vsel %vm6728_vm4, %v342_v5, %v346_v47  ;;  %v351_v14 = vrot.slane %v349_v7, 4  ;;  %v354_v18 = vrot.slane %v352_v8, 5  ;;  %v6855_v8 = vld [vmem:[%s6702_s29 + $0x4c] sm:$0xf] }
  0x39   : > { %v368_v19 = vshll.u32 %v237_v4, 16  ;;  %v5097_v21 = vcombine.low %v337_v61, %v347_v13  ;;  %v2146_v24 = vrot.slane %v2145_v17, 4  ;;  %v360_v25 = vrot.slane %v358_v10, 5  ;;  %v238_v61 = vld [vmem:[%s6702_s29 + $0x44] sm:$0x1] }
  0x3a   : > { %v2141_v23 = vsel %vm6728_vm4, %v2136_v9, %v2140_v56  ;;  %v355_v27 = vor.u32 %v354_v18, %v351_v14  ;;  %v364_v29 = vrot.slane %v362_v11, 4  ;;  %v2153_v35 = vshrl.u32 %v5284_v12, 16 }
  0x3b   : > { %v370_v31 = vrot.slane %v368_v19, 5  ;;  %5952 = vmatmul.mubr.msk.bf16.gmra.mrb[4].mxu1 %vm686_vm3, %v5097_v21  ;;  %v2151_v37 = vsel %vm6728_vm4, %v2146_v24, %v2150_v6  ;;  %v2156_v36 = vshll.u32 %v5284_v12, 16  ;;  %v2162_v38 = vshll.u32 %v6832_v20, 16 }
  0x3c   : > { %v2166_v39 = vshrl.u32 %v6832_v20, 16  ;;  %v5324_v43 = vcombine.low %v2141_v23, %v2151_v37  ;;  %v356_v44 = vrot.slane %v355_v27, 4  ;;  %v365_v45 = vor.u32 %v364_v29, %v360_v25  ;;  %v6863_v23 = vld [vmem:[%s6702_s29 + $0x50] sm:$0x1]  ;;  %v6867_v27 = vld [vmem:[%s6702_s29 + $0x48] sm:$0xf] }
  0x3d   : > { %v2155_v47 = vrot.slane %v2153_v35, 4  ;;  %v2158_v48 = vrot.slane %v2156_v36, 5  ;;  %v2164_v49 = vrot.slane %v2162_v38, 5  ;;  %v2172_v51 = vshll.u32 %v6837_v34, 16  ;;  %v6870_v36 = vld [vmem:[%s6702_s29 + $0x4c] sm:$0xf] }
  0x3e   : > { %v2168_v50 = vrot.slane %v2166_v39, 4  ;;  %6088 = vmatmul.mubr.msk.bf16.gmra.mrb[4].mxu0 %vm686_vm3, %v5324_v43  ;;  %v361_v52 = vsel %vm6728_vm4, %v356_v44, %v360_v25  ;;  %v366_v53 = vrot.slane %v365_v45, 4  ;;  %v373_v55 = vshrl.u32 %v210_v42, 16 }
  0x3f   : > { %v376_v56 = vshll.u32 %v210_v42, 16  ;;  %v2159_v57 = vor.u32 %v2158_v48, %v2155_v47  ;;  %v2174_v59 = vrot.slane %v2172_v51, 5  ;;  %v382_v0 = vshll.u32 %v211_v26, 16 }
  0x40   : > { %v2169_v58 = vor.u32 %v2168_v50, %v2164_v49  ;;  %v371_v4 = vsel %vm6728_vm4, %v366_v53, %v370_v31  ;;  %v375_v5 = vrot.slane %v373_v55, 4  ;;  %v386_v7 = vshrl.u32 %v211_v26, 16  ;;  %v239_v26 = vld [vmem:[%s6702_s29 + $0x50] sm:$0x1]  ;;  %v5290_v53 = vld [vmem:[%s6702_s29 + $0x54] sm:$0xf] }
  0x41   : > { %v378_v6 = vrot.slane %v376_v56, 5  ;;  %v5098_v9 = vcombine.low %v361_v52, %v371_v4  ;;  %v2160_v17 = vrot.slane %v2159_v57, 4  ;;  %v384_v11 = vrot.slane %v382_v0, 5  ;;  %v6886_v4 = vld [vmem:[%s6702_s29 + $0x58] sm:$0xf] }
  0x42   : > { %v2170_v10 = vrot.slane %v2169_v58, 4  ;;  %v388_v13 = vrot.slane %v386_v7, 4  ;;  %v392_v14 = vshll.u32 %v238_v61, 16  ;;  %v2177_v18 = vshrl.u32 %v5287_v2, 16 }
  0x43   : > { %v379_v12 = vor.u32 %v378_v6, %v375_v5  ;;  %5955 = vmatprep.mubr.msk.bf16.mxu1 %vm686_vm3, %v5098_v9  ;;  %v2165_v19 = vsel %vm6728_vm4, %v2160_v17, %v2164_v49  ;;  %v2180_v24 = vshll.u32 %v5287_v2, 16  ;;  %v2186_v25 = vshll.u32 %v6855_v8, 16 }
  0x44   : > { %v2175_v21 = vsel %vm6728_vm4, %v2170_v10, %v2174_v59  ;;  %v389_v35 = vor.u32 %v388_v13, %v384_v11  ;;  %v394_v37 = vrot.slane %v392_v14, 5  ;;  %v2179_v38 = vrot.slane %v2177_v18, 4 }
  0x45   : > { %v5325_v29 = vcombine.low %v2165_v19, %v2175_v21  ;;  %v380_v31 = vrot.slane %v379_v12, 4  ;;  %v2182_v39 = vrot.slane %v2180_v24, 5  ;;  %v2188_v42 = vrot.slane %v2186_v25, 5  ;;  %v6892_v12 = vld [vmem:[%s6702_s29 + $0x5c] sm:$0x1] }
  0x46   : > { %v2190_v43 = vshrl.u32 %v6855_v8, 16  ;;  %v390_v45 = vrot.slane %v389_v35, 4  ;;  %v2196_v47 = vshll.u32 %v6863_v23, 16  ;;  %v397_v48 = vshrl.u32 %v6867_v27, 16  ;;  %v6896_v24 = vld [vmem:[%s6702_s29 + $0x54] sm:$0xf] }
  0x47   : > { %6091 = vmatprep.mubr.msk.bf16.mxu0 %vm686_vm3, %v5325_v29  ;;  %v385_v44 = vsel %vm6728_vm4, %v380_v31, %v384_v11  ;;  %v2183_v49 = vor.u32 %v2182_v39, %v2179_v38  ;;  %v400_v51 = vshll.u32 %v6867_v27, 16  ;;  %v406_v52 = vshll.u32 %v6870_v36, 16 }
  0x48   : > { %v2192_v50 = vrot.slane %v2190_v43, 4  ;;  %v395_v55 = vsel %vm6728_vm4, %v390_v45, %v394_v37  ;;  %v2198_v56 = vrot.slane %v2196_v47, 5  ;;  %v399_v57 = vrot.slane %v397_v48, 4  ;;  %v6902_v37 = vld [vmem:[%s6702_s29 + $0x58] sm:$0xf] }
  0x49   : > { %v410_v58 = vshrl.u32 %v6870_v36, 16  ;;  %v5099_v59 = vcombine.low %v385_v44, %v395_v55  ;;  %v2184_v61 = vrot.slane %v2183_v49, 4  ;;  %v402_v2 = vrot.slane %v400_v51, 5 }
  0x4a   : > { %v2193_v0 = vor.u32 %v2192_v50, %v2188_v42  ;;  %v408_v5 = vrot.slane %v406_v52, 5  ;;  %v416_v7 = vshll.u32 %v239_v26, 16  ;;  %v2201_v9 = vshrl.u32 %v5290_v53, 16  ;;  %v240_v26 = vld [vmem:[%s6702_s29 + $0x5c] sm:$0x1] }
  0x4b   : > { %v412_v6 = vrot.slane %v410_v58, 4  ;;  %5956 = vmatmul.mubr.msk.bf16.gmra.mrb[8].mxu1 %vm686_vm3, %v5099_v59  ;;  %v2189_v17 = vsel %vm6728_vm4, %v2184_v61, %v2188_v42  ;;  %v403_v11 = vor.u32 %v402_v2, %v399_v57  ;;  %v2204_v13 = vshll.u32 %v5290_v53, 16  ;;  %v5293_v53 = vld [vmem:[%s6702_s29 + $0x60] sm:$0xf]  ;;  %v6916_v59 = vld [vmem:[%s6702_s29 + $0x64] sm:$0xf] }
  0x4c   : > { %v2194_v10 = vrot.slane %v2193_v0, 4  ;;  %v418_v18 = vrot.slane %v416_v7, 5  ;;  %v2203_v19 = vrot.slane %v2201_v9, 4  ;;  %v2210_v21 = vshll.u32 %v6886_v4, 16  ;;  %v6923_v9 = vld [vmem:[%s6702_s29 + $0x68] sm:$0x1] }
  0x4d   : > { %v413_v14 = vor.u32 %v412_v6, %v408_v5  ;;  %v404_v29 = vrot.slane %v403_v11, 4  ;;  %v2206_v31 = vrot.slane %v2204_v13, 5  ;;  %v2214_v35 = vshrl.u32 %v6886_v4, 16 }
  0x4e   : > { %v2199_v25 = vsel %vm6728_vm4, %v2194_v10, %v2198_v56  ;;  %v2212_v42 = vrot.slane %v2210_v21, 5  ;;  %v2220_v43 = vshll.u32 %v6892_v12, 16  ;;  %v421_v48 = vshrl.u32 %v6896_v24, 16 }
  0x4f   : > { %v5326_v38 = vcombine.low %v2189_v17, %v2199_v25  ;;  %v414_v39 = vrot.slane %v413_v14, 4  ;;  %v409_v44 = vsel %vm6728_vm4, %v404_v29, %v408_v5  ;;  %v2207_v45 = vor.u32 %v2206_v31, %v2203_v19  ;;  %v6927_v19 = vld [vmem:[%s6702_s29 + $0x60] sm:$0xf] }
  0x50   : > { %v2216_v47 = vrot.slane %v2214_v35, 4  ;;  %v2222_v50 = vrot.slane %v2220_v43, 5  ;;  %v424_v51 = vshll.u32 %v6896_v24, 16  ;;  %v430_v52 = vshll.u32 %v6902_v37, 16  ;;  %v6933_v35 = vld [vmem:[%s6702_s29 + $0x64] sm:$0xf] }
  0x51   : > { %6092 = vmatmul.mubr.msk.bf16.gmra.mrb[8].mxu0 %vm686_vm3, %v5326_v38  ;;  %v419_v49 = vsel %vm6728_vm4, %v414_v39, %v418_v18  ;;  %v2208_v56 = vrot.slane %v2207_v45, 4  ;;  %v423_v58 = vrot.slane %v421_v48, 4  ;;  %v434_v2 = vshrl.u32 %v6902_v37, 16 }
  0x52   : > { %v5100_v55 = vcombine.low %v409_v44, %v419_v49  ;;  %v2217_v57 = vor.u32 %v2216_v47, %v2212_v42  ;;  %v426_v61 = vrot.slane %v424_v51, 5  ;;  %v432_v0 = vrot.slane %v430_v52, 5 }
  0x53   : > { %v440_v5 = vshll.u32 %v240_v26, 16  ;;  %v2213_v6 = vsel %vm6728_vm4, %v2208_v56, %v2212_v42  ;;  %v2225_v17 = vshrl.u32 %v5293_v53, 16  ;;  %v2228_v10 = vshll.u32 %v5293_v53, 16 }
  0x54   : > { %5959 = vmatprep.mubr.msk.bf16.mxu1 %vm686_vm3, %v5100_v55  ;;  %v2218_v7 = vrot.slane %v2217_v57, 4  ;;  %v427_v11 = vor.u32 %v426_v61, %v423_v58  ;;  %v436_v13 = vrot.slane %v434_v2, 4  ;;  %v2234_v18 = vshll.u32 %v6916_v59, 16  ;;  %v5353_v58 = vld [vmem:[%s6702_s29 + $0xc] sm:$0xe] }
  0x55   : > { %v442_v14 = vrot.slane %v440_v5, 5  ;;  %v2227_v25 = vrot.slane %v2225_v17, 4  ;;  %v2230_v29 = vrot.slane %v2228_v10, 5  ;;  %v2238_v31 = vshrl.u32 %v6916_v59, 16 }
  0x56   : > { %v2223_v21 = vsel %vm6728_vm4, %v2218_v7, %v2222_v50  ;;  %v428_v39 = vrot.slane %v427_v11, 4  ;;  %v437_v42 = vor.u32 %v436_v13, %v432_v0  ;;  %v2236_v43 = vrot.slane %v2234_v18, 5  ;;  %v241_v50 = vld [vmem:[%s6702_s29 + $0x68] sm:$0x1] }
  0x57   : > { %v5327_v38 = vcombine.low %v2213_v6, %v2223_v21  ;;  %v2231_v44 = vor.u32 %v2230_v29, %v2227_v25  ;;  %v2240_v45 = vrot.slane %v2238_v31, 4  ;;  %v2244_v47 = vshll.u32 %v6923_v9, 16  ;;  %v6961_v29 = vld [vmem:[%s6702_s29 + $0x70] sm:$0xf] }
  0x58   : > { %v445_v26 = vshrl.u32 %v6927_v19, 16  ;;  %v433_v48 = vsel %vm6728_vm4, %v428_v39, %v432_v0  ;;  %v438_v49 = vrot.slane %v437_v42, 4  ;;  %v448_v51 = vshll.u32 %v6927_v19, 16  ;;  %v6948_v0 = vld [vmem:[%s6702_s29 + $0x6c] sm:$0xf] }
  0x59   : > { %6095 = vmatprep.mubr.msk.bf16.mxu0 %vm686_vm3, %v5327_v38  ;;  %v454_v52 = vshll.u32 %v6933_v35, 16  ;;  %v2232_v53 = vrot.slane %v2231_v44, 4  ;;  %v2241_v55 = vor.u32 %v2240_v45, %v2236_v43  ;;  %v2246_v56 = vrot.slane %v2244_v47, 5 }
  0x5a   : > { %v447_v57 = vrot.slane %v445_v26, 4  ;;  %v443_v61 = vsel %vm6728_vm4, %v438_v49, %v442_v14  ;;  %v450_v2 = vrot.slane %v448_v51, 5  ;;  %v458_v6 = vshrl.u32 %v6933_v35, 16  ;;  %v242_v26 = vld [vmem:[%s6702_s29 + $0x74] sm:$0x1] }
  0x5b   : > { %v456_v5 = vrot.slane %v454_v52, 5  ;;  %v5101_v7 = vcombine.low %v433_v48, %v443_v61  ;;  %v2237_v17 = vsel %vm6728_vm4, %v2232_v53, %v2236_v43  ;;  %v2242_v10 = vrot.slane %v2241_v55, 4  ;;  %v5354_v48 = vld [vmem:[%s6702_s29 + $0x18] sm:$0xe] }
  0x5c   : > { %v464_v11 = vshll.u32 %v241_v50, 16  ;;  %v451_v14 = vor.u32 %v450_v2, %v447_v57  ;;  %v460_v18 = vrot.slane %v458_v6, 4  ;;  %v5369_v21 = vrot.slane %v5353_v58, 9  ;;  %v6980_v53 = vld [vmem:[%s6702_s29 + $0x78] sm:$0xf] }
  0x5d   : > { %v2802_v25 = vrot.slane %v2800_v62, 4  ;;  %5960 = vmatmul.mubr.msk.bf16.gmra.mrb[12].mxu1 %vm686_vm3, %v5101_v7  ;;  %v2247_v31 = vsel %vm6728_vm4, %v2242_v10, %v2246_v56  ;;  %v469_v39 = vshrl.u32 %v6948_v0, 16  ;;  %v472_v42 = vshll.u32 %v6948_v0, 16  ;;  %v243_v57 = vld [vmem:[%s6702_s29 + $0x80] sm:$0x1] }
  0x5e   : > { %v466_v38 = vrot.slane %v464_v11, 5  ;;  %v5328_v43 = vcombine.low %v2237_v17, %v2247_v31  ;;  %v452_v44 = vrot.slane %v451_v14, 4  ;;  %v461_v45 = vor.u32 %v460_v18, %v456_v5  ;;  %v5355_v10 = vld [vmem:[%s6702_s29 + $0x24] sm:$0xe] }
  0x5f   : > { %v2801_v47 = vsel %vm6954_vm7, %v5369_v21, %v2800_v62  ;;  %v2804_v49 = vsel %vm6954_vm7, %v2802_v25, %v2803_v63  ;;  %v471_v50 = vrot.slane %v469_v39, 4  ;;  %v474_v51 = vrot.slane %v472_v42, 5  ;;  %v7006_v39 = vld [vmem:[%s6702_s29 + $0x84] sm:$0xf] }
  0x60   : > { %v478_v52 = vshll.u32 %v6961_v29, 16  ;;  %6096 = vmatmul.mubr.msk.bf16.gmra.mrb[12].mxu0 %vm686_vm3, %v5328_v43  ;;  %v457_v15 = vsel %vm6728_vm4, %v452_v44, %v456_v5  ;;  %v462_v62 = vrot.slane %v461_v45, 4  ;;  %v5386_v55 = vcombine.low %v2801_v47, %v2804_v49  ;;  %v7014_v43 = vld [vmem:[%s6702_s29 + $0x88] sm:$0xf] }
  0x61   : > { %v482_v56 = vshrl.u32 %v6961_v29, 16  ;;  %v475_v63 = vor.u32 %v474_v51, %v471_v50  ;;  %v488_v61 = vshll.u32 %v242_v26, 16  ;;  %v5370_v2 = vrot.slane %v5354_v48, 9 }
  0x62   : > { %v480_v58 = vrot.slane %v478_v52, 5  ;;  %v467_v6 = vsel %vm6728_vm4, %v462_v62, %v466_v38  ;;  %6117 = vmatprep.mubr.msk.bf16.mxu0 %vm686_vm3, %v5386_v55  ;;  %v2811_v5 = vsel %vm6954_vm7, %v6771_v30, %v2810_v28  ;;  %v493_v17 = vshrl.u32 %v6980_v53, 16  ;;  %v244_v52 = vld [vmem:[%s6702_s29 + $0x8c] sm:$0x1] }
  0x63   : > { %v484_v7 = vrot.slane %v482_v56, 4  ;;  %v5102_v11 = vcombine.low %v457_v15, %v467_v6  ;;  %v476_v14 = vrot.slane %v475_v63, 4  ;;  %v490_v18 = vrot.slane %v488_v61, 5 }
  0x64   : > { %v2808_v21 = vsel %vm6954_vm7, %v5370_v2, %v2807_v22  ;;  %v495_v38 = vrot.slane %v493_v17, 4  ;;  %v496_v1 = vshll.u32 %v6980_v53, 16  ;;  %v502_v30 = vshll.u32 %v6987_v16, 16  ;;  %v7019_v22 = vld [vmem:[%s8496_s1 + $0xe] sm:$0x3] }
  0x65   : > { %v485_v25 = vor.u32 %v484_v7, %v480_v58  ;;  %v5387_v31 = vcombine.low %v2808_v21, %v2811_v5  ;;  %5963 = vmatprep.mubr.msk.bf16.mxu1 %vm686_vm3, %v5102_v11  ;;  %v481_v28 = vsel %vm6728_vm4, %v476_v14, %v480_v58  ;;  %v506_v60 = vshrl.u32 %v6987_v16, 16  ;;  %v7038_v5 = vld [vmem:[%s6702_s29 + $0x90] sm:$0xf] }
  0x66   : > { %v512_v42 = vshll.u32 %v243_v57, 16  ;;  %v498_v45 = vrot.slane %v496_v1, 5  ;;  %v5371_v47 = vrot.slane %v5355_v10, 9  ;;  %v2814_v26 = vrot.slane %v6778_v46, 5  ;;  %v5356_v57 = vld [vmem:[%s6702_s29 + $0x30] sm:$0xe] }
  0x67   : > { %v486_v44 = vrot.slane %v485_v25, 4  ;;  %v504_v48 = vrot.slane %v502_v30, 5  ;;  %v508_v49 = vrot.slane %v506_v60, 4  ;;  %v2817_v51 = vrot.slane %v6787_v54, 5  ;;  %v7050_v30 = vld [vmem:[%s6702_s29 + $0x94] sm:$0xf] }
  0x68   : > { %v514_v50 = vrot.slane %v512_v42, 5  ;;  %6118 = vmatmul.mubr.msk.bf16.vlgmr.msra.gmra.mrb[0].mxu0 %vm686_vm3, %v5387_v31  ;;  %v499_v62 = vor.u32 %v498_v45, %v495_v38  ;;  %v2815_v55 = vsel %vm6954_vm7, %v5371_v47, %v2814_v26  ;;  %v2816_v56 = vrot.slane %v2814_v26, 4  ;;  %v245_v60 = vld [vmem:[%s6702_s29 + $0x98] sm:$0x1]  ;;  %v5357_v26 = vld [vmem:[%s6702_s29 + $0x3c] sm:$0xe] }
  0x69   : > { %v491_v15 = vsel %vm6728_vm4, %v486_v44, %v490_v18  ;;  %6150 = vmatpush3.bf16.msra.mxu0 %v6738_v41  ;;  %v509_v46 = vor.u32 %v508_v49, %v504_v48  ;;  %v517_v58 = vshrl.u32 %v7006_v39, 16  ;;  %v520_v54 = vshll.u32 %v7006_v39, 16 }
  0x6a   : > { %v5103_v63 = vcombine.low %v481_v28, %v491_v15  ;;  %v500_v61 = vrot.slane %v499_v62, 4  ;;  %v2818_v2 = vsel %vm6954_vm7, %v2816_v56, %v2817_v51  ;;  %v526_v6 = vshll.u32 %v7014_v43, 16  ;;  %6517 = vmatprep.subr.msk.bf16.mxu0 %vm735_vm0, %v7019_v22 }
  0x6b   : > { %v530_v7 = vshrl.u32 %v7014_v43, 16  ;;  %v510_v41 = vrot.slane %v509_v46, 4  ;;  %v5388_v17 = vcombine.low %v2815_v55, %v2818_v2  ;;  %v519_v10 = vrot.slane %v517_v58, 4  ;;  %v7070_v46 = vld [vmem:[%s6702_s29 + $0xa0] sm:$0xf] }
  0x6c   : > { %5964 = vmatmul.mubr.msk.bf16.gmra.mrb[16].mxu1 %vm686_vm3, %v5103_v63  ;;  %v522_v11 = vrot.slane %v520_v54, 5  ;;  %v505_v14 = vsel %vm6728_vm4, %v500_v61, %v504_v48  ;;  %v528_v18 = vrot.slane %v526_v6, 5  ;;  %v536_v25 = vshll.u32 %v244_v52, 16  ;;  %v7059_v52 = vld [vmem:[%s6702_s29 + $0x9c] sm:$0xf] }
  0x6d   : > { %v532_v21 = vrot.slane %v530_v7, 4  ;;  %v515_v31 = vsel %vm6728_vm4, %v510_v41, %v514_v50  ;;  %6121 = vmatprep.mubr.msk.bf16.mxu0 %vm686_vm3, %v5388_v17  ;;  %v5372_v1 = vrot.slane %v5356_v57, 9  ;;  %v2821_v28 = vrot.slane %v6807_v33, 5 }
  0x6e   : > { %v523_v38 = vor.u32 %v522_v11, %v519_v10  ;;  %v5104_v42 = vcombine.low %v505_v14, %v515_v31  ;;  %v538_v45 = vrot.slane %v536_v25, 5  ;;  %v2824_v47 = vrot.slane %v6815_v40, 5  ;;  %v246_v10 = vld [vmem:[%s6702_s29 + $0xa4] sm:$0x1]  ;;  %v5358_v11 = vld [vmem:[%s6702_s29 + $0x48] sm:$0xe] }
  0x6f   : > { %v533_v44 = vor.u32 %v532_v21, %v528_v18  ;;  %v2822_v49 = vsel %vm6954_vm7, %v5372_v1, %v2821_v28  ;;  %v2823_v50 = vrot.slane %v2821_v28, 4  ;;  %v541_v51 = vshrl.u32 %v7038_v5, 16 }
  0x70   : > { %v524_v48 = vrot.slane %v523_v38, 4  ;;  %5967 = vmatprep.mubr.msk.bf16.mxu1 %vm686_vm3, %v5104_v42  ;;  %v544_v15 = vshll.u32 %v7038_v5, 16  ;;  %v550_v62 = vshll.u32 %v7050_v30, 16  ;;  %v554_v40 = vshrl.u32 %v7050_v30, 16 }
  0x71   : > { %v534_v33 = vrot.slane %v533_v44, 4  ;;  %v2825_v56 = vsel %vm6954_vm7, %v2823_v50, %v2824_v47  ;;  %v543_v57 = vrot.slane %v541_v51, 4  ;;  %v560_v63 = vshll.u32 %v245_v60, 16 }
  0x72   : > { %v529_v55 = vsel %vm6728_vm4, %v524_v48, %v528_v18  ;;  %v5389_v54 = vcombine.low %v2822_v49, %v2825_v56  ;;  %v546_v61 = vrot.slane %v544_v15, 5  ;;  %v552_v2 = vrot.slane %v550_v62, 5  ;;  %v7096_v56 = vld [vmem:[%s6702_s29 + $0xac] sm:$0xf] }
  0x73   : > { %v539_v58 = vsel %vm6728_vm4, %v534_v33, %v538_v45  ;;  %v556_v7 = vrot.slane %v554_v40, 4  ;;  %v562_v41 = vrot.slane %v560_v63, 5  ;;  %v5373_v17 = vrot.slane %v5357_v26, 9  ;;  %v7091_v33 = vld [vmem:[%s6702_s29 + $0xa8] sm:$0xf] }
  0x74   : > { %v5105_v6 = vcombine.low %v529_v55, %v539_v58  ;;  %6122 = vmatmul.mubr.msk.bf16.gmra.mrb[4].mxu0 %vm686_vm3, %v5389_v54  ;;  %v547_v14 = vor.u32 %v546_v61, %v543_v57  ;;  %v2828_v18 = vrot.slane %v6832_v20, 5  ;;  %v2831_v21 = vrot.slane %v6837_v34, 5  ;;  %v247_v61 = vld [vmem:[%s6702_s29 + $0xb0] sm:$0x1] }
  0x75   : > { %v565_v25 = vshrl.u32 %v7059_v52, 16  ;;  %v557_v31 = vor.u32 %v556_v7, %v552_v2  ;;  %v568_v38 = vshll.u32 %v7059_v52, 16  ;;  %v574_v1 = vshll.u32 %v7070_v46, 16 }
  0x76   : > { %5968 = vmatmul.mubr.msk.bf16.gmra.mrb[20].mxu1 %vm686_vm3, %v5105_v6  ;;  %v578_v28 = vshrl.u32 %v7070_v46, 16  ;;  %v548_v60 = vrot.slane %v547_v14, 4  ;;  %v2829_v42 = vsel %vm6954_vm7, %v5373_v17, %v2828_v18  ;;  %v2830_v20 = vrot.slane %v2828_v18, 4  ;;  %v7111_v14 = vld [vmem:[%s6702_s29 + $0xb4] sm:$0xf] }
  0x77   : > { %v567_v44 = vrot.slane %v565_v25, 4  ;;  %v558_v34 = vrot.slane %v557_v31, 4  ;;  %v570_v45 = vrot.slane %v568_v38, 5  ;;  %v576_v47 = vrot.slane %v574_v1, 5 }
  0x78   : > { %v580_v26 = vrot.slane %v578_v28, 4  ;;  %v553_v48 = vsel %vm6728_vm4, %v548_v60, %v552_v2  ;;  %v2832_v49 = vsel %vm6954_vm7, %v2830_v20, %v2831_v21  ;;  %v584_v50 = vshll.u32 %v246_v10, 16  ;;  %v5359_v2 = vld [vmem:[%s6702_s29 + $0x54] sm:$0xe] }
  0x79   : > { %v5374_v51 = vrot.slane %v5358_v11, 9  ;;  %v563_v15 = vsel %vm6728_vm4, %v558_v34, %v562_v41  ;;  %v5390_v62 = vcombine.low %v2829_v42, %v2832_v49  ;;  %v571_v40 = vor.u32 %v570_v45, %v567_v44  ;;  %v7120_v42 = vld [vmem:[%s6702_s29 + $0xb8] sm:$0xf]  ;;  %v248_v49 = vld [vmem:[%s6702_s29 + $0xbc] sm:$0x1] }
  0x7a   : > { %v581_v55 = vor.u32 %v580_v26, %v576_v47  ;;  %v5106_v57 = vcombine.low %v553_v48, %v563_v15  ;;  %v586_v63 = vrot.slane %v584_v50, 5  ;;  %v2835_v58 = vrot.slane %v6855_v8, 5 }
  0x7b   : > { %v2838_v54 = vrot.slane %v6863_v23, 5  ;;  %6125 = vmatprep.mubr.msk.bf16.mxu0 %vm686_vm3, %v5390_v62  ;;  %v572_v6 = vrot.slane %v571_v40, 4  ;;  %v589_v41 = vshrl.u32 %v7091_v33, 16  ;;  %v592_v17 = vshll.u32 %v7091_v33, 16 }
  0x7c   : > { %v582_v7 = vrot.slane %v581_v55, 4  ;;  %5971 = vmatprep.mubr.msk.bf16.mxu1 %vm686_vm3, %v5106_v57  ;;  %v2836_v10 = vsel %vm6954_vm7, %v5374_v51, %v2835_v58  ;;  %v2837_v11 = vrot.slane %v2835_v58, 4  ;;  %v598_v8 = vshll.u32 %v7096_v56, 16  ;;  %v5360_v55 = vld [vmem:[%s6702_s29 + $0x60] sm:$0xe] }
  0x7d   : > { %v602_v23 = vshrl.u32 %v7096_v56, 16  ;;  %v577_v18 = vsel %vm6728_vm4, %v572_v6, %v576_v47  ;;  %v591_v25 = vrot.slane %v589_v41, 4  ;;  %v594_v31 = vrot.slane %v592_v17, 5  ;;  %v5361_v6 = vld [vmem:[%s6702_s29 + $0x6c] sm:$0xe] }
  0x7e   : > { %v587_v21 = vsel %vm6728_vm4, %v582_v7, %v586_v63  ;;  %v2839_v1 = vsel %vm6954_vm7, %v2837_v11, %v2838_v54  ;;  %v600_v28 = vrot.slane %v598_v8, 5  ;;  %v608_v34 = vshll.u32 %v247_v61, 16  ;;  %v5297_v11 = vld [vmem:[%s6702_s29 + $0x70] sm:$0xf]  ;;  %v5298_v8 = vld [vmem:[%s6702_s29 + $0x74] sm:$0x1] }
  0x7f   : > { %v5107_v38 = vcombine.low %v577_v18, %v587_v21  ;;  %v604_v60 = vrot.slane %v602_v23, 4  ;;  %v5391_v20 = vcombine.low %v2836_v10, %v2839_v1  ;;  %v595_v44 = vor.u32 %v594_v31, %v591_v25 }
  0x80   : > { %v5375_v45 = vrot.slane %v5359_v2, 9  ;;  %v2842_v26 = vrot.slane %v6886_v4, 5  ;;  %v2845_v48 = vrot.slane %v6892_v12, 5  ;;  %v613_v50 = vshrl.u32 %v7111_v14, 16 }
  0x81   : > { %5972 = vmatmul.mubr.msk.bf16.gmra.mrb[24].mxu1 %vm686_vm3, %v5107_v38  ;;  %v605_v47 = vor.u32 %v604_v60, %v600_v28  ;;  %6126 = vmatmul.mubr.msk.bf16.gmra.mrb[8].mxu0 %vm686_vm3, %v5391_v20  ;;  %v596_v51 = vrot.slane %v595_v44, 4  ;;  %v610_v15 = vrot.slane %v608_v34, 5  ;;  %v616_v62 = vshll.u32 %v7111_v14, 16 }
  0x82   : > { %v622_v40 = vshll.u32 %v7120_v42, 16  ;;  %v2843_v4 = vsel %vm6954_vm7, %v5375_v45, %v2842_v26  ;;  %v2844_v12 = vrot.slane %v2842_v26, 4  ;;  %v615_v63 = vrot.slane %v613_v50, 4 }
  0x83   : > { %v606_v57 = vrot.slane %v605_v47, 4  ;;  %v601_v58 = vsel %vm6728_vm4, %v596_v51, %v600_v28  ;;  %v618_v54 = vrot.slane %v616_v62, 5  ;;  %v626_v2 = vshrl.u32 %v7120_v42, 16  ;;  %v5362_v47 = vld [vmem:[%s6702_s29 + $0x78] sm:$0xe] }
  0x84   : > { %v624_v61 = vrot.slane %v622_v40, 5  ;;  %v2846_v41 = vsel %vm6954_vm7, %v2844_v12, %v2845_v48  ;;  %v632_v17 = vshll.u32 %v248_v49, 16  ;;  %v5376_v10 = vrot.slane %v5360_v55, 9  ;;  %v6576_v51 = vld [vmem:[%s6702_s29] sm:$0xf] }
  0x85   : > { %v611_v7 = vsel %vm6728_vm4, %v606_v57, %v610_v15  ;;  %v5392_v18 = vcombine.low %v2843_v4, %v2846_v41  ;;  %v619_v21 = vor.u32 %v618_v54, %v615_v63  ;;  %v628_v25 = vrot.slane %v626_v2, 4  ;;  %v7158_v15 = vld [vmem:[%s6702_s29 + $0x4] sm:$0xf]  ;;  %v7162_v40 = vld [vmem:[%s6702_s29 + $0x7c] sm:$0xf] }
  0x86   : > { %v5108_v23 = vcombine.low %v601_v58, %v611_v7  ;;  %v634_v31 = vrot.slane %v632_v17, 5  ;;  %v2849_v38 = vrot.slane %v6916_v59, 5  ;;  %v2852_v1 = vrot.slane %v6923_v9, 5  ;;  %v7165_v55 = vld [vmem:[%s6702_s29 + $0x80] sm:$0x1] }
  0x87   : > { %v5377_v28 = vrot.slane %v5361_v6, 9  ;;  %6129 = vmatprep.mubr.msk.bf16.mxu0 %vm686_vm3, %v5392_v18  ;;  %v620_v60 = vrot.slane %v619_v21, 4  ;;  %v629_v20 = vor.u32 %v628_v25, %v624_v61  ;;  %v2856_v44 = vrot.slane %v5297_v11, 5  ;;  %v5303_v57 = vld [vmem:[%s6702_s29 + $0x88] sm:$0xf] }
  0x88   : > { %5975 = vmatprep.mubr.msk.bf16.mxu1 %vm686_vm3, %v5108_v23  ;;  %v2859_v34 = vrot.slane %v5298_v8, 5  ;;  %v2850_v45 = vsel %vm6954_vm7, %v5376_v10, %v2849_v38  ;;  %v2851_v59 = vrot.slane %v2849_v38, 4  ;;  %v5126_v62 = vcombine.low %v6576_v51, %v7158_v15  ;;  %v5304_v54 = vld [vmem:[%s6702_s29 + $0x8c] sm:$0x1]  ;;  %v5306_v17 = vld [vmem:[%s6702_s29 + $0x94] sm:$0xf] }
  0x89   : > { %v625_v9 = vsel %vm6728_vm4, %v620_v60, %v624_v61  ;;  %v630_v26 = vrot.slane %v629_v20, 4  ;;  %v2857_v48 = vsel %vm6954_vm7, %v5377_v28, %v2856_v44  ;;  %v2858_v49 = vrot.slane %v2856_v44, 4  ;;  %v5363_v61 = vld [vmem:[%s6702_s29 + $0x84] sm:$0xe]  ;;  %v5364_v23 = vld [vmem:[%s6702_s29 + $0x90] sm:$0xe] }
  0x8a   : > { %v2853_v50 = vsel %vm6954_vm7, %v2851_v59, %v2852_v1  ;;  %v5378_v58 = vrot.slane %v5362_v47, 9  ;;  %v2863_v7 = vrot.slane %v7162_v40, 5  ;;  %v2866_v41 = vrot.slane %v7165_v55, 5  ;;  %v5307_v25 = vld [vmem:[%s6702_s29 + $0x98] sm:$0x1] }
  0x8b   : > { %v635_v4 = vsel %vm6728_vm4, %v630_v26, %v634_v31  ;;  %v5393_v12 = vcombine.low %v2850_v45, %v2853_v50  ;;  %v2860_v63 = vsel %vm6954_vm7, %v2858_v49, %v2859_v34  ;;  %v5379_v10 = vrot.slane %v5363_v61, 9  ;;  %v5309_v31 = vld [vmem:[%s6702_s29 + $0xa0] sm:$0xf]  ;;  %v5310_v60 = vld [vmem:[%s6702_s29 + $0xa4] sm:$0x1] }
  0x8c   : > { %v5109_v2 = vcombine.low %v625_v9, %v635_v4  ;;  %v5394_v6 = vcombine.low %v2857_v48, %v2860_v63  ;;  %v2870_v11 = vrot.slane %v5303_v57, 5  ;;  %v2873_v8 = vrot.slane %v5304_v54, 5  ;;  %v5365_v20 = vld [vmem:[%s6702_s29 + $0x9c] sm:$0xe]  ;;  %v6578_v44 = vld [vmem:[%s6702_s29 + $0xc] sm:$0xf] }
  0x8d   : > { %6130 = vmatmul.mubr.msk.bf16.gmra.mrb[12].mxu0 %vm686_vm3, %v5393_v12  ;;  %v2864_v18 = vsel %vm6954_vm7, %v5378_v58, %v2863_v7  ;;  %v2865_v21 = vrot.slane %v2863_v7, 4  ;;  %v2877_v28 = vrot.slane %v5306_v17, 5  ;;  %v7192_v34 = vld [vmem:[%s6702_s29 + $0x10] sm:$0xf]  ;;  %v6580_v47 = vld [vmem:[%s6702_s29 + $0x18] sm:$0xf] }
  0x8e   : > { %5976 = vmatmul.mubr.msk.bf16.gmra.mrb[28].mxu1 %vm686_vm3, %v5109_v2  ;;  %6133 = vmatprep.mubr.msk.bf16.mxu0 %vm686_vm3, %v5394_v6  ;;  %v2871_v38 = vsel %vm6954_vm7, %v5379_v10, %v2870_v11  ;;  %v2872_v1 = vrot.slane %v2870_v11, 4  ;;  %v5127_v45 = vcombine.low %v6578_v44, %v7192_v34  ;;  %v7199_v9 = vld [vmem:[%s6702_s29 + $0x1c] sm:$0xf]  ;;  %v5380_v48 = vrot.slane %v5364_v23, 9  ;;  %v5312_v57 = vld [vmem:[%s6702_s29 + $0xac] sm:$0xf] }
  0x8f   : > { %5981 = vmatprep.mubr.msk.bf16.mxu1 %vm686_vm3, %v5126_v62  ;;  %v2867_v59 = vsel %vm6954_vm7, %v2865_v21, %v2866_v41  ;;  %v5128_v26 = vcombine.low %v6580_v47, %v7199_v9  ;;  %v2879_v51 = vrot.slane %v2877_v28, 4  ;;  %v2880_v62 = vrot.slane %v5307_v25, 5  ;;  %v6582_v54 = vld [vmem:[%s8496_s1 + $0x4] sm:$0x3]  ;;  %v5315_v2 = vld [vmem:[%s6702_s29 + $0xb8] sm:$0xf] }
  0x90   : > { %v5395_v49 = vcombine.low %v2864_v18, %v2867_v59  ;;  %v2874_v50 = vsel %vm6954_vm7, %v2872_v1, %v2873_v8  ;;  %v5381_v12 = vrot.slane %v5365_v20, 9  ;;  %v2884_v63 = vrot.slane %v5309_v31, 5  ;;  %v7214_v7 = vld [vmem:[%s8496_s1 + $0x6] sm:$0x3]  ;;  %v5313_v10 = vld [vmem:[%s6702_s29 + $0xb0] sm:$0x1] }
  0x91   : > { %v5396_v4 = vcombine.low %v2871_v38, %v2874_v50  ;;  %v2887_v58 = vrot.slane %v5310_v60, 5  ;;  %v1454_v61 = vsel %vm735_vm0, %v6582_v54, 0  ;;  %v2878_v41 = vsel %vm6954_vm7, %v5380_v48, %v2877_v28  ;;  %v5366_v11 = vld [vmem:[%s6702_s29 + $0xa8] sm:$0xe]  ;;  %v5316_v25 = vld [vmem:[%s6702_s29 + $0xbc] sm:$0x1] }
  0x92   : > { %v2886_v6 = vrot.slane %v2884_v63, 4  ;;  %v2881_v17 = vsel %vm6954_vm7, %v2879_v51, %v2880_v62  ;;  %v2891_v8 = vrot.slane %v5312_v57, 5  ;;  %v2885_v23 = vsel %vm6954_vm7, %v5381_v12, %v2884_v63  ;;  %v5367_v31 = vld [vmem:[%s6702_s29 + $0xb4] sm:$0xe]  ;;  %v6583_v38 = vld [vmem:[%s6702_s29 + $0x24] sm:$0xf] }
  0x93   : > { %v2898_v21 = vrot.slane %v5315_v2, 5  ;;  %v7235_v1 = vld [vmem:[%s6702_s29 + $0x28] sm:$0xf]  ;;  %v5397_v60 = vcombine.low %v2878_v41, %v2881_v17  ;;  %v5382_v44 = vrot.slane %v5366_v11, 9  ;;  %v2894_v59 = vrot.slane %v5313_v10, 5 }
  0x94   : > { %v2888_v18 = vsel %vm6954_vm7, %v2886_v6, %v2887_v58  ;;  %v5129_v28 = vcombine.low %v6583_v38, %v7235_v1  ;;  %v6585_v47 = vld [vmem:[%s6702_s29 + $0x30] sm:$0xf]  ;;  %v2901_v51 = vrot.slane %v5316_v25, 5  ;;  %v5318_v62 = vld [vmem:[%s6702_s29 + $0xc4] sm:$0xf]  ;;  %v2286_v25 = vshrl.u32 %v7162_v40, 16 }
  0x95   : > { %6134 = vmatmul.mubr.msk.bf16.gmra.mrb[16].mxu0 %vm686_vm3, %v5395_v49  ;;  %v5398_v20 = vcombine.low %v2885_v23, %v2888_v18  ;;  %v5383_v49 = vrot.slane %v5367_v31, 9  ;;  %v2900_v50 = vrot.slane %v2898_v21, 4  ;;  %v2892_v57 = vsel %vm6954_vm7, %v5382_v44, %v2891_v8  ;;  %v5368_v12 = vld [vmem:[%s6702_s29 + $0xc0] sm:$0xe]  ;;  %v6587_v41 = vld [vmem:[%s6702_s29 + $0x3c] sm:$0xf] }
  0x96   : > { %5982 = vmatmul.mubr.msk.bf16.vlgmr.msra.gmra.mrb[0].mxu1 %vm686_vm3, %v5127_v45  ;;  %6137 = vmatprep.mubr.msk.bf16.mxu0 %vm686_vm3, %v5396_v4  ;;  %v2893_v45 = vrot.slane %v2891_v8, 4  ;;  %v2905_v63 = vrot.slane %v5318_v62, 5  ;;  %v5384_v6 = vrot.slane %v5368_v12, 9  ;;  %v7260_v17 = vld [vmem:[%s6702_s29 + $0x40] sm:$0xf]  ;;  %v5132_v18 = vcombine.low %v6867_v27, %v6870_v36  ;;  %v6539_v62 = vld [vmem:[%s6702_s29 + $0x24] sm:$0xff]  }
  0x97   : > { %6014 = vmatpush3.bf16.msra.mxu1 %v1454_v61  ;;  %5985 = vmatprep.mubr.msk.bf16.mxu1 %vm686_vm3, %v5128_v26  ;;  %v7240_v26 = vld [vmem:[%s6702_s29 + $0x34] sm:$0xf]  ;;  %v2899_v58 = vsel %vm6954_vm7, %v5383_v49, %v2898_v21  ;;  %v2902_v54 = vsel %vm6954_vm7, %v2900_v50, %v2901_v51  ;;  %v5319_v61 = vld [vmem:[%s6702_s29 + $0xc8] sm:$0x1]  ;;  %v5131_v10 = vcombine.low %v6587_v41, %v7260_v17  ;;  %v2282_v21 = vshll.u32 %v7162_v40, 16 }
  0x98   : > { %6512 = vmatprep.subr.msk.bf16.mxu1 %vm735_vm0, %v7214_v7  ;;  %v5130_v48 = vcombine.low %v6585_v47, %v7240_v26  ;;  %v2895_v4 = vsel %vm6954_vm7, %v2893_v45, %v2894_v59  ;;  %v5400_v11 = vcombine.low %v2899_v58, %v2902_v54  ;;  %v2907_v8 = vrot.slane %v2905_v63, 4  ;;  %v1192_v45 = vld [vmem:[%s6702_s29] sm:$0xe]  ;;  %v1193_v59 = vld [vmem:[%s6702_s29 + $0xc] sm:$0xe] }
  0x99   : > { %v5399_v2 = vcombine.low %v2892_v57, %v2895_v4  ;;  %v2908_v23 = vrot.slane %v5319_v61, 5  ;;  %v2906_v31 = vsel %vm6954_vm7, %v5384_v6, %v2905_v63  ;;  %v7275_v27 = vrot.slane %v2282_v21, 5  ;;  %v1196_v41 = vld [vmem:[%s6702_s29 + $0x30] sm:$0xe] }
  0x9a   : > { %v2288_v36 = vrot.slane %v2286_v25, 4  ;;  %v5134_v44 = vcombine.low %v6927_v19, %v6933_v35  ;;  %v2292_v47 = vshll.u32 %v7165_v55, 16  ;;  %v5158_v19 = vrot.slane %v1192_v45, 9 }
  0x9b   : > { %v2909_v38 = vsel %vm6954_vm7, %v2907_v8, %v2908_v23  ;;  %8518 = vst [vmem:[#allocation3_spill] sm:$0xff] %v7275_v27  ;;  %v5159_v35 = vrot.slane %v1193_v59, 9  ;;  %v1259_v4 = vrot.slane %v7199_v9, 5  ;;  %v1266_v12 = vrot.slane %v7235_v1, 5  ;;  %v1197_v8 = vld [vmem:[%s6702_s29 + $0x3c] sm:$0xe] }
  0x9c   : > { %v5401_v40 = vcombine.low %v2906_v31, %v2909_v38  ;;  %v2289_v49 = vor.u32 %v2288_v36, %v7275_v27  ;;  %v7295_v51 = vrot.slane %v2292_v47, 5  ;;  %v5135_v58 = vcombine.low %v6948_v0, %v6961_v29  ;;  %v1198_v31 = vld [vmem:[%s6702_s29 + $0x48] sm:$0xe]  ;;  %v6593_v59 = vld [vmem:[%s6702_s29 + $0x38] sm:$0x1] }
  0x9d   : > { %6138 = vmatmul.mubr.msk.bf16.gmra.mrb[20].mxu0 %vm686_vm3, %v5397_v60  ;;  %v5133_v60 = vcombine.low %v6896_v24, %v6902_v37  ;;  %v6590_v24 = vld [vmem:[%s6702_s29 + $0x14] sm:$0x1]  ;;  %v4094_v54 = vsel %vm735_vm0, %v7019_v22, 0  ;;  %v5136_v61 = vcombine.low %v6980_v53, %v6987_v16  ;;  %v5137_v6 = vcombine.low %v7006_v39, %v7014_v43  ;;  %v6591_v16 = vld [vmem:[%s6702_s29 + $0x20] sm:$0x1] }
  0x9e   : > { %5986 = vmatmul.mubr.msk.bf16.gmra.mrb[4].mxu1 %vm686_vm3, %v5129_v28  ;;  %6141 = vmatprep.mubr.msk.bf16.mxu0 %vm686_vm3, %v5398_v20  ;;  %v1252_v28 = vrot.slane %v7192_v34, 5  ;;  %v6537_v20 = vld [vmem:[%s6702_s29 + $0x18] sm:$0xff]   ;;  %v6589_v34 = vld [vmem:[%s6702_s29 + $0x8] sm:$0x1]  ;;  %v1255_v37 = vrot.slane %v6590_v24, 5  ;;  %8519 = vst [vmem:[#allocation4_spill] sm:$0xff] %v7295_v51  ;;  %v5138_v9 = vcombine.low %v7038_v5, %v7050_v30 }
  0x9f   : > { %5989 = vmatprep.mubr.msk.bf16.mxu1 %vm686_vm3, %v5130_v48  ;;  %v1245_v48 = vrot.slane %v7158_v15, 5  ;;  %v1248_v50 = vrot.slane %v6589_v34, 5  ;;  %v1194_v15 = vld [vmem:[%s6702_s29 + $0x18] sm:$0xe]  ;;  %v7300_v63 = vrot.slane %v2289_v49, 4  ;;  %v1262_v22 = vrot.slane %v6591_v16, 5 }
  0xa0   : > { %v1254_v55 = vrot.slane %v1252_v28, 4  ;;  %v5160_v1 = vrot.slane %v1194_v15, 9  ;;  %v7322_v29 = vsel %vm6954_vm7, %v5159_v35, %v1252_v28  ;;  %v1268_v25 = vrot.slane %v1266_v12, 4  ;;  %v5483_v24 = vld [vmem:[%s6702_s29 + $0x18] sm:$0xf] }
  0xa1   : > { %v1247_v57 = vrot.slane %v1245_v48, 4  ;;  %8520 = vst [vmem:[#allocation5_spill] sm:$0xff] %v7300_v63  ;;  %v7318_v0 = vsel %vm6954_vm7, %v5158_v19, %v1245_v48  ;;  %v1276_v47 = vrot.slane %v6593_v59, 5  ;;  %v7359_v49 = vsel %vm735_vm0, %v7214_v7, 0  ;;  %v5484_v7 = vld [vmem:[%s6702_s29 + $0x1c] sm:$0xf] }
  0xa2   : > { %v7326_v53 = vsel %vm6954_vm7, %v1254_v55, %v1255_v37  ;;  %v7363_v34 = vsel %vm6954_vm7, %v5160_v1, %v1259_v4  ;;  %v6543_v37 = vld [vmem:[%s6702_s29 + $0x3c] sm:$0xff]   ;;  %v5163_v35 = vrot.slane %v1197_v8, 9  ;;  %v6594_v55 = vld [vmem:[%s6702_s29 + $0x44] sm:$0x1]  ;;  %v3615_v8 = vshll.u32 %v5483_v24, 16 }
  0xa3   : > { %v7337_v23 = vsel %vm6954_vm7, %v1247_v57, %v1248_v50  ;;  %v1199_v50 = vld [vmem:[%s6702_s29 + $0x54] sm:$0xe]  ;;  %v1283_v15 = vrot.slane %v6594_v55, 5  ;;  %v5487_v39 = vld [vmem:[%s6702_s29 + $0x28] sm:$0xf] }
  0xa4   : > { %v6601_v5 = vld [vmem:[%s6702_s29 + $0x70] sm:$0xf] }
  0xa5   : > { %6142 = vmatmul.mubr.msk.bf16.gmra.mrb[24].mxu0 %vm686_vm3, %v5399_v2  ;;  %v1195_v2 = vld [vmem:[%s6702_s29 + $0x24] sm:$0xe]  ;;  %v1308_v30 = vrot.slane %v6601_v5, 5 }
  0xa6   : > { %5990 = vmatmul.mubr.msk.bf16.gmra.mrb[8].mxu1 %vm686_vm3, %v5131_v10  ;;  %6145 = vmatprep.mubr.msk.bf16.mxu0 %vm686_vm3, %v5400_v11  ;;  %v1273_v10 = vrot.slane %v7240_v26, 5  ;;  %v6541_v11 = vld [vmem:[%s6702_s29 + $0x30] sm:$0xff]   ;;  %v5161_v21 = vrot.slane %v1195_v2, 9 }
  0xa7   : > { %5993 = vmatprep.mubr.msk.bf16.mxu1 %vm686_vm3, %v5132_v18  ;;  %v7333_v26 = vld [vmem:[%s8496_s1 + $0x10] sm:$0x3]  ;;  %v1261_v18 = vrot.slane %v1259_v4, 4  ;;  %v1310_v48 = vrot.slane %v1308_v30, 4 }
  0xa8   : > { %v1275_v45 = vrot.slane %v1273_v10, 4  ;;  %v7370_v19 = vsel %vm6954_vm7, %v5161_v21, %v1266_v12  ;;  %v3625_v21 = vshrl.u32 %v5484_v7, 16 }
  0xa9   : > { %v7379_v4 = vsel %vm6954_vm7, %v1261_v18, %v1262_v22  ;;  %v3612_v22 = vshrl.u32 %v5483_v24, 16  ;;  %v3621_v18 = vshll.u32 %v5484_v7, 16  ;;  %v5486_v24 = vld [vmem:[%s6702_s29 + $0x24] sm:$0xf] }
  0xaa   : > { %v7392_v1 = vsel %vm6954_vm7, %v1275_v45, %v1276_v47 }
  0xab   : > { %v3614_v43 = vrot.slane %v3612_v22, 4  ;;  %v7434_v7 = vrot.slane %v3621_v18, 5  ;;  %v3639_v22 = vshll.u32 %v5486_v24, 16  ;;  %v3649_v18 = vshrl.u32 %v5487_v39, 16 }
  0xad   : > { %6146 = vmatmul.mubr.msk.bf16.gmra.mrb[28].mxu0 %vm686_vm3, %v5401_v40  ;;  %v6592_v40 = vld [vmem:[%s6702_s29 + $0x2c] sm:$0x1]  ;;  %v3641_v27 = vrot.slane %v3639_v22, 5 }
  0xae   : > { %5994 = vmatmul.mubr.msk.bf16.gmra.mrb[12].mxu1 %vm686_vm3, %v5133_v60  ;;  %6151 = vmatprep.mubr.msk.bf16.mxu0 %vm686_vm3, %v6537_v20  ;;  %v1269_v28 = vrot.slane %v6592_v40, 5  ;;  %v1280_v60 = vrot.slane %v7260_v17, 5  ;;  %v6597_v40 = vld [vmem:[%s6702_s29 + $0x50] sm:$0x1]  ;;  %v6602_v17 = vld [vmem:[%s6702_s29 + $0x74] sm:$0x1] }
  0xaf   : > { %5997 = vmatprep.mubr.msk.bf16.mxu1 %vm686_vm3, %v5134_v44  ;;  %v5162_v44 = vrot.slane %v1196_v41, 9  ;;  %v5165_v41 = vrot.slane %v1199_v50, 9  ;;  %v1200_v50 = vld [vmem:[%s6702_s29 + $0x60] sm:$0xe]  ;;  %v5488_v20 = vld [vmem:[%s6702_s29 + $0x2c] sm:$0x1] }
  0xb0   : > { %v1282_v12 = vrot.slane %v1280_v60, 4  ;;  %v7405_v45 = vsel %vm6954_vm7, %v5163_v35, %v1280_v60  ;;  %v6598_v35 = vld [vmem:[%s6702_s29 + $0x5c] sm:$0x1] }
  0xb1   : > { %v7388_v2 = vsel %vm6954_vm7, %v5162_v44, %v1273_v10  ;;  %v1297_v55 = vrot.slane %v6598_v35, 5  ;;  %v1201_v35 = vld [vmem:[%s6702_s29 + $0x6c] sm:$0xe] }
  0xb2   : > { %v7409_v59 = vsel %vm6954_vm7, %v1282_v12, %v1283_v15  ;;  %v6599_v15 = vld [vmem:[%s6702_s29 + $0x64] sm:$0xf]  ;;  %v3627_v12 = vrot.slane %v3625_v21, 4  ;;  %v5167_v5 = vrot.slane %v1201_v35, 9 }
  0xb3   : > { %v6549_v21 = vld [vmem:[%s6702_s29 + $0x60] sm:$0xff]  }
  0xb5   : > { %6152 = vmatmul.mubr.msk.bf16.vlgmr.msra.gmra.mrb[0].mxu0 %vm686_vm3, %v6539_v62  ;;  %v6595_v62 = vld [vmem:[%s6702_s29 + $0x4c] sm:$0xf] }
  0xb6   : > { %5998 = vmatmul.mubr.msk.bf16.gmra.mrb[16].mxu1 %vm686_vm3, %v5135_v58  ;;  %6184 = vmatpush3.bf16.msra.mxu0 %v4094_v54  ;;  %v1287_v57 = vrot.slane %v6595_v62, 5  ;;  %v7383_v58 = vsel %vm6954_vm7, %v1268_v25, %v1269_v28  ;;  %v5164_v54 = vrot.slane %v1198_v31, 9  ;;  %v1290_v28 = vrot.slane %v6597_v40, 5 }
  0xb7   : > { %6001 = vmatprep.mubr.msk.bf16.mxu1 %vm686_vm3, %v5136_v61  ;;  %6155 = vmatprep.mubr.msk.bf16.mxu0 %vm686_vm3, %v6541_v11  ;;  %v6545_v61 = vld [vmem:[%s6702_s29 + $0x48] sm:$0xff]   ;;  %v6596_v11 = vld [vmem:[%s6702_s29 + $0x58] sm:$0xf]  ;;  %v1301_v62 = vrot.slane %v6599_v15, 5  ;;  %v5490_v15 = vld [vmem:[%s6702_s29 + $0x34] sm:$0xf] }
  0xb8   : > { %6518 = vmatprep.subr.msk.bf16.mxu0 %vm735_vm0, %v7333_v26  ;;  %v1294_v16 = vrot.slane %v6596_v11, 5  ;;  %v1289_v31 = vrot.slane %v1287_v57, 4  ;;  %v7413_v47 = vsel %vm6954_vm7, %v5164_v54, %v1287_v57  ;;  %v5485_v57 = vld [vmem:[%s6702_s29 + $0x20] sm:$0x1]  ;;  %v5489_v54 = vld [vmem:[%s6702_s29 + $0x30] sm:$0xf] }
  0xb9   : > { %v5166_v11 = vrot.slane %v1200_v50, 9  ;;  %v3663_v50 = vshll.u32 %v5489_v54, 16  ;;  %v3631_v25 = vshll.u32 %v5485_v57, 16  ;;  %v3669_v36 = vshll.u32 %v5490_v15, 16 }
  0xba   : > { %v7424_v60 = vsel %vm6954_vm7, %v5165_v41, %v1294_v16  ;;  %v7440_v41 = vsel %vm6954_vm7, %v1289_v31, %v1290_v28  ;;  %v1303_v31 = vrot.slane %v1301_v62, 4  ;;  %v3660_v28 = vshrl.u32 %v5489_v54, 16 }
  0xbb   : > { %v7482_v35 = vrot.slane %v3669_v36, 5 }
  0xbd   : > { %6156 = vmatmul.mubr.msk.bf16.gmra.mrb[4].mxu0 %vm686_vm3, %v6543_v37  ;;  %v1296_v37 = vrot.slane %v1294_v16, 4  ;;  %v6600_v16 = vld [vmem:[%s6702_s29 + $0x68] sm:$0x1] }
  0xbe   : > { %6002 = vmatmul.mubr.msk.bf16.gmra.mrb[20].mxu1 %vm686_vm3, %v5137_v6  ;;  %6159 = vmatprep.mubr.msk.bf16.mxu0 %vm686_vm3, %v6545_v61  ;;  %v3617_v6 = vrot.slane %v3615_v8, 5  ;;  %v6547_v61 = vld [vmem:[%s6702_s29 + $0x54] sm:$0xff]   ;;  %v1304_v40 = vrot.slane %v6600_v16, 5  ;;  %v3645_v8 = vshll.u32 %v5487_v39, 16  ;;  %v3628_v16 = vor.u32 %v3627_v12, %v7434_v7 }
  0xbf   : > { %6005 = vmatprep.mubr.msk.bf16.mxu1 %vm686_vm3, %v5138_v9  ;;  %v3636_v9 = vshrl.u32 %v5486_v24, 16  ;;  %v7449_v44 = vsel %vm6954_vm7, %v1296_v37, %v1297_v55  ;;  %v1311_v24 = vrot.slane %v6602_v17, 5  ;;  %v3673_v39 = vshrl.u32 %v5490_v15, 16 }
  0xc0   : > { %v3618_v10 = vor.u32 %v3617_v6, %v3614_v43  ;;  %v7455_v37 = vrot.slane %v3645_v8, 5  ;;  %v3651_v55 = vrot.slane %v3649_v18, 4  ;;  %v8521_v43 = vcombine.low %v7059_v52, %v7070_v46  ;;  %v6603_v8 = vld [vmem:[%s6702_s29 + $0x7c] sm:$0xf]  ;;  %v7491_v18 = vld [vmem:[%s6702_s29 + $0x38] sm:$0x1] }
  0xc1   : > { %v3638_v38 = vrot.slane %v3636_v9, 4  ;;  %v7464_v17 = vsel %vm6954_vm7, %v5166_v11, %v1301_v62  ;;  %v7468_v57 = vsel %vm6954_vm7, %v1303_v31, %v1304_v40  ;;  %v3662_v6 = vrot.slane %v3660_v28, 4  ;;  %8523 = vst [vmem:[#allocation6_spill] sm:$0xff] %v7491_v18 }
  0xc2   : > { %v3665_v12 = vrot.slane %v3663_v50, 5  ;;  %v8522_v52 = vcombine.low %v7091_v33, %v7096_v56  ;;  %v3619_v46 = vrot.slane %v3618_v10, 4  ;;  %v3629_v54 = vrot.slane %v3628_v16, 4  ;;  %v6551_v33 = vld [vmem:[%s6702_s29 + $0x6c] sm:$0xff]   ;;  %v1203_v16 = vld [vmem:[%s6702_s29 + $0x84] sm:$0xe] }
  0xc3   : > { %v3655_v62 = vshll.u32 %v5488_v20, 16  ;;  %v7476_v11 = vsel %vm6954_vm7, %v5167_v5, %v1308_v30  ;;  %v7480_v40 = vsel %vm6954_vm7, %v1310_v48, %v1311_v24  ;;  %v3675_v9 = vrot.slane %v3673_v39, 4  ;;  %v6552_v48 = vld [vmem:[%s6702_s29 + $0x78] sm:$0xff]  }
  0xc4   : > { %v3642_v10 = vor.u32 %v3641_v27, %v3638_v38  ;;  %v3652_v20 = vor.u32 %v3651_v55, %v7455_v37  ;;  %v1315_v30 = vrot.slane %v6603_v8, 5  ;;  %v3666_v38 = vor.u32 %v3665_v12, %v3662_v6  ;;  %v5492_v5 = vld [vmem:[%s6702_s29 + $0x3c] sm:$0xf] }
  0xc5   : > { %6160 = vmatmul.mubr.msk.bf16.gmra.mrb[8].mxu0 %vm686_vm3, %v6547_v61  ;;  %v3633_v61 = vrot.slane %v3631_v25, 5  ;;  %v1202_v25 = vld [vmem:[%s6702_s29 + $0x78] sm:$0xe]  ;;  %v7507_v50 = vrot.slane %v3655_v62, 5  ;;  %v3676_v39 = vor.u32 %v3675_v9, %v7482_v35  ;;  %v3679_v55 = vshll.u32 %v7491_v18, 16 }
  0xc6   : > { %6006 = vmatmul.mubr.msk.bf16.gmra.mrb[24].mxu1 %vm686_vm3, %v8521_v43  ;;  %6163 = vmatprep.mubr.msk.bf16.mxu0 %vm686_vm3, %v6549_v21  ;;  %v3624_v21 = vsel %vm6728_vm4, %v3619_v46, %v7434_v7  ;;  %v5168_v24 = vrot.slane %v1202_v25, 9  ;;  %v6604_v43 = vld [vmem:[%s6702_s29 + $0x88] sm:$0xf]  ;;  %v7515_v7 = vld [vmem:[%s6702_s29 + $0x40] sm:$0xf]  ;;  %v3643_v12 = vrot.slane %v3642_v10, 4  ;;  %v8525_v62 = vcombine.low %v7111_v14, %v7120_v42 }
  0xc7   : > { %6009 = vmatprep.mubr.msk.bf16.mxu1 %vm686_vm3, %v8522_v52  ;;  %v3634_v31 = vsel %vm6728_vm4, %v3629_v54, %v3633_v61  ;;  %v1322_v6 = vrot.slane %v6604_v43, 5  ;;  %8524 = vst [vmem:[#allocation7_spill] sm:$0xff] %v7515_v7  ;;  %v3653_v52 = vrot.slane %v3652_v20, 4  ;;  %v1317_v46 = vrot.slane %v1315_v30, 4  ;;  %v6605_v54 = vld [vmem:[%s6702_s29 + $0x80] sm:$0x1] }
  0xc8   : > { %v1318_v61 = vrot.slane %v6605_v54, 5  ;;  %v3667_v9 = vrot.slane %v3666_v38, 4  ;;  %v5169_v25 = vrot.slane %v1203_v16, 9  ;;  %v3684_v8 = vshrl.u32 %v5492_v5, 16  ;;  %v6553_v10 = vld [vmem:[%s6702_s29 + $0x84] sm:$0xff]  }
  0xc9   : > { %v3687_v43 = vshll.u32 %v5492_v5, 16  ;;  %v7529_v20 = vcombine.low %v3624_v21, %v3634_v31  ;;  %v7533_v14 = vsel %vm735_vm0, %v7333_v26, 0  ;;  %v3697_v38 = vshrl.u32 %v7515_v7, 16  ;;  %v6554_v21 = vld [vmem:[%s6702_s29 + $0x90] sm:$0xff]   ;;  %v6610_v18 = vld [vmem:[%s6702_s29 + $0xa0] sm:$0xf] }
  0xca   : > { %v3677_v16 = vrot.slane %v3676_v39, 4  ;;  %v3681_v5 = vrot.slane %v3679_v55, 5  ;;  %v1324_v54 = vrot.slane %v1322_v6, 4  ;;  %v3648_v31 = vsel %vm6728_vm4, %v3643_v12, %v7455_v37 }
  0xcb   : > { %v3658_v26 = vsel %vm6728_vm4, %v3653_v52, %v7507_v50  ;;  %v7548_v39 = vsel %vm6954_vm7, %v5168_v24, %v1315_v30  ;;  %v7552_v55 = vsel %vm6954_vm7, %v1317_v46, %v1318_v61  ;;  %v3672_v37 = vsel %vm6728_vm4, %v3667_v9, %v7482_v35  ;;  %v5498_v30 = vld [vmem:[%s6702_s29 + $0x54] sm:$0xf]  ;;  %v7569_v24 = vld [vmem:[%s6702_s29 + $0x58] sm:$0xf]  ;;  %v7574_v61 = vld [vmem:[%s6702_s29 + $0x90] sm:$0xe] }
  0xcc   : > { %v7565_v12 = vsel %vm6954_vm7, %v5169_v25, %v1322_v6  ;;  %v3686_v50 = vrot.slane %v3684_v8, 4  ;;  %v3689_v52 = vrot.slane %v3687_v43, 5  ;;  %v3699_v46 = vrot.slane %v3697_v38, 4 }
  0xcd   : > { %6164 = vmatmul.mubr.msk.bf16.gmra.mrb[12].mxu0 %vm686_vm3, %v6551_v33  ;;  %v8526_v33 = vcombine.low %v7318_v0, %v7337_v23  ;;  %v6606_v0 = vld [vmem:[%s6702_s29 + $0x8c] sm:$0x1]  ;;  %v3682_v36 = vsel %vm6728_vm4, %v3677_v16, %v3681_v5  ;;  %v3732_v25 = vshrl.u32 %v5498_v30, 16  ;;  %v3735_v8 = vshll.u32 %v5498_v30, 16 }
  0xce   : > { %6010 = vmatmul.mubr.msk.bf16.gmra.mrb[28].mxu1 %vm686_vm3, %v8525_v62  ;;  %6167 = vmatprep.mubr.msk.bf16.mxu0 %vm686_vm3, %v6552_v48  ;;  %v3693_v48 = vshll.u32 %v7515_v7, 16  ;;  %v1325_v23 = vrot.slane %v6606_v0, 5  ;;  %v5495_v62 = vld [vmem:[%s6702_s29 + $0x48] sm:$0xf]  ;;  %v7558_v0 = vld [vmem:[%s6702_s29 + $0x4c] sm:$0xf]  ;;  %v8528_v38 = vcombine.low %v7322_v29, %v7326_v53  ;;  %v7592_v16 = vcombine.low %v3648_v31, %v3658_v26 }
  0xcf   : > { %6015 = vmatprep.mubr.msk.bf16.mxu1 %vm686_vm3, %v8526_v33  ;;  %v7555_v33 = vld [vmem:[%s6702_s29 + $0x44] sm:$0x1]  ;;  %v3708_v27 = vshrl.u32 %v5495_v62, 16  ;;  %v3711_v15 = vshll.u32 %v5495_v62, 16  ;;  %v3717_v6 = vshll.u32 %v7558_v0, 16  ;;  %v3721_v9 = vshrl.u32 %v7558_v0, 16 }
  0xd0   : > { %8527 = vst [vmem:[#allocation8_spill] sm:$0xff] %v7555_v33  ;;  %v7571_v28 = vrot.slane %v3693_v48, 5  ;;  %v7580_v35 = vsel %vm6954_vm7, %v1324_v54, %v1325_v23  ;;  %v3741_v43 = vshll.u32 %v7569_v24, 16  ;;  %v3745_v48 = vshrl.u32 %v7569_v24, 16  ;;  %v5501_v31 = vld [vmem:[%s6702_s29 + $0x60] sm:$0xf] }
  0xd1   : > { %v3703_v5 = vshll.u32 %v7555_v33, 16  ;;  %v5170_v54 = vrot.slane %v7574_v61, 9  ;;  %v8529_v23 = vcombine.low %v7363_v34, %v7379_v4  ;;  %v7603_v29 = vcombine.low %v3672_v37, %v3682_v36  ;;  %v6555_v26 = vld [vmem:[%s6702_s29 + $0x9c] sm:$0xff]   ;;  %v6556_v30 = vld [vmem:[%s6702_s29 + $0xa8] sm:$0xff]  }
  0xd2   : > { %v3690_v53 = vor.u32 %v3689_v52, %v3686_v50  ;;  %v3710_v62 = vrot.slane %v3708_v27, 4  ;;  %v7614_v34 = vrot.slane %v3717_v6, 5  ;;  %v3723_v4 = vrot.slane %v3721_v9, 4  ;;  %v6607_v36 = vld [vmem:[%s8496_s1 + $0x8] sm:$0x3] }
  0xd3   : > { %v3734_v27 = vrot.slane %v3732_v25, 4  ;;  %v3737_v37 = vrot.slane %v3735_v8, 5  ;;  %v7623_v50 = vrot.slane %v3741_v43, 5  ;;  %v3747_v52 = vrot.slane %v3745_v48, 4  ;;  %v6608_v6 = vld [vmem:[%s6702_s29 + $0x94] sm:$0xf] }
  0xd4   : > { %v7629_v9 = vld [vmem:[%s6702_s29 + $0x64] sm:$0xf]  ;;  %v3756_v61 = vshrl.u32 %v5501_v31, 16  ;;  %v7631_v22 = vrot.slane %v3690_v53, 4  ;;  %v1336_v25 = vrot.slane %v6610_v18, 5  ;;  %v3724_v43 = vor.u32 %v3723_v4, %v7614_v34 }
  0xd5   : > { %6168 = vmatmul.mubr.msk.bf16.gmra.mrb[16].mxu0 %vm686_vm3, %v6553_v10  ;;  %8530 = vst [vmem:[#allocation9_spill] sm:$0xff] %v7629_v9  ;;  %v3759_v10 = vshll.u32 %v5501_v31, 16  ;;  %v3738_v31 = vor.u32 %v3737_v37, %v3734_v27  ;;  %v3748_v53 = vor.u32 %v3747_v52, %v7623_v50  ;;  %v8531_v18 = vcombine.low %v7370_v19, %v7383_v58  ;;  %v6557_v37 = vld [vmem:[%s6702_s29 + $0xb4] sm:$0xff]  }
  0xd6   : > { %6016 = vmatmul.mubr.msk.bf16.vlgmr.msra.gmra.mrb[0].mxu1 %vm686_vm3, %v8528_v38  ;;  %6171 = vmatprep.mubr.msk.bf16.mxu0 %vm686_vm3, %v6554_v21  ;;  %v3713_v21 = vrot.slane %v3711_v15, 5  ;;  %v7612_v38 = vld [vmem:[%s6702_s29 + $0x50] sm:$0x1]  ;;  %v7621_v15 = vld [vmem:[%s6702_s29 + $0x5c] sm:$0x1]  ;;  %v8532_v27 = vcombine.low %v7388_v2, %v7392_v1  ;;  %v1338_v52 = vrot.slane %v1336_v25, 4 }
  0xd7   : > { %6048 = vmatpush3.bf16.msra.mxu1 %v7359_v49  ;;  %6019 = vmatprep.mubr.msk.bf16.mxu1 %vm686_vm3, %v8529_v23  ;;  %v3700_v49 = vor.u32 %v3699_v46, %v7571_v28  ;;  %v7625_v46 = vrot.slane %v3703_v5, 5  ;;  %v1329_v23 = vrot.slane %v6608_v6, 5  ;;  %v3727_v48 = vshll.u32 %v7612_v38, 16  ;;  %v1205_v5 = vld [vmem:[%s6702_s29 + $0x9c] sm:$0xe] }
  0xd8   : > { %6514 = vmatprep.subr.msk.bf16.mxu1 %vm735_vm0, %v6607_v36  ;;  %v6609_v36 = vld [vmem:[%s6702_s29 + $0x98] sm:$0x1]  ;;  %v3714_v7 = vor.u32 %v3713_v21, %v3710_v62  ;;  %v3751_v6 = vshll.u32 %v7621_v15, 16  ;;  %v3769_v62 = vshrl.u32 %v7629_v9, 16  ;;  %v3761_v4 = vrot.slane %v3759_v10, 5 }
  0xd9   : > { %v1332_v33 = vrot.slane %v6609_v36, 5  ;;  %v3701_v8 = vrot.slane %v3700_v49, 4  ;;  %v3765_v36 = vshll.u32 %v7629_v9, 16  ;;  %v7650_v21 = vsel %vm6954_vm7, %v5170_v54, %v1329_v23  ;;  %v7661_v2 = vld [vmem:[%s6702_s29 + $0x68] sm:$0x1] }
  0xda   : > { %v3758_v49 = vrot.slane %v3756_v61, 4  ;;  %v3715_v19 = vrot.slane %v3714_v7, 4  ;;  %v5171_v58 = vrot.slane %v1205_v5, 9  ;;  %v3725_v3 = vrot.slane %v3724_v43, 4  ;;  %8533 = vst [vmem:[#allocation10_spill] sm:$0xff] %v7661_v2  ;;  %v6558_v5 = vld [vmem:[%s6702_s29 + $0xc0] sm:$0xff]  }
  0xdb   : > { %v3729_v54 = vrot.slane %v3727_v48, 5  ;;  %v3753_v63 = vrot.slane %v3751_v6, 5  ;;  %v1343_v61 = vrot.slane %v7096_v56, 5  ;;  %v3739_v10 = vrot.slane %v3738_v31, 4  ;;  %v1207_v31 = vld [vmem:[%s6702_s29 + $0xb4] sm:$0xe] }
  0xdc   : > { %v3749_v51 = vrot.slane %v3748_v53, 4  ;;  %v7663_v1 = vrot.slane %v3765_v36, 5  ;;  %v3771_v7 = vrot.slane %v3769_v62, 4  ;;  %v3696_v43 = vsel %vm6728_vm4, %v7631_v22, %v7571_v28  ;;  %v6612_v62 = vld [vmem:[%s6702_s29 + $0xb0] sm:$0x1] }
  0xdd   : > { %6172 = vmatmul.mubr.msk.bf16.gmra.mrb[20].mxu0 %vm686_vm3, %v6555_v26  ;;  %v1331_v26 = vrot.slane %v1329_v23, 4  ;;  %v1206_v23 = vld [vmem:[%s6702_s29 + $0xa8] sm:$0xe]  ;;  %v3706_v48 = vsel %vm6728_vm4, %v3701_v8, %v7625_v46  ;;  %v3762_v6 = vor.u32 %v3761_v4, %v3758_v49  ;;  %v3720_v53 = vsel %vm6728_vm4, %v3715_v19, %v7614_v34  ;;  %v5504_v46 = vld [vmem:[%s6702_s29 + $0x6c] sm:$0xf] }
  0xde   : > { %6020 = vmatmul.mubr.msk.bf16.gmra.mrb[4].mxu1 %vm686_vm3, %v8531_v18  ;;  %6175 = vmatprep.mubr.msk.bf16.mxu0 %vm686_vm3, %v6556_v30  ;;  %v6611_v18 = vld [vmem:[%s6702_s29 + $0xa4] sm:$0x1]  ;;  %v7683_v36 = vsel %vm6954_vm7, %v5171_v58, %v1336_v25  ;;  %v5172_v28 = vrot.slane %v1206_v23, 9  ;;  %v1345_v8 = vrot.slane %v1343_v61, 4  ;;  %v3775_v49 = vshll.u32 %v7661_v2, 16 }
  0xdf   : > { %6023 = vmatprep.mubr.msk.bf16.mxu1 %vm686_vm3, %v8532_v27  ;;  %v1339_v30 = vrot.slane %v6611_v18, 5  ;;  %v7675_v56 = vsel %vm6954_vm7, %v1331_v26, %v1332_v33  ;;  %v3730_v33 = vsel %vm6728_vm4, %v3725_v3, %v3729_v54  ;;  %v1346_v26 = vrot.slane %v6612_v62, 5  ;;  %v5507_v18 = vld [vmem:[%s6702_s29 + $0x78] sm:$0xf]  ;;  %v7738_v54 = vld [vmem:[%s6702_s29 + $0xbc] sm:$0x1] }
  0xe0   : > { %v3744_v34 = vsel %vm6728_vm4, %v3739_v10, %v7623_v50  ;;  %v3754_v25 = vsel %vm6728_vm4, %v3749_v51, %v3753_v63  ;;  %v3772_v4 = vor.u32 %v3771_v7, %v7663_v1  ;;  %v5173_v27 = vrot.slane %v1207_v31, 9  ;;  %v7712_v51 = vld [vmem:[%s6702_s29 + $0x70] sm:$0xf]  ;;  %v7742_v10 = vld [vmem:[%s6702_s29 + $0x7c] sm:$0xf] }
  0xe1   : > { %v7687_v22 = vsel %vm6954_vm7, %v1338_v52, %v1339_v30  ;;  %v8535_v3 = vcombine.low %v7405_v45, %v7409_v59  ;;  %v7708_v19 = vrot.slane %v3762_v6, 4  ;;  %v1350_v50 = vrot.slane %v7120_v42, 5  ;;  %8536 = vst [vmem:[#allocation12_spill] sm:$0xff] %v7712_v51  ;;  %8538 = vst [vmem:[#allocation13_spill] sm:$0xff] %v7742_v10  ;;  %v5510_v7 = vld [vmem:[%s6702_s29 + $0x84] sm:$0xf] }
  0xe2   : > { %8534 = vst [vmem:[#allocation11_spill] sm:$0xff] %v7687_v22  ;;  %v3780_v63 = vshrl.u32 %v5504_v46, 16  ;;  %v8537_v45 = vcombine.low %v7413_v47, %v7440_v41  ;;  %v7720_v58 = vcombine.low %v3720_v53, %v3730_v33  ;;  %v7726_v42 = vsel %vm6954_vm7, %v5172_v28, %v1343_v61  ;;  %v6559_v61 = vld [vmem:[%s6702_s29 + $0xcc] sm:$0xff]   ;;  %v7754_v31 = vld [vmem:[%s6702_s29 + $0x88] sm:$0xf] }
  0xe3   : > { %v7729_v30 = vcombine.low %v3744_v34, %v3754_v25  ;;  %v7733_v47 = vsel %vm6954_vm7, %v1345_v8, %v1346_v26  ;;  %v7735_v41 = vrot.slane %v3775_v49, 5  ;;  %v3789_v6 = vshll.u32 %v7712_v51, 16  ;;  %8539 = vst [vmem:[#allocation14_spill] sm:$0xff] %v7754_v31  ;;  %v5513_v62 = vld [vmem:[%s6702_s29 + $0x90] sm:$0xf] }
  0xe4   : > { %v7760_v28 = vrot.slane %v1350_v50, 4  ;;  %v7762_v33 = vrot.slane %v3780_v63, 4  ;;  %v3793_v8 = vshrl.u32 %v7712_v51, 16  ;;  %v3804_v26 = vshrl.u32 %v5507_v18, 16  ;;  %v7769_v25 = vld [vmem:[%s6702_s29 + $0x94] sm:$0xf] }
  0xe5   : > { %6176 = vmatmul.mubr.msk.bf16.gmra.mrb[24].mxu0 %vm686_vm3, %v6557_v37  ;;  %v7706_v37 = vcombine.low %v3696_v43, %v3706_v48  ;;  %v7750_v43 = vsel %vm6954_vm7, %v5173_v27, %v1350_v50  ;;  %v3783_v48 = vshll.u32 %v5504_v46, 16  ;;  %v3807_v49 = vshll.u32 %v5507_v18, 16  ;;  %8540 = vst [vmem:[#allocation15_spill] sm:$0xff] %v7769_v25  ;;  %v7807_v2 = vld [vmem:[%s6702_s29 + $0x8c] sm:$0x1] }
  0xe6   : > { %6024 = vmatmul.mubr.msk.bf16.gmra.mrb[8].mxu1 %vm686_vm3, %v8535_v3  ;;  %6179 = vmatprep.mubr.msk.bf16.mxu0 %vm686_vm3, %v6558_v5  ;;  %v7746_v5 = vrot.slane %v3772_v4, 4  ;;  %v3813_v46 = vshll.u32 %v7742_v10, 16  ;;  %v3817_v34 = vshrl.u32 %v7742_v10, 16  ;;  %v3828_v4 = vshrl.u32 %v5510_v7, 16 }
  0xe7   : > { %6027 = vmatprep.mubr.msk.bf16.mxu1 %vm686_vm3, %v8537_v45  ;;  %v3831_v27 = vshll.u32 %v5510_v7, 16  ;;  %v3837_v3 = vshll.u32 %v7754_v31, 16  ;;  %v3841_v50 = vshrl.u32 %v7754_v31, 16  ;;  %v7779_v45 = vld [vmem:[%s6702_s29 + $0x74] sm:$0x1]  ;;  %v3785_v18 = vrot.slane %v3783_v48, 5 }
  0xe8   : > { %v3852_v52 = vshrl.u32 %v5513_v62, 16  ;;  %v3855_v53 = vshll.u32 %v5513_v62, 16  ;;  %v8541_v7 = vcombine.low %v7424_v60, %v7449_v44  ;;  %v3795_v59 = vrot.slane %v3793_v8, 4  ;;  %v5516_v48 = vld [vmem:[%s6702_s29 + $0x9c] sm:$0xf] }
  0xe9   : > { %v3861_v63 = vshll.u32 %v7769_v25, 16  ;;  %v3865_v23 = vshrl.u32 %v7769_v25, 16  ;;  %v8542_v62 = vcombine.low %v7464_v17, %v7468_v57  ;;  %v7797_v44 = vld [vmem:[%s6702_s29 + $0x80] sm:$0x1]  ;;  %v3806_v60 = vrot.slane %v3804_v26, 4 }
  0xea   : > { %8543 = vst [vmem:[#allocation16_spill] sm:$0xff] %v7797_v44  ;;  %v3830_v31 = vrot.slane %v3828_v4, 4  ;;  %v3833_v8 = vrot.slane %v3831_v27, 5  ;;  %v7801_v10 = vrot.slane %v3837_v3, 5  ;;  %v3843_v51 = vrot.slane %v3841_v50, 4 }
  0xeb   : > { %v7804_v25 = vld [vmem:[%s6702_s29 + $0xa0] sm:$0xf]  ;;  %v3854_v17 = vrot.slane %v3852_v52, 4  ;;  %v3857_v57 = vrot.slane %v3855_v53, 5  ;;  %v3879_v9 = vshll.u32 %v5516_v48, 16  ;;  %v3786_v26 = vor.u32 %v3785_v18, %v7762_v33 }
  0xec   : > { %v3823_v27 = vshll.u32 %v7797_v44, 16  ;;  %v7816_v3 = vld [vmem:[%s6702_s29 + $0x98] sm:$0x1]  ;;  %v3885_v50 = vshll.u32 %v7804_v25, 16  ;;  %v3889_v52 = vshrl.u32 %v7804_v25, 16  ;;  %v3834_v22 = vor.u32 %v3833_v8, %v3830_v31 }
  0xed   : > { %6180 = vmatmul.mubr.msk.bf16.gmra.mrb[28].mxu0 %vm686_vm3, %v6559_v61  ;;  %v7787_v61 = vrot.slane %v3789_v6, 5  ;;  %v3819_v6 = vrot.slane %v3817_v34, 4  ;;  %v3867_v34 = vrot.slane %v3865_v23, 4  ;;  %v3847_v33 = vshll.u32 %v7807_v2, 16 }
  0xee   : > { %6028 = vmatmul.mubr.msk.bf16.gmra.mrb[12].mxu1 %vm686_vm3, %v8541_v7  ;;  %6185 = vmatprep.mubr.msk.bf16.mxu0 %vm686_vm3, %v7529_v20  ;;  %v3809_v7 = vrot.slane %v3807_v49, 5  ;;  %v7799_v20 = vrot.slane %v3813_v46, 5  ;;  %v3799_v49 = vshll.u32 %v7779_v45, 16  ;;  %v7811_v46 = vrot.slane %v3861_v63, 5 }
  0xef   : > { %6031 = vmatprep.mubr.msk.bf16.mxu1 %vm686_vm3, %v8542_v62  ;;  %v3876_v62 = vshrl.u32 %v5516_v48, 16  ;;  %v3796_v4 = vor.u32 %v3795_v59, %v7787_v61  ;;  %v3844_v23 = vor.u32 %v3843_v51, %v7801_v10  ;;  %v3858_v59 = vor.u32 %v3857_v57, %v3854_v17  ;;  %v7849_v57 = vld [vmem:[%s6702_s29 + $0xa4] sm:$0x1] }
  0xf0   : > { %v3810_v53 = vor.u32 %v3809_v7, %v3806_v60  ;;  %v3820_v48 = vor.u32 %v3819_v6, %v7799_v20  ;;  %v3881_v18 = vrot.slane %v3879_v9, 5  ;;  %v8544_v44 = vcombine.low %v7476_v11, %v7480_v40 }
  0xf1   : > { %v3878_v63 = vrot.slane %v3876_v62, 4  ;;  %v8545_v31 = vrot.slane %v7738_v54, 5  ;;  %v3801_v51 = vrot.slane %v3799_v49, 5  ;;  %v3868_v60 = vor.u32 %v3867_v34, %v7811_v46  ;;  %v7852_v34 = vld [vmem:[%s6702_s29 + $0xac] sm:$0xf] }
  0xf2   : > { %v3871_v9 = vshll.u32 %v7816_v3, 16  ;;  %v8546_v11 = vcombine.low %v7548_v39, %v7552_v55  ;;  %v3787_v40 = vrot.slane %v3786_v26, 4  ;;  %v7845_v54 = vrot.slane %v3885_v50, 5 }
  0xf3   : > { %v3811_v7 = vrot.slane %v3810_v53, 4  ;;  %v3821_v6 = vrot.slane %v3820_v48, 4  ;;  %v3825_v8 = vrot.slane %v3823_v27, 5  ;;  %v3849_v17 = vrot.slane %v3847_v33, 5  ;;  %v7862_v48 = vld [vmem:[%s6702_s29 + $0xb0] sm:$0x1] }
  0xf4   : > { %v3835_v39 = vrot.slane %v3834_v22, 4  ;;  %v3845_v55 = vrot.slane %v3844_v23, 4  ;;  %v3859_v62 = vrot.slane %v3858_v59, 4  ;;  %v3882_v49 = vor.u32 %v3881_v18, %v3878_v63 }
  0xf5   : > { %6186 = vmatmul.mubr.msk.bf16.vlgmr.msra.gmra.mrb[0].mxu0 %vm686_vm3, %v7592_v16  ;;  %v7835_v16 = vsel %vm6954_vm7, %v7760_v28, %v8545_v31  ;;  %v3891_v28 = vrot.slane %v3889_v52, 4  ;;  %v3873_v26 = vrot.slane %v3871_v9, 5  ;;  %v3792_v52 = vsel %vm6728_vm4, %v3787_v40, %v7787_v61 }
  0xf6   : > { %6032 = vmatmul.mubr.msk.bf16.gmra.mrb[16].mxu1 %vm686_vm3, %v8544_v44  ;;  %6218 = vmatpush3.bf16.msra.mxu0 %v7533_v14  ;;  %v3797_v14 = vrot.slane %v3796_v4, 4  ;;  %v5519_v44 = vld [vmem:[%s6702_s29 + $0xa8] sm:$0xf]  ;;  %v3895_v22 = vshll.u32 %v7849_v57, 16  ;;  %v3816_v33 = vsel %vm6728_vm4, %v3811_v7, %v7799_v20  ;;  %v3826_v23 = vsel %vm6728_vm4, %v3821_v6, %v3825_v8 }
  0xf7   : > { %6035 = vmatprep.mubr.msk.bf16.mxu1 %vm686_vm3, %v8546_v11  ;;  %6189 = vmatprep.mubr.msk.bf16.mxu0 %vm686_vm3, %v7603_v29  ;;  %v3869_v29 = vrot.slane %v3868_v60, 4  ;;  %v3900_v4 = vshrl.u32 %v5519_v44, 16  ;;  %v3903_v50 = vshll.u32 %v5519_v44, 16  ;;  %v3892_v53 = vor.u32 %v3891_v28, %v7845_v54  ;;  %v5568_v11 = vld [vmem:[%s6702_s29 + $0x48] sm:$0xe] }
  0xf8   : > { %v3802_v27 = vsel %vm6728_vm4, %v3797_v14, %v3801_v51  ;;  %v3909_v59 = vshll.u32 %v7852_v34, 16  ;;  %v3913_v61 = vshrl.u32 %v7852_v34, 16  ;;  %v3840_v63 = vsel %vm6728_vm4, %v3835_v39, %v7801_v10  ;;  %v7927_v39 = vld [vmem:[%s6702_s29 + $0xb8] sm:$0xf] }
  0xf9   : > { %v3850_v18 = vsel %vm6728_vm4, %v3845_v55, %v3849_v17  ;;  %v3864_v20 = vsel %vm6728_vm4, %v3859_v62, %v7811_v46  ;;  %v3883_v31 = vrot.slane %v3882_v49, 4  ;;  %v8547_v51 = vcombine.low %v7565_v12, %v7580_v35 }
  0xfa   : > { %v3902_v10 = vrot.slane %v3900_v4, 4  ;;  %v3905_v60 = vrot.slane %v3903_v50, 5  ;;  %v3919_v9 = vshll.u32 %v7862_v48, 16  ;;  %v8548_v46 = vcombine.low %v7650_v21, %v7675_v56  ;;  %v5522_v21 = vld [vmem:[%s6702_s29 + $0xb4] sm:$0xf] }
  0xfb   : > { %v5189_v12 = vcombine.low %v7726_v42, %v7733_v47  ;;  %v8549_v35 = vsel %vm6728_vm4, %v7746_v5, %v7735_v41  ;;  %v3893_v14 = vrot.slane %v3892_v53, 4  ;;  %v3897_v28 = vrot.slane %v3895_v22, 5  ;;  %v5570_v4 = vld [vmem:[%s6702_s29 + $0x60] sm:$0xe]  ;;  %v5571_v53 = vld [vmem:[%s6702_s29 + $0x6c] sm:$0xe] }
  0xfc   : > { %v5190_v56 = vcombine.low %v7750_v43, %v7835_v16  ;;  %v7910_v44 = vcombine.low %v3792_v52, %v3802_v27  ;;  %v7912_v42 = vrot.slane %v3909_v59, 5  ;;  %v3915_v47 = vrot.slane %v3913_v61, 4  ;;  %v8558_v16 = vld [vmem:[#allocation4_spill] sm:$0xff] }
  0xfd   : > { %6190 = vmatmul.mubr.msk.bf16.gmra.mrb[4].mxu0 %vm686_vm3, %v7706_v37  ;;  %v3874_v37 = vsel %vm6728_vm4, %v3869_v29, %v3873_v26  ;;  %v7914_v41 = vcombine.low %v3816_v33, %v3826_v23  ;;  %v7916_v5 = vcombine.low %v3840_v63, %v3850_v18  ;;  %v3888_v6 = vsel %vm6728_vm4, %v3883_v31, %v7845_v54  ;;  %v8551_v23 = vld [vmem:[#allocation11_spill] sm:$0xff]  ;;  %v5525_v63 = vld [vmem:[%s6702_s29 + $0xc0] sm:$0xf]  ;;  %v8553_v18 = vld [vmem:[#allocation9_spill] sm:$0xff] }
  0xfe   : > { %6036 = vmatmul.mubr.msk.bf16.gmra.mrb[20].mxu1 %vm686_vm3, %v8547_v51  ;;  %6193 = vmatprep.mubr.msk.bf16.mxu0 %vm686_vm3, %v7720_v58  ;;  %v8550_v58 = vsel %vm6728_vm4, %v7708_v19, %v7663_v1  ;;  %v7918_v7 = vcombine.low %v3864_v20, %v3874_v37  ;;  %v5584_v1 = vrot.slane %v5568_v11, 9  ;;  %v5569_v19 = vld [vmem:[%s6702_s29 + $0x54] sm:$0xe]  ;;  %v3906_v8 = vor.u32 %v3905_v60, %v3902_v10  ;;  %v8554_v31 = vld [vmem:[#allocation10_spill] sm:$0xff] }
  0xff   : > { %6039 = vmatprep.mubr.msk.bf16.mxu1 %vm686_vm3, %v8548_v46  ;;  %v5538_v40 = vcombine.low %v8550_v58, %v8549_v35  ;;  %v7924_v17 = vrot.slane %v3919_v9, 5  ;;  %v3924_v55 = vshrl.u32 %v5522_v21, 16  ;;  %v3898_v62 = vsel %vm6728_vm4, %v3893_v14, %v3897_v28  ;;  %v8555_v9 = vld [vmem:[#allocation12_spill] sm:$0xff]  ;;  %v7976_v35 = vld [vmem:[%s6702_s29 + $0xbc] sm:$0x1] }
 0x100   : > { %v3927_v49 = vshll.u32 %v5522_v21, 16  ;;  %v4383_v29 = vrot.slane %v7558_v0, 5  ;;  %v4386_v26 = vrot.slane %v7612_v38, 5  ;;  %v3916_v50 = vor.u32 %v3915_v47, %v7912_v42  ;;  %v7979_v58 = vld [vmem:[%s6702_s29 + $0xc4] sm:$0xf] }
 0x101   : > { %v5585_v52 = vrot.slane %v5569_v19, 9  ;;  %v4390_v54 = vrot.slane %v7569_v24, 5  ;;  %v4393_v27 = vrot.slane %v7621_v15, 5  ;;  %v3933_v22 = vshll.u32 %v7927_v39, 16  ;;  %v5572_v19 = vld [vmem:[%s6702_s29 + $0x78] sm:$0xe] }
 0x102   : > { %v3937_v33 = vshrl.u32 %v7927_v39, 16  ;;  %v7944_v0 = vsel %vm6954_vm7, %v5584_v1, %v4383_v29  ;;  %v4385_v38 = vrot.slane %v4383_v29, 4  ;;  %v8552_v59 = vcombine.low %v7683_v36, %v8551_v23  ;;  %v8556_v23 = vld [vmem:[#allocation13_spill] sm:$0xff] }
 0x103   : > { %v7951_v24 = vcombine.low %v3888_v6, %v3898_v62  ;;  %v7955_v15 = vsel %vm6954_vm7, %v5585_v52, %v4390_v54  ;;  %v5586_v61 = vrot.slane %v5570_v4, 9  ;;  %v4397_v20 = vrot.slane %v8553_v18, 5  ;;  %v6560_v6 = vld [vmem:[%s6702_s29 + $0xc] sm:$0xff]  }
 0x104   : > { %v7961_v36 = vsel %vm6954_vm7, %v4385_v38, %v4386_v26  ;;  %v4400_v51 = vrot.slane %v8554_v31, 5  ;;  %v5587_v37 = vrot.slane %v5571_v53, 9  ;;  %v4404_v11 = vrot.slane %v8555_v9, 5 }
 0x105   : > { %6194 = vmatmul.mubr.msk.bf16.gmra.mrb[8].mxu0 %vm686_vm3, %v7729_v30  ;;  %v4392_v30 = vrot.slane %v4390_v54, 4  ;;  %v5601_v10 = vcombine.low %v7944_v0, %v7961_v36  ;;  %v4407_v46 = vrot.slane %v7779_v45, 5  ;;  %v7985_v14 = vsel %vm6954_vm7, %v5586_v61, %v4397_v20 }
 0x106   : > { %6040 = vmatmul.mubr.msk.bf16.gmra.mrb[24].mxu1 %vm686_vm3, %v8552_v59  ;;  %6197 = vmatprep.mubr.msk.bf16.mxu0 %vm686_vm3, %v5538_v40  ;;  %v4399_v28 = vrot.slane %v4397_v20, 4  ;;  %v7987_v21 = vrot.slane %v3924_v55, 4  ;;  %v3948_v47 = vshrl.u32 %v5525_v63, 16  ;;  %v7991_v45 = vsel %vm6954_vm7, %v5587_v37, %v4404_v11  ;;  %v5299_v55 = vld [vmem:[%s6702_s29 + $0x78] sm:$0xf]  ;;  %v8557_v59 = vld [vmem:[#allocation16_spill] sm:$0xff] }
 0x107   : > { %6043 = vmatprep.mubr.msk.bf16.mxu1 %vm686_vm3, %v5189_v12  ;;  %v7969_v60 = vsel %vm6954_vm7, %v4392_v30, %v4393_v27  ;;  %v7973_v12 = vrot.slane %v3906_v8, 4  ;;  %v4406_v1 = vrot.slane %v4404_v11, 4  ;;  %v7995_v8 = vrot.slane %v3916_v50, 4 }
 0x108   : > { %v5602_v40 = vcombine.low %v7955_v15, %v7969_v60  ;;  %v7997_v62 = vrot.slane %v3927_v49, 5  ;;  %v3951_v29 = vshll.u32 %v5525_v63, 16  ;;  %v8001_v26 = vsel %vm6954_vm7, %v4399_v28, %v4400_v51  ;;  %v8560_v28 = vld [vmem:[#allocation14_spill] sm:$0xff] }
 0x109   : > { %v8004_v4 = vrot.slane %v3933_v22, 5  ;;  %v8006_v52 = vrot.slane %v3937_v33, 4  ;;  %v5603_v54 = vcombine.low %v7985_v14, %v8001_v26  ;;  %v8012_v27 = vsel %vm6954_vm7, %v4406_v1, %v4407_v46  ;;  %v5573_v33 = vld [vmem:[%s6702_s29 + $0x84] sm:$0xe]  ;;  %v6561_v1 = vld [vmem:[%s6702_s29 + $0x18] sm:$0xff]  }
 0x10a   : > { %v3943_v49 = vshll.u32 %v7976_v35, 16  ;;  %v3957_v50 = vshll.u32 %v7979_v58, 16  ;;  %v5604_v53 = vcombine.low %v7991_v45, %v8012_v27  ;;  %v5588_v22 = vrot.slane %v5572_v19, 9  ;;  %v6623_v60 = vld [vmem:[%s6702_s29 + $0xa0] sm:$0xf] }
 0x10b   : > { %v3950_v38 = vrot.slane %v3948_v47, 4  ;;  %v4414_v30 = vrot.slane %v8557_v59, 5  ;;  %v2273_v61 = vshrl.u32 %v5299_v55, 16  ;;  %v3953_v63 = vrot.slane %v3951_v29, 5  ;;  %v5528_v29 = vld [vmem:[%s6702_s29 + $0xcc] sm:$0xf] }
 0x10c   : > { %v3961_v18 = vshrl.u32 %v7979_v58, 16  ;;  %v2276_v43 = vshll.u32 %v5299_v55, 16  ;;  %v5589_v37 = vrot.slane %v5573_v33, 9  ;;  %v3912_v9 = vsel %vm6728_vm4, %v7973_v12, %v7912_v42  ;;  %v8055_v55 = vld [vmem:[%s6702_s29 + $0xd0] sm:$0xf] }
 0x10d   : > { %6198 = vmatmul.mubr.msk.bf16.gmra.mrb[12].mxu0 %vm686_vm3, %v7910_v44  ;;  %v4411_v44 = vrot.slane %v8556_v23, 5  ;;  %v2275_v51 = vrot.slane %v2273_v61, 4  ;;  %v3930_v11 = vor.u32 %v7997_v62, %v7987_v21  ;;  %v4418_v47 = vrot.slane %v8560_v28, 5  ;;  %v6562_v21 = vld [vmem:[%s6702_s29 + $0x24] sm:$0xff]   ;;  %v6627_v27 = vld [vmem:[%s6702_s29 + $0xac] sm:$0xf] }
 0x10e   : > { %6044 = vmatmul.mubr.msk.bf16.gmra.mrb[28].mxu1 %vm686_vm3, %v5190_v56  ;;  %6201 = vmatprep.mubr.msk.bf16.mxu0 %vm686_vm3, %v7914_v41  ;;  %v8559_v56 = vld [vmem:[#allocation5_spill] sm:$0xff]  ;;  %v2278_v46 = vrot.slane %v2276_v43, 5  ;;  %v3922_v19 = vsel %vm6728_vm4, %v7995_v8, %v7924_v17  ;;  %v4421_v12 = vrot.slane %v7807_v2, 5  ;;  %v8063_v62 = vrot.slane %v3957_v50, 5  ;;  %v5574_v8 = vld [vmem:[%s6702_s29 + $0x90] sm:$0xe] }
 0x10f   : > { %6049 = vmatprep.mubr.msk.bf16.mxu1 %vm686_vm3, %v6560_v6  ;;  %v2295_v41 = vsel %vm6728_vm4, %v8559_v56, %v8558_v16  ;;  %v8037_v20 = vsel %vm6954_vm7, %v5588_v22, %v4411_v44  ;;  %v4413_v31 = vrot.slane %v4411_v44, 4  ;;  %v3940_v6 = vor.u32 %v8006_v52, %v8004_v4  ;;  %v8069_v52 = vld [vmem:[%s6702_s29 + $0xc8] sm:$0x1]  ;;  %v8562_v16 = vld [vmem:[#allocation2_spill] sm:$0xff] }
 0x110   : > { %v3963_v22 = vrot.slane %v3961_v18, 4  ;;  %v2279_v17 = vor.u32 %v2278_v46, %v2275_v51  ;;  %v3945_v23 = vrot.slane %v3943_v49, 5  ;;  %v3954_v44 = vor.u32 %v3953_v63, %v3950_v38  ;;  %v8563_v51 = vld [vmem:[#allocation3_spill] sm:$0xff] }
 0x111   : > { %v8059_v42 = vsel %vm6954_vm7, %v4413_v31, %v4414_v30  ;;  %v8073_v59 = vsel %vm6954_vm7, %v5589_v37, %v4418_v47  ;;  %v4420_v30 = vrot.slane %v4418_v47, 4  ;;  %v3972_v2 = vshrl.u32 %v5528_v29, 16 }
 0x112   : > { %v5605_v33 = vcombine.low %v8037_v20, %v8059_v42  ;;  %v3975_v50 = vshll.u32 %v5528_v29, 16  ;;  %v3981_v61 = vshll.u32 %v8055_v55, 16  ;;  %v2280_v18 = vrot.slane %v2279_v17, 4  ;;  %v6563_v29 = vld [vmem:[%s6702_s29 + $0x30] sm:$0xff]  }
 0x113   : > { %v3985_v49 = vshrl.u32 %v8055_v55, 16  ;;  %v8084_v38 = vsel %vm6954_vm7, %v4420_v30, %v4421_v12  ;;  %v5590_v63 = vrot.slane %v5574_v8, 9  ;;  %v3964_v56 = vor.u32 %v3963_v22, %v8063_v62 }
 0x114   : > { %v3967_v31 = vshll.u32 %v8069_v52, 16  ;;  %v5606_v37 = vcombine.low %v8073_v59, %v8084_v38  ;;  %v5544_v46 = vcombine.low %v3912_v9, %v3922_v19  ;;  %v3931_v28 = vrot.slane %v3930_v11, 4  ;;  %v5575_v11 = vld [vmem:[%s6702_s29 + $0x9c] sm:$0xe] }
 0x115   : > { %6202 = vmatmul.mubr.msk.bf16.gmra.mrb[16].mxu0 %vm686_vm3, %v7916_v5  ;;  %v8561_v5 = vld [vmem:[#allocation15_spill] sm:$0xff]  ;;  %v3941_v47 = vrot.slane %v3940_v6, 4  ;;  %v3955_v12 = vrot.slane %v3954_v44, 4  ;;  %v4428_v8 = vrot.slane %v7816_v3, 5  ;;  %v3974_v30 = vrot.slane %v3972_v2, 4  ;;  %v6564_v19 = vld [vmem:[%s6702_s29 + $0x3c] sm:$0xff]  }
 0x116   : > { %6050 = vmatmul.mubr.msk.bf16.vlgmr.msra.gmra.mrb[0].mxu1 %vm686_vm3, %v6561_v1  ;;  %6205 = vmatprep.mubr.msk.bf16.mxu0 %vm686_vm3, %v7918_v7  ;;  %v4425_v43 = vrot.slane %v8561_v5, 5  ;;  %v2285_v7 = vsel %vm6728_vm4, %v2280_v18, %v8563_v51  ;;  %v3977_v18 = vrot.slane %v3975_v50, 5  ;;  %v8107_v5 = vrot.slane %v3981_v61, 5 }
 0x117   : > { %6252 = vmatpush3.bf16.msra.mxu1 %v8562_v16  ;;  %6053 = vmatprep.mubr.msk.bf16.mxu1 %vm686_vm3, %v6562_v21  ;;  %v8096_v1 = vcombine.low %v2285_v7, %v2295_v41  ;;  %v8100_v21 = vld [vmem:[%s6702_s29 + $0xd4] sm:$0x1]  ;;  %v3987_v9 = vrot.slane %v3985_v49, 4  ;;  %v3965_v41 = vrot.slane %v3964_v56, 4  ;;  %v3969_v6 = vrot.slane %v3967_v31, 5 }
 0x118   : > { %v8104_v22 = vsel %vm6954_vm7, %v5590_v63, %v4425_v43  ;;  %v4427_v17 = vrot.slane %v4425_v43, 4  ;;  %v3936_v63 = vsel %vm6728_vm4, %v3931_v28, %v8004_v4  ;;  %v3946_v2 = vsel %vm6728_vm4, %v3941_v47, %v3945_v23  ;;  %v6614_v16 = vld [vmem:[%s6702_s29 + $0x1c] sm:$0xf]  ;;  %v5576_v28 = vld [vmem:[%s6702_s29 + $0xa8] sm:$0xe] }
 0x119   : > { %v3991_v50 = vshll.u32 %v8100_v21, 16  ;;  %v5591_v61 = vrot.slane %v5575_v11, 9  ;;  %v4432_v49 = vrot.slane %v7804_v25, 5  ;;  %v3960_v4 = vsel %vm6728_vm4, %v3955_v12, %v8063_v62  ;;  %v5564_v62 = vld [vmem:[%s6702_s29 + $0x18] sm:$0xe]  ;;  %v6565_v47 = vld [vmem:[%s6702_s29 + $0x48] sm:$0xff]  }
 0x11a   : > { %v8113_v44 = vsel %vm6954_vm7, %v4427_v17, %v4428_v8  ;;  %v3988_v43 = vor.u32 %v3987_v9, %v8107_v5  ;;  %v4435_v23 = vrot.slane %v7849_v57, 5  ;;  %v3970_v25 = vsel %vm6728_vm4, %v3965_v41, %v3969_v6  ;;  %v6615_v11 = vld [vmem:[%s6702_s29 + $0x20] sm:$0x1] }
 0x11b   : > { %v5607_v3 = vcombine.low %v8104_v22, %v8113_v44  ;;  %v4355_v56 = vrot.slane %v6614_v16, 5  ;;  %v8139_v31 = vsel %vm6954_vm7, %v5591_v61, %v4432_v49  ;;  %v4434_v51 = vrot.slane %v4432_v49, 4  ;;  %v5577_v49 = vld [vmem:[%s6702_s29 + $0xb4] sm:$0xe] }
 0x11c   : > { %v5545_v7 = vcombine.low %v3936_v63, %v3946_v2  ;;  %v3989_v17 = vrot.slane %v3988_v43, 4  ;;  %v5592_v41 = vrot.slane %v5576_v28, 9  ;;  %v4439_v6 = vrot.slane %v7852_v34, 5  ;;  %v5565_v2 = vld [vmem:[%s6702_s29 + $0x24] sm:$0xe] }
 0x11d   : > { %6206 = vmatmul.mubr.msk.bf16.gmra.mrb[20].mxu0 %vm686_vm3, %v7951_v24  ;;  %v3978_v24 = vor.u32 %v3977_v18, %v3974_v30  ;;  %v8144_v57 = vsel %vm6954_vm7, %v4434_v51, %v4435_v23  ;;  %v6566_v30 = vld [vmem:[%s6702_s29 + $0x54] sm:$0xff]   ;;  %v5580_v18 = vrot.slane %v5564_v62, 9  ;;  %v4357_v9 = vrot.slane %v4355_v56, 4  ;;  %v6618_v28 = vld [vmem:[%s6702_s29 + $0x2c] sm:$0x1] }
 0x11e   : > { %6054 = vmatmul.mubr.msk.bf16.gmra.mrb[4].mxu1 %vm686_vm3, %v6563_v29  ;;  %6209 = vmatprep.mubr.msk.bf16.mxu0 %vm686_vm3, %v5544_v46  ;;  %v3993_v46 = vrot.slane %v3991_v50, 5  ;;  %v5546_v29 = vcombine.low %v3960_v4, %v3970_v25  ;;  %v5608_v8 = vcombine.low %v8139_v31, %v8144_v57  ;;  %v4442_v63 = vrot.slane %v7862_v48, 5  ;;  %v6616_v50 = vld [vmem:[%s6702_s29 + $0x28] sm:$0xf]  ;;  %v5566_v25 = vld [vmem:[%s6702_s29 + $0x30] sm:$0xe] }
 0x11f   : > { %6057 = vmatprep.mubr.msk.bf16.mxu1 %vm686_vm3, %v6564_v19  ;;  %v3979_v12 = vrot.slane %v3978_v24, 4  ;;  %v4358_v19 = vrot.slane %v6615_v11, 5  ;;  %v4362_v61 = vrot.slane %v6616_v50, 5  ;;  %v8167_v48 = vsel %vm6954_vm7, %v5592_v41, %v4439_v6  ;;  %v6568_v11 = vld [vmem:[%s6702_s29 + $0x6c] sm:$0xff]   ;;  %v8564_v41 = vld [vmem:[#allocation6_spill] sm:$0xff] }
 0x120   : > { %v3994_v34 = vsel %vm6728_vm4, %v3989_v17, %v3993_v46  ;;  %v4441_v24 = vrot.slane %v4439_v6, 4  ;;  %v4356_v43 = vsel %vm6954_vm7, %v5580_v18, %v4355_v56  ;;  %v5581_v51 = vrot.slane %v5565_v2, 9  ;;  %v5578_v50 = vld [vmem:[%s6702_s29 + $0xc0] sm:$0xe]  ;;  %v6632_v31 = vld [vmem:[%s6702_s29 + $0xc8] sm:$0x1] }
 0x121   : > { %v3984_v4 = vsel %vm6728_vm4, %v3979_v12, %v8107_v5  ;;  %v4359_v23 = vsel %vm6954_vm7, %v4357_v9, %v4358_v19  ;;  %v6617_v5 = vld [vmem:[%s6702_s29 + $0x34] sm:$0xf]  ;;  %v6567_v12 = vld [vmem:[%s6702_s29 + $0x60] sm:$0xff]   ;;  %v5582_v18 = vrot.slane %v5566_v25, 9  ;;  %v4449_v9 = vrot.slane %v7976_v35, 5 }
 0x122   : > { %v4369_v16 = vrot.slane %v6617_v5, 5  ;;  %v8178_v62 = vsel %vm6954_vm7, %v4441_v24, %v4442_v63  ;;  %v5547_v46 = vcombine.low %v3984_v4, %v3994_v34  ;;  %v5597_v17 = vcombine.low %v4356_v43, %v4359_v23  ;;  %v5567_v24 = vld [vmem:[%s6702_s29 + $0x3c] sm:$0xe] }
 0x123   : > { %v5609_v56 = vcombine.low %v8167_v48, %v8178_v62  ;;  %v4372_v6 = vrot.slane %v8564_v41, 5  ;;  %v4363_v35 = vsel %vm6954_vm7, %v5581_v51, %v4362_v61  ;;  %v5594_v5 = vrot.slane %v5578_v50, 9 }
 0x124   : > { %v4371_v19 = vrot.slane %v4369_v16, 4  ;;  %v4370_v23 = vsel %vm6954_vm7, %v5582_v18, %v4369_v16  ;;  %v4456_v51 = vrot.slane %v8069_v52, 5  ;;  %v2436_v57 = vshll.u32 %v6632_v31, 16 }
 0x125   : > { %6210 = vmatmul.mubr.msk.bf16.gmra.mrb[24].mxu0 %vm686_vm3, %v5545_v7  ;;  %v5593_v7 = vrot.slane %v5577_v49, 9 }
 0x126   : > { %6058 = vmatmul.mubr.msk.bf16.gmra.mrb[8].mxu1 %vm686_vm3, %v6565_v47  ;;  %6213 = vmatprep.mubr.msk.bf16.mxu0 %vm686_vm3, %v5546_v29  ;;  %v4365_v47 = vrot.slane %v6618_v28, 5  ;;  %v4446_v29 = vrot.slane %v7927_v39, 5  ;;  %v8565_v39 = vld [vmem:[#allocation7_spill] sm:$0xff]  ;;  %v4373_v25 = vsel %vm6954_vm7, %v4371_v19, %v4372_v6  ;;  %v5583_v28 = vrot.slane %v5567_v24, 9 }
 0x127   : > { %6061 = vmatprep.mubr.msk.bf16.mxu1 %vm686_vm3, %v6566_v30  ;;  %v4364_v30 = vrot.slane %v4362_v61, 4  ;;  %v4376_v49 = vrot.slane %v8565_v39, 5  ;;  %v4453_v61 = vrot.slane %v7979_v58, 5  ;;  %v6619_v39 = vld [vmem:[%s6702_s29 + $0x70] sm:$0xf]  ;;  %v4460_v24 = vrot.slane %v8055_v55, 5 }
 0x128   : > { %v8190_v63 = vsel %vm6954_vm7, %v5593_v7, %v4446_v29  ;;  %v4448_v2 = vrot.slane %v4446_v29, 4  ;;  %v5296_v7 = vld [vmem:[%s6702_s29 + $0x6c] sm:$0xf]  ;;  %v8566_v29 = vld [vmem:[#allocation8_spill] sm:$0xff] }
 0x129   : > { %v4366_v34 = vsel %vm6954_vm7, %v4364_v30, %v4365_v47  ;;  %v4378_v47 = vrot.slane %v4376_v49, 4  ;;  %v6569_v30 = vld [vmem:[%s6702_s29 + $0x78] sm:$0xff]   ;;  %v8221_v16 = vsel %vm6954_vm7, %v5594_v5, %v4453_v61  ;;  %v4455_v18 = vrot.slane %v4453_v61, 4 }
 0x12a   : > { %v8197_v4 = vsel %vm6954_vm7, %v4448_v2, %v4449_v9  ;;  %v5599_v9 = vcombine.low %v4370_v23, %v4373_v25  ;;  %v2249_v19 = vshrl.u32 %v5296_v7, 16  ;;  %v2252_v41 = vshll.u32 %v5296_v7, 16 }
 0x12b   : > { %v5610_v43 = vcombine.low %v8190_v63, %v8197_v4  ;;  %v8226_v58 = vsel %vm6954_vm7, %v4455_v18, %v4456_v51  ;;  %v4377_v6 = vsel %vm6954_vm7, %v5583_v28, %v4376_v49  ;;  %v4463_v49 = vrot.slane %v8100_v21, 5  ;;  %v6571_v51 = vld [vmem:[%s6702_s29 + $0x90] sm:$0xff]   ;;  %v6572_v21 = vld [vmem:[%s6702_s29 + $0x9c] sm:$0xff]  }
 0x12c   : > { %v5611_v50 = vcombine.low %v8221_v16, %v8226_v58  ;;  %v2251_v23 = vrot.slane %v2249_v19, 4  ;;  %v2254_v25 = vrot.slane %v2252_v41, 5  ;;  %v4462_v7 = vrot.slane %v4460_v24, 4 }
 0x12d   : > { %6214 = vmatmul.mubr.msk.bf16.gmra.mrb[28].mxu0 %vm686_vm3, %v5547_v46  ;;  %v5598_v46 = vcombine.low %v4363_v35, %v4366_v34  ;;  %v2258_v35 = vshll.u32 %v6619_v39, 16  ;;  %v2262_v34 = vshrl.u32 %v6619_v39, 16 }
 0x12e   : > { %6062 = vmatmul.mubr.msk.bf16.gmra.mrb[12].mxu1 %vm686_vm3, %v6567_v12  ;;  %6219 = vmatprep.mubr.msk.bf16.mxu0 %vm686_vm3, %v5597_v17  ;;  %v4379_v12 = vrot.slane %v8566_v29, 5  ;;  %v5579_v17 = vld [vmem:[%s6702_s29 + $0xcc] sm:$0xe]  ;;  %v8248_v55 = vsel %vm6954_vm7, %v4462_v7, %v4463_v49 }
 0x12f   : > { %6065 = vmatprep.mubr.msk.bf16.mxu1 %vm686_vm3, %v6568_v11  ;;  %v6570_v11 = vld [vmem:[%s6702_s29 + $0x84] sm:$0xff]   ;;  %v5595_v52 = vrot.slane %v5579_v17, 9  ;;  %v2264_v28 = vrot.slane %v2262_v34, 4  ;;  %v6620_v17 = vld [vmem:[%s6702_s29 + $0x74] sm:$0x1] }
 0x130   : > { %v4380_v2 = vsel %vm6954_vm7, %v4378_v47, %v4379_v12  ;;  %v5302_v47 = vld [vmem:[%s6702_s29 + $0x84] sm:$0xf]  ;;  %v2255_v12 = vor.u32 %v2254_v25, %v2251_v23  ;;  %v6574_v34 = vld [vmem:[%s6702_s29 + $0xb4] sm:$0xff]  }
 0x131   : > { %v8243_v5 = vsel %vm6954_vm7, %v5595_v52, %v4460_v24  ;;  %v5600_v61 = vcombine.low %v4377_v6, %v4380_v2  ;;  %v2300_v18 = vshll.u32 %v5302_v47, 16  ;;  %v5305_v6 = vld [vmem:[%s6702_s29 + $0x90] sm:$0xf]  ;;  %v6573_v2 = vld [vmem:[%s6702_s29 + $0xa8] sm:$0xff]  }
 0x132   : > { %v5612_v29 = vcombine.low %v8243_v5, %v8248_v55  ;;  %v2256_v52 = vrot.slane %v2255_v12, 4  ;;  %v2321_v23 = vshrl.u32 %v5305_v6, 16  ;;  %v2324_v25 = vshll.u32 %v5305_v6, 16 }
 0x133   : > { %v2354_v12 = vshll.u32 %v6623_v60, 16 }
 0x134   : > { %v2326_v14 = vrot.slane %v2324_v25, 5  ;;  %v6626_v25 = vld [vmem:[%s6702_s29 + $0xa4] sm:$0x1] }
 0x135   : > { %6220 = vmatmul.mubr.msk.bf16.vlgmr.msra.gmra.mrb[0].mxu0 %vm686_vm3, %v5598_v46  ;;  %v2260_v46 = vrot.slane %v2258_v35, 5  ;;  %v5308_v35 = vld [vmem:[%s6702_s29 + $0x9c] sm:$0xf]  ;;  %v8290_v6 = vrot.slane %v2354_v12, 5 }
 0x136   : > { %6066 = vmatmul.mubr.msk.bf16.gmra.mrb[16].mxu1 %vm686_vm3, %v6569_v30  ;;  %6223 = vmatprep.mubr.msk.bf16.mxu0 %vm686_vm3, %v5599_v9  ;;  %v2268_v30 = vshll.u32 %v6620_v17, 16  ;;  %v2297_v9 = vshrl.u32 %v5302_v47, 16  ;;  %v2348_v47 = vshll.u32 %v5308_v35, 16  ;;  %v6624_v17 = vld [vmem:[%s6702_s29 + $0x8c] sm:$0x1] }
 0x137   : > { %6069 = vmatprep.mubr.msk.bf16.mxu1 %vm686_vm3, %v6570_v11  ;;  %v2265_v13 = vor.u32 %v2264_v28, %v2260_v46  ;;  %v6621_v11 = vld [vmem:[%s6702_s29 + $0x88] sm:$0xf]  ;;  %v2261_v7 = vsel %vm6728_vm4, %v2256_v52, %v2260_v46 }
 0x138   : > { %v2306_v19 = vshll.u32 %v6621_v11, 16  ;;  %v2310_v41 = vshrl.u32 %v6621_v11, 16  ;;  %v2270_v0 = vrot.slane %v2268_v30, 5  ;;  %v2299_v36 = vrot.slane %v2297_v9, 4 }
 0x139   : > { %v2266_v39 = vrot.slane %v2265_v13, 4  ;;  %v2316_v30 = vshll.u32 %v6624_v17, 16  ;;  %v2323_v9 = vrot.slane %v2321_v23, 4  ;;  %v2350_v11 = vrot.slane %v2348_v47, 5 }
 0x13a   : > { %v8267_v24 = vrot.slane %v2306_v19, 5  ;;  %v2312_v49 = vrot.slane %v2310_v41, 4  ;;  %v6575_v19 = vld [vmem:[%s6702_s29 + $0xc0] sm:$0xff]  }
 0x13b   : > { %v2271_v46 = vsel %vm6728_vm4, %v2266_v39, %v2270_v0  ;;  %v5311_v39 = vld [vmem:[%s6702_s29 + $0xa8] sm:$0xf] }
 0x13c   : > { %v2313_v13 = vor.u32 %v2312_v49, %v8267_v24  ;;  %v5329_v41 = vcombine.low %v2261_v7, %v2271_v46  ;;  %v2364_v7 = vshll.u32 %v6626_v25, 16  ;;  %v2372_v45 = vshll.u32 %v5311_v39, 16 }
 0x13d   : > { %6224 = vmatmul.mubr.msk.bf16.gmra.mrb[4].mxu0 %vm686_vm3, %v5600_v61  ;;  %v6622_v61 = vld [vmem:[%s6702_s29 + $0x94] sm:$0xf] }
 0x13e   : > { %6070 = vmatmul.mubr.msk.bf16.gmra.mrb[20].mxu1 %vm686_vm3, %v6571_v51  ;;  %6227 = vmatprep.mubr.msk.bf16.mxu0 %vm686_vm3, %v5601_v10  ;;  %v2302_v10 = vrot.slane %v2300_v18, 5  ;;  %v2330_v51 = vshll.u32 %v6622_v61, 16  ;;  %v2334_v28 = vshrl.u32 %v6622_v61, 16  ;;  %v2314_v0 = vrot.slane %v2313_v13, 4 }
 0x13f   : > { %6073 = vmatprep.mubr.msk.bf16.mxu1 %vm686_vm3, %v6572_v21  ;;  %v2345_v21 = vshrl.u32 %v5308_v35, 16  ;;  %v6625_v35 = vld [vmem:[%s6702_s29 + $0x98] sm:$0x1]  ;;  %v2369_v61 = vshrl.u32 %v5311_v39, 16  ;;  %v5317_v39 = vld [vmem:[%s6702_s29 + $0xc0] sm:$0xf] }
 0x140   : > { %v2303_v15 = vor.u32 %v2302_v10, %v2299_v36  ;;  %v8287_v26 = vrot.slane %v2330_v51, 5  ;;  %v2318_v36 = vrot.slane %v2316_v30, 5  ;;  %v2327_v10 = vor.u32 %v2326_v14, %v2323_v9  ;;  %v5314_v51 = vld [vmem:[%s6702_s29 + $0xb4] sm:$0xf] }
 0x141   : > { %v2347_v18 = vrot.slane %v2345_v21, 4  ;;  %v2382_v21 = vshrl.u32 %v6627_v27, 16  ;;  %v2393_v20 = vshrl.u32 %v5314_v51, 16  ;;  %v2396_v42 = vshll.u32 %v5314_v51, 16 }
 0x142   : > { %v2304_v52 = vrot.slane %v2303_v15, 4  ;;  %v2319_v46 = vsel %vm6728_vm4, %v2314_v0, %v2318_v36  ;;  %v2328_v15 = vrot.slane %v2327_v10, 4  ;;  %v2366_v30 = vrot.slane %v2364_v7, 5 }
 0x143   : > { %v2351_v23 = vor.u32 %v2350_v11, %v2347_v18  ;;  %v2371_v9 = vrot.slane %v2369_v61, 4  ;;  %v2384_v11 = vrot.slane %v2382_v21, 4  ;;  %v6631_v61 = vld [vmem:[%s6702_s29 + $0xbc] sm:$0x1] }
 0x144   : > { %v2309_v47 = vsel %vm6728_vm4, %v2304_v52, %v8267_v24  ;;  %v2333_v0 = vsel %vm6728_vm4, %v2328_v15, %v8287_v26  ;;  %v2412_v22 = vshll.u32 %v6631_v61, 16 }
 0x145   : > { %6228 = vmatmul.mubr.msk.bf16.gmra.mrb[8].mxu0 %vm686_vm3, %v5602_v40  ;;  %v2358_v40 = vshrl.u32 %v6623_v60, 16  ;;  %v2352_v17 = vrot.slane %v2351_v23, 4  ;;  %v5331_v24 = vcombine.low %v2309_v47, %v2319_v46 }
 0x146   : > { %6074 = vmatmul.mubr.msk.bf16.gmra.mrb[24].mxu1 %vm686_vm3, %v6573_v2  ;;  %6231 = vmatprep.mubr.msk.bf16.mxu0 %vm686_vm3, %v5603_v54  ;;  %v2336_v54 = vrot.slane %v2334_v28, 4 }
 0x147   : > { %6077 = vmatprep.mubr.msk.bf16.mxu1 %vm686_vm3, %v6574_v34  ;;  %v2360_v2 = vrot.slane %v2358_v40, 4  ;;  %v2340_v34 = vshll.u32 %v6625_v35, 16  ;;  %v2357_v10 = vsel %vm6728_vm4, %v2352_v17, %v8290_v6  ;;  %v2438_v17 = vrot.slane %v2436_v57, 5 }
 0x148   : > { %v2337_v49 = vor.u32 %v2336_v54, %v8287_v26  ;;  %v2374_v54 = vrot.slane %v2372_v45, 5  ;;  %v6629_v26 = vld [vmem:[%s6702_s29 + $0xb0] sm:$0x1] }
 0x149   : > { %v2361_v28 = vor.u32 %v2360_v2, %v8290_v6  ;;  %v2342_v60 = vrot.slane %v2340_v34, 5  ;;  %v2388_v35 = vshll.u32 %v6629_v26, 16  ;;  %v2417_v34 = vshrl.u32 %v5317_v39, 16 }
 0x14a   : > { %v2338_v13 = vrot.slane %v2337_v49, 4  ;;  %v2375_v38 = vor.u32 %v2374_v54, %v2371_v9  ;;  %v2420_v6 = vshll.u32 %v5317_v39, 16  ;;  %v6630_v49 = vld [vmem:[%s6702_s29 + $0xc4] sm:$0xf] }
 0x14b   : > { %v2362_v14 = vrot.slane %v2361_v28, 4  ;;  %v2426_v23 = vshll.u32 %v6630_v49, 16  ;;  %v2430_v25 = vshrl.u32 %v6630_v49, 16  ;;  %v2390_v45 = vrot.slane %v2388_v35, 5 }
 0x14c   : > { %v2343_v36 = vsel %vm6728_vm4, %v2338_v13, %v2342_v60  ;;  %v2376_v51 = vrot.slane %v2375_v38, 4  ;;  %v2414_v60 = vrot.slane %v2412_v22, 5 }
 0x14d   : > { %6232 = vmatmul.mubr.msk.bf16.gmra.mrb[12].mxu0 %vm686_vm3, %v5604_v53  ;;  %v2378_v53 = vshll.u32 %v6627_v27, 16  ;;  %v2367_v59 = vsel %vm6728_vm4, %v2362_v14, %v2366_v30  ;;  %v5332_v44 = vcombine.low %v2333_v0, %v2343_v36  ;;  %v2419_v27 = vrot.slane %v2417_v34, 4  ;;  %v8399_v36 = vld [vmem:[%s8498_s3] ss:$0 sm:$0xff] }
 0x14e   : > { %6078 = vmatmul.mubr.msk.bf16.gmra.mrb[28].mxu1 %vm686_vm3, %v6575_v19  ;;  %6235 = vmatprep.mubr.msk.bf16.mxu0 %vm686_vm3, %v5605_v33  ;;  %v6628_v33 = vld [vmem:[%s6702_s29 + $0xb8] sm:$0xf]  ;;  %v2395_v19 = vrot.slane %v2393_v20, 4  ;;  %v2428_v21 = vrot.slane %v2426_v23, 5  ;;  %v2432_v47 = vrot.slane %v2430_v25, 4 }
 0x14f   : > { %6099 = vmatprep.mubr.msk.bf16.mxu1 %vm686_vm3, %v5329_v41  ;;  %v2402_v12 = vshll.u32 %v6628_v33, 16  ;;  %v2406_v40 = vshrl.u32 %v6628_v33, 16  ;;  %v2380_v18 = vrot.slane %v2378_v53, 5  ;;  %v2398_v41 = vrot.slane %v2396_v42, 5 }
 0x150   : > { %v2422_v53 = vrot.slane %v2420_v6, 5 }
 0x151   : > { %v2404_v52 = vrot.slane %v2402_v12, 5  ;;  %v2408_v2 = vrot.slane %v2406_v40, 4  ;;  %v2381_v20 = vsel %vm6728_vm4, %v2376_v51, %v2380_v18  ;;  %v2433_v12 = vor.u32 %v2432_v47, %v2428_v21 }
 0x152   : > { %v2423_v33 = vor.u32 %v2422_v53, %v2419_v27 }
 0x153   : > { %v2409_v7 = vor.u32 %v2408_v2, %v2404_v52  ;;  %v2434_v13 = vrot.slane %v2433_v12, 4  ;;  %v8394_v2 = vld [vmem:[%s8497_s2] ss:$0 sm:$0xff] }
 0x154   : > { %v2424_v40 = vrot.slane %v2423_v33, 4 }
 0x155   : > { %6236 = vmatmul.mubr.msk.bf16.gmra.mrb[16].mxu0 %vm686_vm3, %v5606_v37  ;;  %v2385_v37 = vor.u32 %v2384_v11, %v2380_v18  ;;  %v2410_v15 = vrot.slane %v2409_v7, 4  ;;  %v2439_v9 = vsel %vm6728_vm4, %v2434_v13, %v2438_v17 }
 0x156   : > { %6100 = vmatmul.mubr.msk.bf16.vlgmr.msra.gmra.mrb[16].mxu1 %vm686_vm3, %v8096_v1  ;;  %6239 = vmatprep.mubr.msk.bf16.mxu0 %vm686_vm3, %v5607_v3  ;;  %v2399_v1 = vor.u32 %v2398_v41, %v2395_v19  ;;  %v5333_v3 = vcombine.low %v2357_v10, %v2367_v59  ;;  %v2429_v30 = vsel %vm6728_vm4, %v2424_v40, %v2428_v21 }
 0x157   : > { %6103 = vmatprep.mubr.msk.bf16.mxu1 %vm686_vm3, %v5331_v24  ;;  %v2386_v28 = vrot.slane %v2385_v37, 4  ;;  %v2415_v48 = vsel %vm6728_vm4, %v2410_v15, %v2414_v60  ;;  %v5336_v14 = vcombine.low %v2429_v30, %v2439_v9 }
 0x158   : > { %v2400_v46 = vrot.slane %v2399_v1, 4 }
 0x159   : > { %v2391_v42 = vsel %vm6728_vm4, %v2386_v28, %v2390_v45 }
 0x15a   : > { %v5334_v62 = vcombine.low %v2381_v20, %v2391_v42 }
 0x15d   : > { %6240 = vmatmul.mubr.msk.bf16.gmra.mrb[20].mxu0 %vm686_vm3, %v5608_v8  ;;  %v2405_v8 = vsel %vm6728_vm4, %v2400_v46, %v2404_v52 }
 0x15e   : > { %6104 = vmatmul.mubr.msk.bf16.gmra.mrb[20].mxu1 %vm686_vm3, %v5332_v44  ;;  %6243 = vmatprep.mubr.msk.bf16.mxu0 %vm686_vm3, %v5609_v56  ;;  %v5335_v56 = vcombine.low %v2405_v8, %v2415_v48 }
 0x15f   : > { %6107 = vmatprep.mubr.msk.bf16.mxu1 %vm686_vm3, %v5333_v3 }
 0x165   : > { %6244 = vmatmul.mubr.msk.bf16.gmra.mrb[24].mxu0 %vm686_vm3, %v5610_v43 }
 0x166   : > { %6108 = vmatmul.mubr.msk.bf16.gmra.mrb[24].mxu1 %vm686_vm3, %v5334_v62  ;;  %6247 = vmatprep.mubr.msk.bf16.mxu0 %vm686_vm3, %v5611_v50 }
 0x167   : > { %6111 = vmatprep.mubr.msk.bf16.mxu1 %vm686_vm3, %v5335_v56 }
 0x16d   : > { %6248 = vmatmul.mubr.msk.bf16.gmra.mrb[28].mxu0 %vm686_vm3, %v5612_v29 }
 0x16e   : > { %6112 = vmatmul.mubr.msk.bf16.gmra.mrb[28].mxu1 %vm686_vm3, %v5336_v14 }
 0x1e9   : > { %v6051_v63 = vpop.f32.mrb[0].mxu1 }
 0x1ea   : > { %v1849_v4 = vpop.f32.mrb[1].mxu1 }
 0x1eb   : > { %v6052_v43 = vpop.f32.mrb[2].mxu1 }
 0x1ec   : > { %v1852_v16 = vpop.f32.mrb[3].mxu1 }
 0x1f1   : > { %v6055_v58 = vpop.f32.mrb[4].mxu1 }
 0x1f2   : > { %v1865_v50 = vpop.f32.mrb[5].mxu1 }
 0x1f3   : > { %v6056_v54 = vpop.f32.mrb[6].mxu1 }
 0x1f4   : > { %v1868_v18 = vpop.f32.mrb[7].mxu1 }
 0x1f9   : > { %v6059_v11 = vpop.f32.mrb[8].mxu1 }
 0x1fa   : > { %v1881_v32 = vpop.f32.mrb[9].mxu1 }
 0x1fb   : > { %v8378_v24 = vpop.f32.mrb[10].mxu1 }
 0x1fc   : > { %v8380_v19 = vpop.f32.mrb[11].mxu1 }
 0x201   : > { %v8382_v5 = vpop.f32.mrb[12].mxu1 }
 0x202   : > { %v8384_v55 = vpop.f32.mrb[13].mxu1 }
 0x203   : > { %v8386_v29 = vpop.f32.mrb[14].mxu1 }
 0x204   : > { %v8388_v41 = vpop.f32.mrb[15].mxu1 }
 0x208   : > { %v6221_v52 = vpop.f32.mrb[0].mxu0 }
 0x209   : > { %v6253_v39 = vadd.f32 %v6221_v52, %v6051_v63  ;;  %v4600_v0 = vpop.f32.mrb[1].mxu0 }
 0x20a   : > { %v6254_v10 = vadd.f32 %v4600_v0, %v1849_v4  ;;  %v6222_v59 = vpop.f32.mrb[2].mxu0 }
 0x20b   : > { %v4768_v38 = vmul.f32 %v6253_v39, %v8394_v2  ;;  %v6255_v37 = vadd.f32 %v6222_v59, %v6052_v43  ;;  %v4603_v26 = vpop.f32.mrb[3].mxu0 }
 0x20c   : > { %v4766_v35 = vmul.f32 %v6254_v10, %v8394_v2  ;;  %v6256_v34 = vadd.f32 %v4603_v26, %v1852_v16 }
 0x20d   : > { %v4807_v6 = vadd.f32 %v8399_v36, %v4768_v38  ;;  %v4769_v49 = vmul.f32 %v6255_v37, %v8394_v2 }
 0x20e   : > { %v4805_v23 = vadd.f32 %v8399_v36, %v4766_v35  ;;  %v4767_v25 = vmul.f32 %v6256_v34, %v8394_v2 }
 0x20f   : > { %v4808_v1 = vadd.f32 %v8399_v36, %v4769_v49  ;;  %v4839_v22 = vmax.f32 %v4807_v6, 0.0 }
 0x210   : > { %v4806_v7 = vadd.f32 %v8399_v36, %v4767_v25  ;;  %v6225_v61 = vpop.f32.mrb[4].mxu0  ;;  %v4837_v28 = vmax.f32 %v4805_v23, 0.0 }
 0x211   : > { %v4840_v44 = vmax.f32 %v4808_v1, 0.0  ;;  %v6257_v3 = vadd.f32 %v6225_v61, %v6055_v58  ;;  %v4616_v51 = vpop.f32.mrb[5].mxu0 }
 0x212   : > { %v4838_v45 = vmax.f32 %v4806_v7, 0.0  ;;  %v6258_v27 = vadd.f32 %v4616_v51, %v1865_v50  ;;  %v6226_v53 = vpop.f32.mrb[6].mxu0 }
 0x213   : > { %v5705_v21 = vpack.c.bf16 %v4840_v44, %v4839_v22  ;;  %v4772_v47 = vmul.f32 %v6257_v3, %v8394_v2  ;;  %v6259_v46 = vadd.f32 %v6226_v53, %v6056_v54  ;;  %v4619_v15 = vpop.f32.mrb[7].mxu0 }
 0x214   : > { %v5700_v60 = vpack.c.bf16 %v4838_v45, %v4837_v28  ;;  %v4770_v20 = vmul.f32 %v6258_v27, %v8394_v2  ;;  %v6260_v42 = vadd.f32 %v4619_v15, %v1868_v18 }
 0x215   : > { %5777 = vst [vmem:[%s8412_s27 + $0x8] sm:$0xff] %v5705_v21   ;;  %v4811_v33 = vadd.f32 %v8399_v36, %v4772_v47  ;;  %v4773_v12 = vmul.f32 %v6259_v46, %v8394_v2 }
 0x216   : > { %5701 = vst [vmem:[%s8412_s27] sm:$0xff] %v5700_v60   ;;  %v4809_v31 = vadd.f32 %v8399_v36, %v4770_v20  ;;  %v4771_v57 = vmul.f32 %v6260_v42, %v8394_v2 }
 0x217   : > { %v4812_v8 = vadd.f32 %v8399_v36, %v4773_v12  ;;  %v4843_v56 = vmax.f32 %v4811_v33, 0.0 }
 0x218   : > { %v4810_v48 = vadd.f32 %v8399_v36, %v4771_v57  ;;  %v6229_v62 = vpop.f32.mrb[8].mxu0  ;;  %v4841_v30 = vmax.f32 %v4809_v31, 0.0 }
 0x219   : > { %v4844_v40 = vmax.f32 %v4812_v8, 0.0  ;;  %v6261_v13 = vadd.f32 %v6229_v62, %v6059_v11  ;;  %v4632_v17 = vpop.f32.mrb[9].mxu0 }
 0x21a   : > { %v4842_v9 = vmax.f32 %v4810_v48, 0.0  ;;  %v6262_v14 = vadd.f32 %v4632_v17, %v1881_v32  ;;  %v6230_v63 = vpop.f32.mrb[10].mxu0 }
 0x21b   : > { %v5715_v4 = vpack.c.bf16 %v4844_v40, %v4843_v56  ;;  %v4776_v43 = vmul.f32 %v6261_v13, %v8394_v2  ;;  %v6263_v16 = vadd.f32 %v6230_v63, %v8378_v24  ;;  %v4635_v58 = vpop.f32.mrb[11].mxu0 }
 0x21c   : > { %v5710_v50 = vpack.c.bf16 %v4842_v9, %v4841_v30  ;;  %v4774_v54 = vmul.f32 %v6262_v14, %v8394_v2  ;;  %v6264_v18 = vadd.f32 %v4635_v58, %v8380_v19 }
 0x21d   : > { %5779 = vst [vmem:[%s8412_s27 + $0x18] sm:$0xff] %v5715_v4   ;;  %v4815_v11 = vadd.f32 %v8399_v36, %v4776_v43  ;;  %v4777_v52 = vmul.f32 %v6263_v16, %v8394_v2 }
 0x21e   : > { %5778 = vst [vmem:[%s8412_s27 + $0x10] sm:$0xff] %v5710_v50   ;;  %v4813_v32 = vadd.f32 %v8399_v36, %v4774_v54  ;;  %v4775_v39 = vmul.f32 %v6264_v18, %v8394_v2 }
 0x21f   : > { %v4816_v0 = vadd.f32 %v8399_v36, %v4777_v52  ;;  %v4847_v59 = vmax.f32 %v4815_v11, 0.0 }
 0x220   : > { %v4814_v24 = vadd.f32 %v8399_v36, %v4775_v39  ;;  %v6233_v10 = vpop.f32.mrb[12].mxu0  ;;  %v4845_v26 = vmax.f32 %v4813_v32, 0.0 }
 0x221   : > { %v4848_v38 = vmax.f32 %v4816_v0, 0.0  ;;  %v6265_v19 = vadd.f32 %v6233_v10, %v8382_v5  ;;  %v4648_v37 = vpop.f32.mrb[13].mxu0 }
 0x222   : > { %v4846_v35 = vmax.f32 %v4814_v24, 0.0  ;;  %v6266_v34 = vadd.f32 %v4648_v37, %v8384_v55  ;;  %v6234_v6 = vpop.f32.mrb[14].mxu0 }
 0x223   : > { %v5725_v49 = vpack.c.bf16 %v4848_v38, %v4847_v59  ;;  %v4780_v23 = vmul.f32 %v6265_v19, %v8394_v2  ;;  %v6267_v25 = vadd.f32 %v6234_v6, %v8386_v29  ;;  %v4651_v1 = vpop.f32.mrb[15].mxu0 }
 0x224   : > { %v5720_v7 = vpack.c.bf16 %v4846_v35, %v4845_v26  ;;  %v4778_v61 = vmul.f32 %v6266_v34, %v8394_v2  ;;  %v6268_v22 = vadd.f32 %v4651_v1, %v8388_v41 }
 0x225   : > { %5781 = vst [vmem:[%s8412_s27 + $0x28] sm:$0xff] %v5725_v49   ;;  %v4819_v5 = vadd.f32 %v8399_v36, %v4780_v23  ;;  %v4781_v44 = vmul.f32 %v6267_v25, %v8394_v2 }
 0x226   : > { %5780 = vst [vmem:[%s8412_s27 + $0x20] sm:$0xff] %v5720_v7   ;;  %v4817_v55 = vadd.f32 %v8399_v36, %v4778_v61  ;;  %v4779_v3 = vmul.f32 %v6268_v22, %v8394_v2 }
 0x227   : > { %v4820_v51 = vadd.f32 %v8399_v36, %v4781_v44  ;;  %v4851_v45 = vmax.f32 %v4819_v5, 0.0 }
 0x228   : > { %v4818_v29 = vadd.f32 %v8399_v36, %v4779_v3  ;;  %v6237_v28 = vpop.f32.mrb[16].mxu0  ;;  %v4849_v21 = vmax.f32 %v4817_v55, 0.0 }
 0x229   : > { %v4852_v27 = vmax.f32 %v4820_v51, 0.0  ;;  %v6101_v53 = vpop.f32.mrb[16].mxu1  ;;  %v4664_v41 = vpop.f32.mrb[17].mxu0 }
 0x22a   : > { %v4850_v47 = vmax.f32 %v4818_v29, 0.0  ;;  %v6269_v46 = vadd.f32 %v6237_v28, %v6101_v53  ;;  %v2639_v15 = vpop.f32.mrb[17].mxu1  ;;  %v6238_v60 = vpop.f32.mrb[18].mxu0 }
 0x22b   : > { %v5735_v20 = vpack.c.bf16 %v4852_v27, %v4851_v45  ;;  %v6270_v42 = vadd.f32 %v4664_v41, %v2639_v15  ;;  %v6102_v33 = vpop.f32.mrb[18].mxu1  ;;  %v4667_v12 = vpop.f32.mrb[19].mxu0 }
 0x22c   : > { %v5730_v31 = vpack.c.bf16 %v4850_v47, %v4849_v21  ;;  %v4784_v57 = vmul.f32 %v6269_v46, %v8394_v2  ;;  %v6271_v8 = vadd.f32 %v6238_v60, %v6102_v33  ;;  %v2642_v48 = vpop.f32.mrb[19].mxu1 }
 0x22d   : > { %5783 = vst [vmem:[%s8412_s27 + $0x38] sm:$0xff] %v5735_v20   ;;  %v4782_v62 = vmul.f32 %v6270_v42, %v8394_v2  ;;  %v6272_v56 = vadd.f32 %v4667_v12, %v2642_v48 }
 0x22e   : > { %5782 = vst [vmem:[%s8412_s27 + $0x30] sm:$0xff] %v5730_v31   ;;  %v4823_v40 = vadd.f32 %v8399_v36, %v4784_v57  ;;  %v4785_v13 = vmul.f32 %v6271_v8, %v8394_v2 }
 0x22f   : > { %v4821_v17 = vadd.f32 %v8399_v36, %v4782_v62  ;;  %v4783_v30 = vmul.f32 %v6272_v56, %v8394_v2 }
 0x230   : > { %v4824_v9 = vadd.f32 %v8399_v36, %v4785_v13  ;;  %v6241_v14 = vpop.f32.mrb[20].mxu0  ;;  %v4855_v16 = vmax.f32 %v4823_v40, 0.0 }
 0x231   : > { %v4822_v63 = vadd.f32 %v8399_v36, %v4783_v30  ;;  %v6105_v4 = vpop.f32.mrb[20].mxu1  ;;  %v4680_v43 = vpop.f32.mrb[21].mxu0  ;;  %v4853_v11 = vmax.f32 %v4821_v17, 0.0 }
 0x232   : > { %v4856_v58 = vmax.f32 %v4824_v9, 0.0  ;;  %v6273_v50 = vadd.f32 %v6241_v14, %v6105_v4  ;;  %v2655_v54 = vpop.f32.mrb[21].mxu1  ;;  %v6242_v18 = vpop.f32.mrb[22].mxu0 }
 0x233   : > { %v4854_v52 = vmax.f32 %v4822_v63, 0.0  ;;  %v6274_v32 = vadd.f32 %v4680_v43, %v2655_v54  ;;  %v6106_v39 = vpop.f32.mrb[22].mxu1  ;;  %v4683_v0 = vpop.f32.mrb[23].mxu0 }
 0x234   : > { %v5745_v24 = vpack.c.bf16 %v4856_v58, %v4855_v16  ;;  %v4788_v10 = vmul.f32 %v6273_v50, %v8394_v2  ;;  %v6275_v59 = vadd.f32 %v6242_v18, %v6106_v39  ;;  %v2658_v38 = vpop.f32.mrb[23].mxu1 }
 0x235   : > { %v5740_v19 = vpack.c.bf16 %v4854_v52, %v4853_v11  ;;  %v4786_v37 = vmul.f32 %v6274_v32, %v8394_v2  ;;  %v6276_v26 = vadd.f32 %v4683_v0, %v2658_v38 }
 0x236   : > { %5785 = vst [vmem:[%s8412_s27 + $0x48] sm:$0xff] %v5745_v24   ;;  %v4827_v35 = vadd.f32 %v8399_v36, %v4788_v10  ;;  %v4789_v34 = vmul.f32 %v6275_v59, %v8394_v2 }
 0x237   : > { %5784 = vst [vmem:[%s8412_s27 + $0x40] sm:$0xff] %v5740_v19   ;;  %v4825_v6 = vadd.f32 %v8399_v36, %v4786_v37  ;;  %v4787_v49 = vmul.f32 %v6276_v26, %v8394_v2 }
 0x238   : > { %v4828_v23 = vadd.f32 %v8399_v36, %v4789_v34  ;;  %v6245_v25 = vpop.f32.mrb[24].mxu0  ;;  %v4859_v22 = vmax.f32 %v4827_v35, 0.0 }
 0x239   : > { %v4826_v1 = vadd.f32 %v8399_v36, %v4787_v49  ;;  %v6109_v7 = vpop.f32.mrb[24].mxu1  ;;  %v4696_v61 = vpop.f32.mrb[25].mxu0  ;;  %v4857_v51 = vmax.f32 %v4825_v6, 0.0 }
 0x23a   : > { %v4860_v5 = vmax.f32 %v4828_v23, 0.0  ;;  %v6277_v44 = vadd.f32 %v6245_v25, %v6109_v7  ;;  %v2671_v55 = vpop.f32.mrb[25].mxu1  ;;  %v6246_v3 = vpop.f32.mrb[26].mxu0 }
 0x23b   : > { %v4858_v29 = vmax.f32 %v4826_v1, 0.0  ;;  %v6278_v28 = vadd.f32 %v4696_v61, %v2671_v55  ;;  %v6110_v45 = vpop.f32.mrb[26].mxu1  ;;  %v4699_v27 = vpop.f32.mrb[27].mxu0 }
 0x23c   : > { %v5755_v53 = vpack.c.bf16 %v4860_v5, %v4859_v22  ;;  %v4792_v41 = vmul.f32 %v6277_v44, %v8394_v2  ;;  %v6279_v21 = vadd.f32 %v6246_v3, %v6110_v45  ;;  %v2674_v47 = vpop.f32.mrb[27].mxu1 }
 0x23d   : > { %v5750_v46 = vpack.c.bf16 %v4858_v29, %v4857_v51  ;;  %v4790_v15 = vmul.f32 %v6278_v28, %v8394_v2  ;;  %v6280_v60 = vadd.f32 %v4699_v27, %v2674_v47 }
 0x23e   : > { %5787 = vst [vmem:[%s8412_s27 + $0x58] sm:$0xff] %v5755_v53   ;;  %v4831_v20 = vadd.f32 %v8399_v36, %v4792_v41  ;;  %v4793_v42 = vmul.f32 %v6279_v21, %v8394_v2 }
 0x23f   : > { %5786 = vst [vmem:[%s8412_s27 + $0x50] sm:$0xff] %v5750_v46   ;;  %v4829_v33 = vadd.f32 %v8399_v36, %v4790_v15  ;;  %v4791_v12 = vmul.f32 %v6280_v60, %v8394_v2 }
 0x240   : > { %v4832_v31 = vadd.f32 %v8399_v36, %v4793_v42  ;;  %v6249_v57 = vpop.f32.mrb[28].mxu0  ;;  %v4863_v56 = vmax.f32 %v4831_v20, 0.0 }
 0x241   : > { %v4830_v8 = vadd.f32 %v8399_v36, %v4791_v12  ;;  %v6113_v48 = vpop.f32.mrb[28].mxu1  ;;  %v4712_v62 = vpop.f32.mrb[29].mxu0  ;;  %v4861_v9 = vmax.f32 %v4829_v33, 0.0 }
 0x242   : > { %v4864_v40 = vmax.f32 %v4832_v31, 0.0  ;;  %v6281_v13 = vadd.f32 %v6249_v57, %v6113_v48  ;;  %v2687_v17 = vpop.f32.mrb[29].mxu1  ;;  %v6250_v30 = vpop.f32.mrb[30].mxu0 }
 0x243   : > { %v4862_v14 = vmax.f32 %v4830_v8, 0.0  ;;  %v6282_v63 = vadd.f32 %v4712_v62, %v2687_v17  ;;  %v6114_v4 = vpop.f32.mrb[30].mxu1  ;;  %v4715_v43 = vpop.f32.mrb[31].mxu0 }
 0x244   : > { %v5765_v16 = vpack.c.bf16 %v4864_v40, %v4863_v56  ;;  %v4796_v58 = vmul.f32 %v6281_v13, %v8394_v2  ;;  %v6283_v50 = vadd.f32 %v6250_v30, %v6114_v4  ;;  %v2690_v54 = vpop.f32.mrb[31].mxu1 }
 0x245   : > { %v5760_v18 = vpack.c.bf16 %v4862_v14, %v4861_v9  ;;  %v4794_v11 = vmul.f32 %v6282_v63, %v8394_v2  ;;  %v6284_v52 = vadd.f32 %v4715_v43, %v2690_v54 }
 0x246   : > { %5789 = vst [vmem:[%s8412_s27 + $0x68] sm:$0xff] %v5765_v16   ;;  %v4835_v32 = vadd.f32 %v8399_v36, %v4796_v58  ;;  %v4797_v39 = vmul.f32 %v6283_v50, %v8394_v2 }
 0x247   : > { %5788 = vst [vmem:[%s8412_s27 + $0x60] sm:$0xff] %v5760_v18   ;;  %v4833_v0 = vadd.f32 %v8399_v36, %v4794_v11  ;;  %v4795_v24 = vmul.f32 %v6284_v52, %v8394_v2 }
 0x248   : > { %v4836_v10 = vadd.f32 %v8399_v36, %v4797_v39  ;;  %v4867_v38 = vmax.f32 %v4835_v32, 0.0 }
 0x249   : > { %v4834_v59 = vadd.f32 %v8399_v36, %v4795_v24  ;;  %v4865_v37 = vmax.f32 %v4833_v0, 0.0 }
 0x24a   : > { %v4868_v19 = vmax.f32 %v4836_v10, 0.0 }
 0x24b   : > { %v4866_v26 = vmax.f32 %v4834_v59, 0.0 }
 0x24c   : > { %v5775_v35 = vpack.c.bf16 %v4868_v19, %v4867_v38 }
 0x24d   : > { %v5770_v34 = vpack.c.bf16 %v4866_v26, %v4865_v37 }
 0x24e   : > { %5791 = vst [vmem:[%s8412_s27 + $0x78] sm:$0xff] %v5775_v35  }
 0x24f   : > { %5790 = vst [vmem:[%s8412_s27 + $0x70] sm:$0xff] %v5770_v34  }
 0x250 PF: > { %s14_s15 = sadd.s32 1, %s6639_s15  }
 0x251   : > { %p11_p5 = scmp.ge.s32.totalorder %s14_s15, 4  }
 0x253   :  { %13 = sbr.rel (!%p11_p5) target bundleno = 1 (0x1), region = 76 }

</bundles_post_ra>
